<compile_context>
chip_gen: v7x
topology: tpu7x:2x2x1
jax: 0.10.0
libtpu: 0.0.40
codegen_flags: <defaults>
</compile_context>

<pallas_src>
import functools

import jax
import jax.numpy as jnp
from jax.experimental import pallas as pl
from jax.experimental.pallas import tpu as pltpu


# ------------------------------- kernel -------------------------------------


def _transformer_kernel(state_ref, in_w_ref, in_b_ref, cls_ref,
                        wqkv_ref, bqkv_ref, wo_ref, bo_ref,
                        g1_ref, be1_ref, w1_ref, b1_ref,
                        w2_ref, b2_ref, g2_ref, be2_ref,
                        out_ref, x_ref,
                        *, B, S, T, D, H, HD, eps):
    layer = pl.program_id(0)
    last = pl.num_programs(0) - 1

    # ---- grid step 0: input projection + cls prepend, written to the
    #      resident (B*T, D) VMEM activation slab with ONE full store.
    @pl.when(layer == 0)
    def _init():
        x0 = (jnp.dot(state_ref[...], in_w_ref[...],
                      preferred_element_type=jnp.float32)
              + in_b_ref[...])                                  # (B*S, D)
        cls = cls_ref[...]                                      # (1, D)
        rows = []
        for b in range(B):
            rows.append(cls)
            rows.append(x0[b * S:(b + 1) * S, :])
        x_ref[...] = jnp.concatenate(rows, axis=0)              # (B*T, D)

    # ---- per-layer weights (pipelined in across the layer grid axis) ----
    wqkv = wqkv_ref[0]                        # (D, 3D)   q-columns pre-scaled
    bqkv = bqkv_ref[0]                        # (1, 3D)
    wo, bo = wo_ref[0], bo_ref[0]             # (D, D), (1, D)
    g1, be1 = g1_ref[0], be1_ref[0]
    w1, b1 = w1_ref[0], b1_ref[0]             # (D, F), (1, F)
    w2, b2 = w2_ref[0], b2_ref[0]             # (F, D), (1, D)
    g2, be2 = g2_ref[0], be2_ref[0]

    def layer_norm(v, g, b):
        mu = jnp.mean(v, axis=-1, keepdims=True)
        vc = v - mu
        var = jnp.mean(vc * vc, axis=-1, keepdims=True)   # biased var (PyTorch LN)
        return vc * jax.lax.rsqrt(var + eps) * g + b

    def post_block(x_rows, attn_rows):
        # attn_rows already includes the out-projection + bias.
        h1 = layer_norm(x_rows + attn_rows, g1, be1)
        f = jnp.maximum(
            jnp.dot(h1, w1, preferred_element_type=jnp.float32) + b1, 0.0)
        f = jnp.dot(f, w2, preferred_element_type=jnp.float32) + b2
        return layer_norm(h1 + f, g2, be2)

    # ---- whole-slab QKV projection (one matmul for all B*T rows) ----
    x_all = x_ref[...]                                           # (B*T, D)
    qkv = jnp.dot(x_all, wqkv, preferred_element_type=jnp.float32) + bqkv

    # ---- tiny per-(batch, head) softmax attention on static slices ----
    ctx_rows = []
    for b in range(B):
        qkv_b = qkv[b * T:(b + 1) * T, :]                        # (T, 3D)
        heads = []
        for h in range(H):
            q = qkv_b[:, h * HD:(h + 1) * HD]                    # (T, HD)
            k = qkv_b[:, D + h * HD:D + (h + 1) * HD]            # (T, HD)
            v = qkv_b[:, 2 * D + h * HD:2 * D + (h + 1) * HD]    # (T, HD)
            s = jnp.einsum("qd,kd->qk", q, k,
                           preferred_element_type=jnp.float32)   # (T, T)
            m = jnp.max(s, axis=-1, keepdims=True)
            e = jnp.exp(s - m)
            p = e * pl.reciprocal(jnp.sum(e, axis=-1, keepdims=True),
                                  approx=True)
            heads.append(jnp.dot(p, v, preferred_element_type=jnp.float32))
        ctx_rows.append(jnp.concatenate(heads, axis=-1))         # (T, D)
    ctx = jnp.concatenate(ctx_rows, axis=0)                      # (B*T, D)

    # ---- single out-projection matmul for the whole slab ----
    attn = jnp.dot(ctx, wo, preferred_element_type=jnp.float32) + bo

    @pl.when(layer < last)
    def _mid():
        x_ref[...] = post_block(x_all, attn)

    @pl.when(layer == last)
    def _final():
        # Module returns only sequence position 0 -> FFN on the CLS rows.
        cls_x = jnp.concatenate(
            [x_all[b * T:b * T + 1, :] for b in range(B)], axis=0)   # (B, D)
        cls_a = jnp.concatenate(
            [attn[b * T:b * T + 1, :] for b in range(B)], axis=0)    # (B, D)
        out_ref[...] = post_block(cls_x, cls_a)


# ------------------------------ wrapper --------------------------------------


def transformer_forward(state, packed, *, nhead):
    B, S, Din = state.shape
    D = packed["in_w"].shape[1]
    F = packed["w1"].shape[-1]
    L = packed["wqkv"].shape[0]
    T = S + 1
    HD = D // nhead

    state2d = state.reshape(B * S, Din)      # flat rows -> one in-kernel matmul

    def const_spec(shape):
        nd = len(shape)

        def imap(l):
            return (0,) * nd
        return pl.BlockSpec(shape, imap)

    def layer_spec(tail):
        nd = len(tail)

        def imap(l):
            return (l,) + (0,) * nd
        return pl.BlockSpec((1,) + tail, imap)

    kernel = functools.partial(_transformer_kernel,
                               B=B, S=S, T=T, D=D, H=nhead, HD=HD, eps=1e-5)

    grid_spec = pltpu.PrefetchScalarGridSpec(
        num_scalar_prefetch=0,
        grid=(L,),
        in_specs=[
            const_spec((B * S, Din)),       # state (flattened rows)
            const_spec((Din, D)),           # in_w
            const_spec((1, D)),             # in_b
            const_spec((1, D)),             # cls token
            layer_spec((D, 3 * D)),         # wqkv (packed, q pre-scaled)
            layer_spec((1, 3 * D)),         # bqkv
            layer_spec((D, D)),             # wo
            layer_spec((1, D)),             # bo
            layer_spec((1, D)),             # ln1 gamma
            layer_spec((1, D)),             # ln1 beta
            layer_spec((D, F)),             # w1
            layer_spec((1, F)),             # b1
            layer_spec((F, D)),             # w2
            layer_spec((1, D)),             # b2
            layer_spec((1, D)),             # ln2 gamma
            layer_spec((1, D)),             # ln2 beta
        ],
        out_specs=pl.BlockSpec((B, D), lambda l: (0, 0)),
        scratch_shapes=[pltpu.VMEM((B * T, D), jnp.float32)],
    )

    return pl.pallas_call(
        kernel,
        out_shape=jax.ShapeDtypeStruct((B, D), jnp.float32),
        grid_spec=grid_spec,
        compiler_params=pltpu.CompilerParams(
            dimension_semantics=("arbitrary",)),
    )(state2d, packed["in_w"], packed["in_b"], packed["cls"],
      packed["wqkv"], packed["bqkv"], packed["wo"], packed["bo"],
      packed["ln1_g"], packed["ln1_b"], packed["w1"], packed["b1"],
      packed["w2"], packed["b2"], packed["ln2_g"], packed["ln2_b"])


# --------------------------- params & packing --------------------------------


def init_params(key, in_dim, d_model, d_ff, num_layers):
    """Deterministic synthetic init (shapes match the PyTorch module)."""
    def lin(k, fan_in, fan_out):
        kw, kb = jax.random.split(k)
        bound = 1.0 / (fan_in ** 0.5)
        w = jax.random.uniform(kw, (fan_in, fan_out), jnp.float32, -bound, bound)
        b = jax.random.uniform(kb, (fan_out,), jnp.float32, -bound, bound)
        return w, b

    keys = jax.random.split(key, 1 + num_layers)
    params = {}
    params["in_w"], params["in_b"] = lin(keys[0], in_dim, d_model)
    params["cls"] = jnp.zeros((d_model,), jnp.float32)  # nn.Parameter(torch.zeros(emb))
    layers = []
    for i in range(num_layers):
        k = jax.random.split(keys[1 + i], 6)
        wq, bq = lin(k[0], d_model, d_model)
        wk, bk = lin(k[1], d_model, d_model)
        wv, bv = lin(k[2], d_model, d_model)
        wo, bo = lin(k[3], d_model, d_model)
        w1, b1 = lin(k[4], d_model, d_ff)
        w2, b2 = lin(k[5], d_ff, d_model)
        layers.append(dict(
            wq=wq, bq=bq, wk=wk, bk=bk, wv=wv, bv=bv, wo=wo, bo=bo,
            w1=w1, b1=b1, w2=w2, b2=b2,
            ln1_g=jnp.ones((d_model,), jnp.float32),
            ln1_b=jnp.zeros((d_model,), jnp.float32),
            ln2_g=jnp.ones((d_model,), jnp.float32),
            ln2_b=jnp.zeros((d_model,), jnp.float32)))
    params["layers"] = layers
    return params


def pack_params(params, nhead):
    """Stack per-layer weights (leading layer axis), pack QKV, fold 1/sqrt(hd)."""
    D = params["in_w"].shape[1]
    scale = 1.0 / ((D // nhead) ** 0.5)
    layers = params["layers"]
    row = lambda v: v.reshape(1, -1)
    return {
        "in_w": params["in_w"],
        "in_b": row(params["in_b"]),
        "cls": row(params["cls"]),
        "wqkv": jnp.stack([jnp.concatenate(
            [lp["wq"] * scale, lp["wk"], lp["wv"]], axis=1) for lp in layers]),
        "bqkv": jnp.stack([row(jnp.concatenate(
            [lp["bq"] * scale, lp["bk"], lp["bv"]])) for lp in layers]),
        "wo": jnp.stack([lp["wo"] for lp in layers]),
        "bo": jnp.stack([row(lp["bo"]) for lp in layers]),
        "ln1_g": jnp.stack([row(lp["ln1_g"]) for lp in layers]),
        "ln1_b": jnp.stack([row(lp["ln1_b"]) for lp in layers]),
        "w1": jnp.stack([lp["w1"] for lp in layers]),
        "b1": jnp.stack([row(lp["b1"]) for lp in layers]),
        "w2": jnp.stack([lp["w2"] for lp in layers]),
        "b2": jnp.stack([row(lp["b2"]) for lp in layers]),
        "ln2_g": jnp.stack([row(lp["ln2_g"]) for lp in layers]),
        "ln2_b": jnp.stack([row(lp["ln2_b"]) for lp in layers]),
    }


# -------------------------------- main ---------------------------------------

if __name__ == "__main__":
    B, S, in_dim = 2, 8, 16
    d_model, nhead, num_layers = 32, 4, 2
    d_ff = 2048  # nn.TransformerEncoderLayer default dim_feedforward

    key = jax.random.PRNGKey(0)
    kx, kp = jax.random.split(key)
    state = jax.random.normal(kx, (B, S, in_dim), dtype=jnp.float32)
    params = init_params(kp, in_dim, d_model, d_ff, num_layers)
    packed = pack_params(params, nhead)

    fwd = jax.jit(functools.partial(transformer_forward, nhead=nhead))
    out = fwd(state, packed)
    jax.block_until_ready(out)
    assert out.shape == (B, d_model) and out.dtype == jnp.float32
    print("KERNEL_OK")
</pallas_src>

<mosaic_0001>
module attributes {stable_mosaic.version = 11 : i64} {
  func.func @_transformer_kernel(%arg0: i32, %arg1: memref<16x16xf32, #tpu.memory_space<vmem>>, %arg2: memref<16x32xf32, #tpu.memory_space<vmem>>, %arg3: memref<1x32xf32, #tpu.memory_space<vmem>>, %arg4: memref<1x32xf32, #tpu.memory_space<vmem>>, %arg5: memref<1x32x96xf32, #tpu.memory_space<vmem>>, %arg6: memref<1x1x96xf32, #tpu.memory_space<vmem>>, %arg7: memref<1x32x32xf32, #tpu.memory_space<vmem>>, %arg8: memref<1x1x32xf32, #tpu.memory_space<vmem>>, %arg9: memref<1x1x32xf32, #tpu.memory_space<vmem>>, %arg10: memref<1x1x32xf32, #tpu.memory_space<vmem>>, %arg11: memref<1x32x2048xf32, #tpu.memory_space<vmem>>, %arg12: memref<1x1x2048xf32, #tpu.memory_space<vmem>>, %arg13: memref<1x2048x32xf32, #tpu.memory_space<vmem>>, %arg14: memref<1x1x32xf32, #tpu.memory_space<vmem>>, %arg15: memref<1x1x32xf32, #tpu.memory_space<vmem>>, %arg16: memref<1x1x32xf32, #tpu.memory_space<vmem>>, %arg17: memref<2x32xf32, #tpu.memory_space<vmem>>, %arg18: memref<18x32xf32, #tpu.memory_space<vmem>>) attributes {dimension_semantics = [#tpu.dimension_semantics<arbitrary>], iteration_bounds = array<i64: 2>, scalar_prefetch = 0 : i64, scratch_operands = 1 : i64, tpu.core_type = #tpu.core_type<tc>, window_params = [{pipeline_mode = #tpu.pipeline_mode<synchronous>, transform_indices = @transform_0, window_bounds = array<i64: 16, 16>}, {pipeline_mode = #tpu.pipeline_mode<synchronous>, transform_indices = @transform_1, window_bounds = array<i64: 16, 32>}, {pipeline_mode = #tpu.pipeline_mode<synchronous>, transform_indices = @transform_2, window_bounds = array<i64: 1, 32>}, {pipeline_mode = #tpu.pipeline_mode<synchronous>, transform_indices = @transform_3, window_bounds = array<i64: 1, 32>}, {transform_indices = @transform_4, window_bounds = array<i64: 1, 32, 96>}, {transform_indices = @transform_5, window_bounds = array<i64: 1, 1, 96>}, {transform_indices = @transform_6, window_bounds = array<i64: 1, 32, 32>}, {transform_indices = @transform_7, window_bounds = array<i64: 1, 1, 32>}, {transform_indices = @transform_8, window_bounds = array<i64: 1, 1, 32>}, {transform_indices = @transform_9, window_bounds = array<i64: 1, 1, 32>}, {transform_indices = @transform_10, window_bounds = array<i64: 1, 32, 2048>}, {transform_indices = @transform_11, window_bounds = array<i64: 1, 1, 2048>}, {transform_indices = @transform_12, window_bounds = array<i64: 1, 2048, 32>}, {transform_indices = @transform_13, window_bounds = array<i64: 1, 1, 32>}, {transform_indices = @transform_14, window_bounds = array<i64: 1, 1, 32>}, {transform_indices = @transform_15, window_bounds = array<i64: 1, 1, 32>}, {pipeline_mode = #tpu.pipeline_mode<synchronous>, transform_indices = @transform_16, window_bounds = array<i64: 2, 32>}]} {
    %c0_i32 = arith.constant 0 : i32
    %0 = arith.cmpi eq, %arg0, %c0_i32 : i32
    %1 = arith.extui %0 : i1 to i32
    %c0_i32_0 = arith.constant 0 : i32
    %2 = arith.cmpi ne, %1, %c0_i32_0 : i32
    scf.if %2 {
      %c0_74 = arith.constant 0 : index
      %c0_75 = arith.constant 0 : index
      %165 = vector.load %arg1[%c0_74, %c0_75] : memref<16x16xf32, #tpu.memory_space<vmem>>, vector<16x16xf32>
      %c0_76 = arith.constant 0 : index
      %c0_77 = arith.constant 0 : index
      %166 = vector.load %arg2[%c0_76, %c0_77] : memref<16x32xf32, #tpu.memory_space<vmem>>, vector<16x32xf32>
      %cst_78 = arith.constant dense<0.000000e+00> : vector<16x32xf32>
      %167 = tpu.matmul %165, %166, %cst_78 {dimension_numbers = #tpu.dot_dimension_numbers<[1], [0], [0], [1], [0, 0, 1, 1], [], []>} : vector<16x16xf32>, vector<16x32xf32>, vector<16x32xf32> -> vector<16x32xf32>
      %c0_79 = arith.constant 0 : index
      %c0_80 = arith.constant 0 : index
      %168 = vector.load %arg3[%c0_79, %c0_80] : memref<1x32xf32, #tpu.memory_space<vmem>>, vector<1x32xf32>
      %169 = vector.broadcast %168 : vector<1x32xf32> to vector<16x32xf32>
      %170 = arith.addf %167, %169 : vector<16x32xf32>
      %c0_81 = arith.constant 0 : index
      %c0_82 = arith.constant 0 : index
      %171 = vector.load %arg4[%c0_81, %c0_82] : memref<1x32xf32, #tpu.memory_space<vmem>>, vector<1x32xf32>
      %172 = vector.extract_strided_slice %170 {offsets = [0, 0], sizes = [8, 32], strides = [1, 1]} : vector<16x32xf32> to vector<8x32xf32>
      %173 = vector.extract_strided_slice %170 {offsets = [8, 0], sizes = [8, 32], strides = [1, 1]} : vector<16x32xf32> to vector<8x32xf32>
      %174 = tpu.concatenate %171, %172, %171, %173 in 0 : vector<1x32xf32>, vector<8x32xf32>, vector<1x32xf32>, vector<8x32xf32> -> vector<18x32xf32>
      %c0_83 = arith.constant 0 : index
      %c0_84 = arith.constant 0 : index
      %175 = vector.load %arg18[%c0_83, %c0_84] : memref<18x32xf32, #tpu.memory_space<vmem>>, vector<18x32xf32>
      tpu.vector_store %arg18[%c0_83, %c0_84], %174 {strides = array<i32>} : memref<18x32xf32, #tpu.memory_space<vmem>>, vector<18x32xf32>,
    } else {
    }
    %c0 = arith.constant 0 : index
    %c0_1 = arith.constant 0 : index
    %c0_2 = arith.constant 0 : index
    %3 = vector.load %arg5[%c0, %c0_1, %c0_2] : memref<1x32x96xf32, #tpu.memory_space<vmem>>, vector<1x32x96xf32>
    %4 = vector.shape_cast %3 : vector<1x32x96xf32> to vector<32x96xf32>
    %c0_3 = arith.constant 0 : index
    %c0_4 = arith.constant 0 : index
    %c0_5 = arith.constant 0 : index
    %5 = vector.load %arg6[%c0_3, %c0_4, %c0_5] : memref<1x1x96xf32, #tpu.memory_space<vmem>>, vector<1x1x96xf32>
    %6 = vector.shape_cast %5 : vector<1x1x96xf32> to vector<1x96xf32>
    %c0_6 = arith.constant 0 : index
    %c0_7 = arith.constant 0 : index
    %c0_8 = arith.constant 0 : index
    %7 = vector.load %arg7[%c0_6, %c0_7, %c0_8] : memref<1x32x32xf32, #tpu.memory_space<vmem>>, vector<1x32x32xf32>
    %8 = vector.shape_cast %7 : vector<1x32x32xf32> to vector<32x32xf32>
    %c0_9 = arith.constant 0 : index
    %c0_10 = arith.constant 0 : index
    %c0_11 = arith.constant 0 : index
    %9 = vector.load %arg8[%c0_9, %c0_10, %c0_11] : memref<1x1x32xf32, #tpu.memory_space<vmem>>, vector<1x1x32xf32>
    %10 = vector.shape_cast %9 : vector<1x1x32xf32> to vector<1x32xf32>
    %c0_12 = arith.constant 0 : index
    %c0_13 = arith.constant 0 : index
    %c0_14 = arith.constant 0 : index
    %11 = vector.load %arg9[%c0_12, %c0_13, %c0_14] : memref<1x1x32xf32, #tpu.memory_space<vmem>>, vector<1x1x32xf32>
    %12 = vector.shape_cast %11 : vector<1x1x32xf32> to vector<1x32xf32>
    %c0_15 = arith.constant 0 : index
    %c0_16 = arith.constant 0 : index
    %c0_17 = arith.constant 0 : index
    %13 = vector.load %arg10[%c0_15, %c0_16, %c0_17] : memref<1x1x32xf32, #tpu.memory_space<vmem>>, vector<1x1x32xf32>
    %14 = vector.shape_cast %13 : vector<1x1x32xf32> to vector<1x32xf32>
    %c0_18 = arith.constant 0 : index
    %c0_19 = arith.constant 0 : index
    %c0_20 = arith.constant 0 : index
    %15 = vector.load %arg11[%c0_18, %c0_19, %c0_20] : memref<1x32x2048xf32, #tpu.memory_space<vmem>>, vector<1x32x2048xf32>
    %16 = vector.shape_cast %15 : vector<1x32x2048xf32> to vector<32x2048xf32>
    %c0_21 = arith.constant 0 : index
    %c0_22 = arith.constant 0 : index
    %c0_23 = arith.constant 0 : index
    %17 = vector.load %arg12[%c0_21, %c0_22, %c0_23] : memref<1x1x2048xf32, #tpu.memory_space<vmem>>, vector<1x1x2048xf32>
    %18 = vector.shape_cast %17 : vector<1x1x2048xf32> to vector<1x2048xf32>
    %c0_24 = arith.constant 0 : index
    %c0_25 = arith.constant 0 : index
    %c0_26 = arith.constant 0 : index
    %19 = vector.load %arg13[%c0_24, %c0_25, %c0_26] : memref<1x2048x32xf32, #tpu.memory_space<vmem>>, vector<1x2048x32xf32>
    %20 = vector.shape_cast %19 : vector<1x2048x32xf32> to vector<2048x32xf32>
    %c0_27 = arith.constant 0 : index
    %c0_28 = arith.constant 0 : index
    %c0_29 = arith.constant 0 : index
    %21 = vector.load %arg14[%c0_27, %c0_28, %c0_29] : memref<1x1x32xf32, #tpu.memory_space<vmem>>, vector<1x1x32xf32>
    %22 = vector.shape_cast %21 : vector<1x1x32xf32> to vector<1x32xf32>
    %c0_30 = arith.constant 0 : index
    %c0_31 = arith.constant 0 : index
    %c0_32 = arith.constant 0 : index
    %23 = vector.load %arg15[%c0_30, %c0_31, %c0_32] : memref<1x1x32xf32, #tpu.memory_space<vmem>>, vector<1x1x32xf32>
    %24 = vector.shape_cast %23 : vector<1x1x32xf32> to vector<1x32xf32>
    %c0_33 = arith.constant 0 : index
    %c0_34 = arith.constant 0 : index
    %c0_35 = arith.constant 0 : index
    %25 = vector.load %arg16[%c0_33, %c0_34, %c0_35] : memref<1x1x32xf32, #tpu.memory_space<vmem>>, vector<1x1x32xf32>
    %26 = vector.shape_cast %25 : vector<1x1x32xf32> to vector<1x32xf32>
    %c0_36 = arith.constant 0 : index
    %c0_37 = arith.constant 0 : index
    %27 = vector.load %arg18[%c0_36, %c0_37] : memref<18x32xf32, #tpu.memory_space<vmem>>, vector<18x32xf32>
    %cst = arith.constant dense<0.000000e+00> : vector<18x96xf32>
    %28 = tpu.matmul %27, %4, %cst {dimension_numbers = #tpu.dot_dimension_numbers<[1], [0], [0], [1], [0, 0, 1, 1], [], []>} : vector<18x32xf32>, vector<32x96xf32>, vector<18x96xf32> -> vector<18x96xf32>
    %29 = vector.broadcast %6 : vector<1x96xf32> to vector<18x96xf32>
    %30 = arith.addf %28, %29 : vector<18x96xf32>
    %31 = vector.extract_strided_slice %30 {offsets = [0, 0], sizes = [9, 96], strides = [1, 1]} : vector<18x96xf32> to vector<9x96xf32>
    %32 = vector.extract_strided_slice %31 {offsets = [0, 0], sizes = [9, 8], strides = [1, 1]} : vector<9x96xf32> to vector<9x8xf32>
    %33 = vector.extract_strided_slice %31 {offsets = [0, 32], sizes = [9, 8], strides = [1, 1]} : vector<9x96xf32> to vector<9x8xf32>
    %34 = vector.extract_strided_slice %31 {offsets = [0, 64], sizes = [9, 8], strides = [1, 1]} : vector<9x96xf32> to vector<9x8xf32>
    "tpu.trace_start"() <{level = 10 : i32, message = "qd,kd->qk"}> : () -> ()
    %cst_38 = arith.constant dense<0.000000e+00> : vector<9x9xf32>
    %35 = tpu.matmul %32, %33, %cst_38 {dimension_numbers = #tpu.dot_dimension_numbers<[1], [1], [0], [0], [0, 0, 1, 0], [], []>} : vector<9x8xf32>, vector<9x8xf32>, vector<9x9xf32> -> vector<9x9xf32>
    "tpu.trace_stop"() : () -> ()
    %cst_39 = arith.constant dense<0xFF800000> : vector<9xf32>
    %36 = vector.multi_reduction <maximumf>, %35, %cst_39 [1] : vector<9x9xf32> to vector<9xf32>
    %37 = vector.shape_cast %36 : vector<9xf32> to vector<9x1xf32>
    %38 = vector.broadcast %37 : vector<9x1xf32> to vector<9x9xf32>
    %39 = arith.subf %35, %38 : vector<9x9xf32>
    %40 = math.exp %39 : vector<9x9xf32>
    %cst_40 = arith.constant dense<0.000000e+00> : vector<9xf32>
    %41 = vector.multi_reduction <add>, %40, %cst_40 [1] : vector<9x9xf32> to vector<9xf32>
    %42 = vector.shape_cast %41 : vector<9xf32> to vector<9x1xf32>
    %43 = tpu.reciprocal %42 {approx = true} : vector<9x1xf32> -> vector<9x1xf32>
    %44 = vector.broadcast %43 : vector<9x1xf32> to vector<9x9xf32>
    %45 = arith.mulf %40, %44 : vector<9x9xf32>
    %cst_41 = arith.constant dense<0.000000e+00> : vector<9x8xf32>
    %46 = tpu.matmul %45, %34, %cst_41 {dimension_numbers = #tpu.dot_dimension_numbers<[1], [0], [0], [1], [0, 0, 1, 1], [], []>} : vector<9x9xf32>, vector<9x8xf32>, vector<9x8xf32> -> vector<9x8xf32>
    %47 = vector.extract_strided_slice %31 {offsets = [0, 8], sizes = [9, 8], strides = [1, 1]} : vector<9x96xf32> to vector<9x8xf32>
    %48 = vector.extract_strided_slice %31 {offsets = [0, 40], sizes = [9, 8], strides = [1, 1]} : vector<9x96xf32> to vector<9x8xf32>
    %49 = vector.extract_strided_slice %31 {offsets = [0, 72], sizes = [9, 8], strides = [1, 1]} : vector<9x96xf32> to vector<9x8xf32>
    "tpu.trace_start"() <{level = 10 : i32, message = "qd,kd->qk"}> : () -> ()
    %cst_42 = arith.constant dense<0.000000e+00> : vector<9x9xf32>
    %50 = tpu.matmul %47, %48, %cst_42 {dimension_numbers = #tpu.dot_dimension_numbers<[1], [1], [0], [0], [0, 0, 1, 0], [], []>} : vector<9x8xf32>, vector<9x8xf32>, vector<9x9xf32> -> vector<9x9xf32>
    "tpu.trace_stop"() : () -> ()
    %cst_43 = arith.constant dense<0xFF800000> : vector<9xf32>
    %51 = vector.multi_reduction <maximumf>, %50, %cst_43 [1] : vector<9x9xf32> to vector<9xf32>
    %52 = vector.shape_cast %51 : vector<9xf32> to vector<9x1xf32>
    %53 = vector.broadcast %52 : vector<9x1xf32> to vector<9x9xf32>
    %54 = arith.subf %50, %53 : vector<9x9xf32>
    %55 = math.exp %54 : vector<9x9xf32>
    %cst_44 = arith.constant dense<0.000000e+00> : vector<9xf32>
    %56 = vector.multi_reduction <add>, %55, %cst_44 [1] : vector<9x9xf32> to vector<9xf32>
    %57 = vector.shape_cast %56 : vector<9xf32> to vector<9x1xf32>
    %58 = tpu.reciprocal %57 {approx = true} : vector<9x1xf32> -> vector<9x1xf32>
    %59 = vector.broadcast %58 : vector<9x1xf32> to vector<9x9xf32>
    %60 = arith.mulf %55, %59 : vector<9x9xf32>
    %cst_45 = arith.constant dense<0.000000e+00> : vector<9x8xf32>
    %61 = tpu.matmul %60, %49, %cst_45 {dimension_numbers = #tpu.dot_dimension_numbers<[1], [0], [0], [1], [0, 0, 1, 1], [], []>} : vector<9x9xf32>, vector<9x8xf32>, vector<9x8xf32> -> vector<9x8xf32>
    %62 = vector.extract_strided_slice %31 {offsets = [0, 16], sizes = [9, 8], strides = [1, 1]} : vector<9x96xf32> to vector<9x8xf32>
    %63 = vector.extract_strided_slice %31 {offsets = [0, 48], sizes = [9, 8], strides = [1, 1]} : vector<9x96xf32> to vector<9x8xf32>
    %64 = vector.extract_strided_slice %31 {offsets = [0, 80], sizes = [9, 8], strides = [1, 1]} : vector<9x96xf32> to vector<9x8xf32>
    "tpu.trace_start"() <{level = 10 : i32, message = "qd,kd->qk"}> : () -> ()
    %cst_46 = arith.constant dense<0.000000e+00> : vector<9x9xf32>
    %65 = tpu.matmul %62, %63, %cst_46 {dimension_numbers = #tpu.dot_dimension_numbers<[1], [1], [0], [0], [0, 0, 1, 0], [], []>} : vector<9x8xf32>, vector<9x8xf32>, vector<9x9xf32> -> vector<9x9xf32>
    "tpu.trace_stop"() : () -> ()
    %cst_47 = arith.constant dense<0xFF800000> : vector<9xf32>
    %66 = vector.multi_reduction <maximumf>, %65, %cst_47 [1] : vector<9x9xf32> to vector<9xf32>
    %67 = vector.shape_cast %66 : vector<9xf32> to vector<9x1xf32>
    %68 = vector.broadcast %67 : vector<9x1xf32> to vector<9x9xf32>
    %69 = arith.subf %65, %68 : vector<9x9xf32>
    %70 = math.exp %69 : vector<9x9xf32>
    %cst_48 = arith.constant dense<0.000000e+00> : vector<9xf32>
    %71 = vector.multi_reduction <add>, %70, %cst_48 [1] : vector<9x9xf32> to vector<9xf32>
    %72 = vector.shape_cast %71 : vector<9xf32> to vector<9x1xf32>
    %73 = tpu.reciprocal %72 {approx = true} : vector<9x1xf32> -> vector<9x1xf32>
    %74 = vector.broadcast %73 : vector<9x1xf32> to vector<9x9xf32>
    %75 = arith.mulf %70, %74 : vector<9x9xf32>
    %cst_49 = arith.constant dense<0.000000e+00> : vector<9x8xf32>
    %76 = tpu.matmul %75, %64, %cst_49 {dimension_numbers = #tpu.dot_dimension_numbers<[1], [0], [0], [1], [0, 0, 1, 1], [], []>} : vector<9x9xf32>, vector<9x8xf32>, vector<9x8xf32> -> vector<9x8xf32>
    %77 = vector.extract_strided_slice %31 {offsets = [0, 24], sizes = [9, 8], strides = [1, 1]} : vector<9x96xf32> to vector<9x8xf32>
    %78 = vector.extract_strided_slice %31 {offsets = [0, 56], sizes = [9, 8], strides = [1, 1]} : vector<9x96xf32> to vector<9x8xf32>
    %79 = vector.extract_strided_slice %31 {offsets = [0, 88], sizes = [9, 8], strides = [1, 1]} : vector<9x96xf32> to vector<9x8xf32>
    "tpu.trace_start"() <{level = 10 : i32, message = "qd,kd->qk"}> : () -> ()
    %cst_50 = arith.constant dense<0.000000e+00> : vector<9x9xf32>
    %80 = tpu.matmul %77, %78, %cst_50 {dimension_numbers = #tpu.dot_dimension_numbers<[1], [1], [0], [0], [0, 0, 1, 0], [], []>} : vector<9x8xf32>, vector<9x8xf32>, vector<9x9xf32> -> vector<9x9xf32>
    "tpu.trace_stop"() : () -> ()
    %cst_51 = arith.constant dense<0xFF800000> : vector<9xf32>
    %81 = vector.multi_reduction <maximumf>, %80, %cst_51 [1] : vector<9x9xf32> to vector<9xf32>
    %82 = vector.shape_cast %81 : vector<9xf32> to vector<9x1xf32>
    %83 = vector.broadcast %82 : vector<9x1xf32> to vector<9x9xf32>
    %84 = arith.subf %80, %83 : vector<9x9xf32>
    %85 = math.exp %84 : vector<9x9xf32>
    %cst_52 = arith.constant dense<0.000000e+00> : vector<9xf32>
    %86 = vector.multi_reduction <add>, %85, %cst_52 [1] : vector<9x9xf32> to vector<9xf32>
    %87 = vector.shape_cast %86 : vector<9xf32> to vector<9x1xf32>
    %88 = tpu.reciprocal %87 {approx = true} : vector<9x1xf32> -> vector<9x1xf32>
    %89 = vector.broadcast %88 : vector<9x1xf32> to vector<9x9xf32>
    %90 = arith.mulf %85, %89 : vector<9x9xf32>
    %cst_53 = arith.constant dense<0.000000e+00> : vector<9x8xf32>
    %91 = tpu.matmul %90, %79, %cst_53 {dimension_numbers = #tpu.dot_dimension_numbers<[1], [0], [0], [1], [0, 0, 1, 1], [], []>} : vector<9x9xf32>, vector<9x8xf32>, vector<9x8xf32> -> vector<9x8xf32>
    %92 = tpu.concatenate %46, %61, %76, %91 in 1 : vector<9x8xf32>, vector<9x8xf32>, vector<9x8xf32>, vector<9x8xf32> -> vector<9x32xf32>
    %93 = vector.extract_strided_slice %30 {offsets = [9, 0], sizes = [9, 96], strides = [1, 1]} : vector<18x96xf32> to vector<9x96xf32>
    %94 = vector.extract_strided_slice %93 {offsets = [0, 0], sizes = [9, 8], strides = [1, 1]} : vector<9x96xf32> to vector<9x8xf32>
    %95 = vector.extract_strided_slice %93 {offsets = [0, 32], sizes = [9, 8], strides = [1, 1]} : vector<9x96xf32> to vector<9x8xf32>
    %96 = vector.extract_strided_slice %93 {offsets = [0, 64], sizes = [9, 8], strides = [1, 1]} : vector<9x96xf32> to vector<9x8xf32>
    "tpu.trace_start"() <{level = 10 : i32, message = "qd,kd->qk"}> : () -> ()
    %cst_54 = arith.constant dense<0.000000e+00> : vector<9x9xf32>
    %97 = tpu.matmul %94, %95, %cst_54 {dimension_numbers = #tpu.dot_dimension_numbers<[1], [1], [0], [0], [0, 0, 1, 0], [], []>} : vector<9x8xf32>, vector<9x8xf32>, vector<9x9xf32> -> vector<9x9xf32>
    "tpu.trace_stop"() : () -> ()
    %cst_55 = arith.constant dense<0xFF800000> : vector<9xf32>
    %98 = vector.multi_reduction <maximumf>, %97, %cst_55 [1] : vector<9x9xf32> to vector<9xf32>
    %99 = vector.shape_cast %98 : vector<9xf32> to vector<9x1xf32>
    %100 = vector.broadcast %99 : vector<9x1xf32> to vector<9x9xf32>
    %101 = arith.subf %97, %100 : vector<9x9xf32>
    %102 = math.exp %101 : vector<9x9xf32>
    %cst_56 = arith.constant dense<0.000000e+00> : vector<9xf32>
    %103 = vector.multi_reduction <add>, %102, %cst_56 [1] : vector<9x9xf32> to vector<9xf32>
    %104 = vector.shape_cast %103 : vector<9xf32> to vector<9x1xf32>
    %105 = tpu.reciprocal %104 {approx = true} : vector<9x1xf32> -> vector<9x1xf32>
    %106 = vector.broadcast %105 : vector<9x1xf32> to vector<9x9xf32>
    %107 = arith.mulf %102, %106 : vector<9x9xf32>
    %cst_57 = arith.constant dense<0.000000e+00> : vector<9x8xf32>
    %108 = tpu.matmul %107, %96, %cst_57 {dimension_numbers = #tpu.dot_dimension_numbers<[1], [0], [0], [1], [0, 0, 1, 1], [], []>} : vector<9x9xf32>, vector<9x8xf32>, vector<9x8xf32> -> vector<9x8xf32>
    %109 = vector.extract_strided_slice %93 {offsets = [0, 8], sizes = [9, 8], strides = [1, 1]} : vector<9x96xf32> to vector<9x8xf32>
    %110 = vector.extract_strided_slice %93 {offsets = [0, 40], sizes = [9, 8], strides = [1, 1]} : vector<9x96xf32> to vector<9x8xf32>
    %111 = vector.extract_strided_slice %93 {offsets = [0, 72], sizes = [9, 8], strides = [1, 1]} : vector<9x96xf32> to vector<9x8xf32>
    "tpu.trace_start"() <{level = 10 : i32, message = "qd,kd->qk"}> : () -> ()
    %cst_58 = arith.constant dense<0.000000e+00> : vector<9x9xf32>
    %112 = tpu.matmul %109, %110, %cst_58 {dimension_numbers = #tpu.dot_dimension_numbers<[1], [1], [0], [0], [0, 0, 1, 0], [], []>} : vector<9x8xf32>, vector<9x8xf32>, vector<9x9xf32> -> vector<9x9xf32>
    "tpu.trace_stop"() : () -> ()
    %cst_59 = arith.constant dense<0xFF800000> : vector<9xf32>
    %113 = vector.multi_reduction <maximumf>, %112, %cst_59 [1] : vector<9x9xf32> to vector<9xf32>
    %114 = vector.shape_cast %113 : vector<9xf32> to vector<9x1xf32>
    %115 = vector.broadcast %114 : vector<9x1xf32> to vector<9x9xf32>
    %116 = arith.subf %112, %115 : vector<9x9xf32>
    %117 = math.exp %116 : vector<9x9xf32>
    %cst_60 = arith.constant dense<0.000000e+00> : vector<9xf32>
    %118 = vector.multi_reduction <add>, %117, %cst_60 [1] : vector<9x9xf32> to vector<9xf32>
    %119 = vector.shape_cast %118 : vector<9xf32> to vector<9x1xf32>
    %120 = tpu.reciprocal %119 {approx = true} : vector<9x1xf32> -> vector<9x1xf32>
    %121 = vector.broadcast %120 : vector<9x1xf32> to vector<9x9xf32>
    %122 = arith.mulf %117, %121 : vector<9x9xf32>
    %cst_61 = arith.constant dense<0.000000e+00> : vector<9x8xf32>
    %123 = tpu.matmul %122, %111, %cst_61 {dimension_numbers = #tpu.dot_dimension_numbers<[1], [0], [0], [1], [0, 0, 1, 1], [], []>} : vector<9x9xf32>, vector<9x8xf32>, vector<9x8xf32> -> vector<9x8xf32>
    %124 = vector.extract_strided_slice %93 {offsets = [0, 16], sizes = [9, 8], strides = [1, 1]} : vector<9x96xf32> to vector<9x8xf32>
    %125 = vector.extract_strided_slice %93 {offsets = [0, 48], sizes = [9, 8], strides = [1, 1]} : vector<9x96xf32> to vector<9x8xf32>
    %126 = vector.extract_strided_slice %93 {offsets = [0, 80], sizes = [9, 8], strides = [1, 1]} : vector<9x96xf32> to vector<9x8xf32>
    "tpu.trace_start"() <{level = 10 : i32, message = "qd,kd->qk"}> : () -> ()
    %cst_62 = arith.constant dense<0.000000e+00> : vector<9x9xf32>
    %127 = tpu.matmul %124, %125, %cst_62 {dimension_numbers = #tpu.dot_dimension_numbers<[1], [1], [0], [0], [0, 0, 1, 0], [], []>} : vector<9x8xf32>, vector<9x8xf32>, vector<9x9xf32> -> vector<9x9xf32>
    "tpu.trace_stop"() : () -> ()
    %cst_63 = arith.constant dense<0xFF800000> : vector<9xf32>
    %128 = vector.multi_reduction <maximumf>, %127, %cst_63 [1] : vector<9x9xf32> to vector<9xf32>
    %129 = vector.shape_cast %128 : vector<9xf32> to vector<9x1xf32>
    %130 = vector.broadcast %129 : vector<9x1xf32> to vector<9x9xf32>
    %131 = arith.subf %127, %130 : vector<9x9xf32>
    %132 = math.exp %131 : vector<9x9xf32>
    %cst_64 = arith.constant dense<0.000000e+00> : vector<9xf32>
    %133 = vector.multi_reduction <add>, %132, %cst_64 [1] : vector<9x9xf32> to vector<9xf32>
    %134 = vector.shape_cast %133 : vector<9xf32> to vector<9x1xf32>
    %135 = tpu.reciprocal %134 {approx = true} : vector<9x1xf32> -> vector<9x1xf32>
    %136 = vector.broadcast %135 : vector<9x1xf32> to vector<9x9xf32>
    %137 = arith.mulf %132, %136 : vector<9x9xf32>
    %cst_65 = arith.constant dense<0.000000e+00> : vector<9x8xf32>
    %138 = tpu.matmul %137, %126, %cst_65 {dimension_numbers = #tpu.dot_dimension_numbers<[1], [0], [0], [1], [0, 0, 1, 1], [], []>} : vector<9x9xf32>, vector<9x8xf32>, vector<9x8xf32> -> vector<9x8xf32>
    %139 = vector.extract_strided_slice %93 {offsets = [0, 24], sizes = [9, 8], strides = [1, 1]} : vector<9x96xf32> to vector<9x8xf32>
    %140 = vector.extract_strided_slice %93 {offsets = [0, 56], sizes = [9, 8], strides = [1, 1]} : vector<9x96xf32> to vector<9x8xf32>
    %141 = vector.extract_strided_slice %93 {offsets = [0, 88], sizes = [9, 8], strides = [1, 1]} : vector<9x96xf32> to vector<9x8xf32>
    "tpu.trace_start"() <{level = 10 : i32, message = "qd,kd->qk"}> : () -> ()
    %cst_66 = arith.constant dense<0.000000e+00> : vector<9x9xf32>
    %142 = tpu.matmul %139, %140, %cst_66 {dimension_numbers = #tpu.dot_dimension_numbers<[1], [1], [0], [0], [0, 0, 1, 0], [], []>} : vector<9x8xf32>, vector<9x8xf32>, vector<9x9xf32> -> vector<9x9xf32>
    "tpu.trace_stop"() : () -> ()
    %cst_67 = arith.constant dense<0xFF800000> : vector<9xf32>
    %143 = vector.multi_reduction <maximumf>, %142, %cst_67 [1] : vector<9x9xf32> to vector<9xf32>
    %144 = vector.shape_cast %143 : vector<9xf32> to vector<9x1xf32>
    %145 = vector.broadcast %144 : vector<9x1xf32> to vector<9x9xf32>
    %146 = arith.subf %142, %145 : vector<9x9xf32>
    %147 = math.exp %146 : vector<9x9xf32>
    %cst_68 = arith.constant dense<0.000000e+00> : vector<9xf32>
    %148 = vector.multi_reduction <add>, %147, %cst_68 [1] : vector<9x9xf32> to vector<9xf32>
    %149 = vector.shape_cast %148 : vector<9xf32> to vector<9x1xf32>
    %150 = tpu.reciprocal %149 {approx = true} : vector<9x1xf32> -> vector<9x1xf32>
    %151 = vector.broadcast %150 : vector<9x1xf32> to vector<9x9xf32>
    %152 = arith.mulf %147, %151 : vector<9x9xf32>
    %cst_69 = arith.constant dense<0.000000e+00> : vector<9x8xf32>
    %153 = tpu.matmul %152, %141, %cst_69 {dimension_numbers = #tpu.dot_dimension_numbers<[1], [0], [0], [1], [0, 0, 1, 1], [], []>} : vector<9x9xf32>, vector<9x8xf32>, vector<9x8xf32> -> vector<9x8xf32>
    %154 = tpu.concatenate %108, %123, %138, %153 in 1 : vector<9x8xf32>, vector<9x8xf32>, vector<9x8xf32>, vector<9x8xf32> -> vector<9x32xf32>
    %155 = tpu.concatenate %92, %154 in 0 : vector<9x32xf32>, vector<9x32xf32> -> vector<18x32xf32>
    %cst_70 = arith.constant dense<0.000000e+00> : vector<18x32xf32>
    %156 = tpu.matmul %155, %8, %cst_70 {dimension_numbers = #tpu.dot_dimension_numbers<[1], [0], [0], [1], [0, 0, 1, 1], [], []>} : vector<18x32xf32>, vector<32x32xf32>, vector<18x32xf32> -> vector<18x32xf32>
    %157 = vector.broadcast %10 : vector<1x32xf32> to vector<18x32xf32>
    %158 = arith.addf %156, %157 : vector<18x32xf32>
    %c1_i32 = arith.constant 1 : i32
    %159 = arith.cmpi slt, %arg0, %c1_i32 : i32
    %160 = arith.extui %159 : i1 to i32
    %c0_i32_71 = arith.constant 0 : i32
    %161 = arith.cmpi ne, %160, %c0_i32_71 : i32
    scf.if %161 {
      %165 = arith.addf %27, %158 : vector<18x32xf32>
      %cst_74 = arith.constant dense<0.000000e+00> : vector<18xf32>
      %166 = vector.multi_reduction <add>, %165, %cst_74 [1] : vector<18x32xf32> to vector<18xf32>
      %167 = vector.shape_cast %166 : vector<18xf32> to vector<18x1xf32>
      %cst_75 = arith.constant 3.200000e+01 : f32
      %168 = vector.broadcast %cst_75 : f32 to vector<18x1xf32>
      %169 = arith.divf %167, %168 : vector<18x1xf32>
      %170 = vector.broadcast %169 : vector<18x1xf32> to vector<18x32xf32>
      %171 = arith.subf %165, %170 : vector<18x32xf32>
      %172 = arith.mulf %171, %171 : vector<18x32xf32>
      %cst_76 = arith.constant dense<0.000000e+00> : vector<18xf32>
      %173 = vector.multi_reduction <add>, %172, %cst_76 [1] : vector<18x32xf32> to vector<18xf32>
      %174 = vector.shape_cast %173 : vector<18xf32> to vector<18x1xf32>
      %cst_77 = arith.constant 3.200000e+01 : f32
      %175 = vector.broadcast %cst_77 : f32 to vector<18x1xf32>
      %176 = arith.divf %174, %175 : vector<18x1xf32>
      %cst_78 = arith.constant 9.99999974E-6 : f32
      %177 = vector.broadcast %cst_78 : f32 to vector<18x1xf32>
      %178 = arith.addf %176, %177 : vector<18x1xf32>
      %179 = math.rsqrt %178 : vector<18x1xf32>
      %180 = vector.broadcast %179 : vector<18x1xf32> to vector<18x32xf32>
      %181 = arith.mulf %171, %180 : vector<18x32xf32>
      %182 = vector.broadcast %12 : vector<1x32xf32> to vector<18x32xf32>
      %183 = arith.mulf %181, %182 : vector<18x32xf32>
      %184 = vector.broadcast %14 : vector<1x32xf32> to vector<18x32xf32>
      %185 = arith.addf %183, %184 : vector<18x32xf32>
      %cst_79 = arith.constant dense<0.000000e+00> : vector<18x2048xf32>
      %186 = tpu.matmul %185, %16, %cst_79 {dimension_numbers = #tpu.dot_dimension_numbers<[1], [0], [0], [1], [0, 0, 1, 1], [], []>} : vector<18x32xf32>, vector<32x2048xf32>, vector<18x2048xf32> -> vector<18x2048xf32>
      %187 = vector.broadcast %18 : vector<1x2048xf32> to vector<18x2048xf32>
      %188 = arith.addf %186, %187 : vector<18x2048xf32>
      %cst_80 = arith.constant 0.000000e+00 : f32
      %189 = vector.broadcast %cst_80 : f32 to vector<18x2048xf32>
      %190 = arith.maximumf %188, %189 : vector<18x2048xf32>
      %cst_81 = arith.constant dense<0.000000e+00> : vector<18x32xf32>
      %191 = tpu.matmul %190, %20, %cst_81 {dimension_numbers = #tpu.dot_dimension_numbers<[1], [0], [0], [1], [0, 0, 1, 1], [], []>} : vector<18x2048xf32>, vector<2048x32xf32>, vector<18x32xf32> -> vector<18x32xf32>
      %192 = vector.broadcast %22 : vector<1x32xf32> to vector<18x32xf32>
      %193 = arith.addf %191, %192 : vector<18x32xf32>
      %194 = arith.addf %185, %193 : vector<18x32xf32>
      %cst_82 = arith.constant dense<0.000000e+00> : vector<18xf32>
      %195 = vector.multi_reduction <add>, %194, %cst_82 [1] : vector<18x32xf32> to vector<18xf32>
      %196 = vector.shape_cast %195 : vector<18xf32> to vector<18x1xf32>
      %cst_83 = arith.constant 3.200000e+01 : f32
      %197 = vector.broadcast %cst_83 : f32 to vector<18x1xf32>
      %198 = arith.divf %196, %197 : vector<18x1xf32>
      %199 = vector.broadcast %198 : vector<18x1xf32> to vector<18x32xf32>
      %200 = arith.subf %194, %199 : vector<18x32xf32>
      %201 = arith.mulf %200, %200 : vector<18x32xf32>
      %cst_84 = arith.constant dense<0.000000e+00> : vector<18xf32>
      %202 = vector.multi_reduction <add>, %201, %cst_84 [1] : vector<18x32xf32> to vector<18xf32>
      %203 = vector.shape_cast %202 : vector<18xf32> to vector<18x1xf32>
      %cst_85 = arith.constant 3.200000e+01 : f32
      %204 = vector.broadcast %cst_85 : f32 to vector<18x1xf32>
      %205 = arith.divf %203, %204 : vector<18x1xf32>
      %cst_86 = arith.constant 9.99999974E-6 : f32
      %206 = vector.broadcast %cst_86 : f32 to vector<18x1xf32>
      %207 = arith.addf %205, %206 : vector<18x1xf32>
      %208 = math.rsqrt %207 : vector<18x1xf32>
      %209 = vector.broadcast %208 : vector<18x1xf32> to vector<18x32xf32>
      %210 = arith.mulf %200, %209 : vector<18x32xf32>
      %211 = vector.broadcast %24 : vector<1x32xf32> to vector<18x32xf32>
      %212 = arith.mulf %210, %211 : vector<18x32xf32>
      %213 = vector.broadcast %26 : vector<1x32xf32> to vector<18x32xf32>
      %214 = arith.addf %212, %213 : vector<18x32xf32>
      %c0_87 = arith.constant 0 : index
      %c0_88 = arith.constant 0 : index
      %215 = vector.load %arg18[%c0_87, %c0_88] : memref<18x32xf32, #tpu.memory_space<vmem>>, vector<18x32xf32>
      tpu.vector_store %arg18[%c0_87, %c0_88], %214 {strides = array<i32>} : memref<18x32xf32, #tpu.memory_space<vmem>>, vector<18x32xf32>,
    } else {
    }
    %c1_i32_72 = arith.constant 1 : i32
    %162 = arith.cmpi eq, %arg0, %c1_i32_72 : i32
    %163 = arith.extui %162 : i1 to i32
    %c0_i32_73 = arith.constant 0 : i32
    %164 = arith.cmpi ne, %163, %c0_i32_73 : i32
    scf.if %164 {
      %165 = vector.extract_strided_slice %27 {offsets = [0, 0], sizes = [1, 32], strides = [1, 1]} : vector<18x32xf32> to vector<1x32xf32>
      %166 = vector.extract_strided_slice %27 {offsets = [9, 0], sizes = [1, 32], strides = [1, 1]} : vector<18x32xf32> to vector<1x32xf32>
      %167 = tpu.concatenate %165, %166 in 0 : vector<1x32xf32>, vector<1x32xf32> -> vector<2x32xf32>
      %168 = vector.extract_strided_slice %158 {offsets = [0, 0], sizes = [1, 32], strides = [1, 1]} : vector<18x32xf32> to vector<1x32xf32>
      %169 = vector.extract_strided_slice %158 {offsets = [9, 0], sizes = [1, 32], strides = [1, 1]} : vector<18x32xf32> to vector<1x32xf32>
      %170 = tpu.concatenate %168, %169 in 0 : vector<1x32xf32>, vector<1x32xf32> -> vector<2x32xf32>
      %171 = arith.addf %167, %170 : vector<2x32xf32>
      %cst_74 = arith.constant dense<0.000000e+00> : vector<2xf32>
      %172 = vector.multi_reduction <add>, %171, %cst_74 [1] : vector<2x32xf32> to vector<2xf32>
      %173 = vector.shape_cast %172 : vector<2xf32> to vector<2x1xf32>
      %cst_75 = arith.constant 3.200000e+01 : f32
      %174 = vector.broadcast %cst_75 : f32 to vector<2x1xf32>
      %175 = arith.divf %173, %174 : vector<2x1xf32>
      %176 = vector.broadcast %175 : vector<2x1xf32> to vector<2x32xf32>
      %177 = arith.subf %171, %176 : vector<2x32xf32>
      %178 = arith.mulf %177, %177 : vector<2x32xf32>
      %cst_76 = arith.constant dense<0.000000e+00> : vector<2xf32>
      %179 = vector.multi_reduction <add>, %178, %cst_76 [1] : vector<2x32xf32> to vector<2xf32>
      %180 = vector.shape_cast %179 : vector<2xf32> to vector<2x1xf32>
      %cst_77 = arith.constant 3.200000e+01 : f32
      %181 = vector.broadcast %cst_77 : f32 to vector<2x1xf32>
      %182 = arith.divf %180, %181 : vector<2x1xf32>
      %cst_78 = arith.constant 9.99999974E-6 : f32
      %183 = vector.broadcast %cst_78 : f32 to vector<2x1xf32>
      %184 = arith.addf %182, %183 : vector<2x1xf32>
      %185 = math.rsqrt %184 : vector<2x1xf32>
      %186 = vector.broadcast %185 : vector<2x1xf32> to vector<2x32xf32>
      %187 = arith.mulf %177, %186 : vector<2x32xf32>
      %188 = vector.broadcast %12 : vector<1x32xf32> to vector<2x32xf32>
      %189 = arith.mulf %187, %188 : vector<2x32xf32>
      %190 = vector.broadcast %14 : vector<1x32xf32> to vector<2x32xf32>
      %191 = arith.addf %189, %190 : vector<2x32xf32>
      %cst_79 = arith.constant dense<0.000000e+00> : vector<2x2048xf32>
      %192 = tpu.matmul %191, %16, %cst_79 {dimension_numbers = #tpu.dot_dimension_numbers<[1], [0], [0], [1], [0, 0, 1, 1], [], []>} : vector<2x32xf32>, vector<32x2048xf32>, vector<2x2048xf32> -> vector<2x2048xf32>
      %193 = vector.broadcast %18 : vector<1x2048xf32> to vector<2x2048xf32>
      %194 = arith.addf %192, %193 : vector<2x2048xf32>
      %cst_80 = arith.constant 0.000000e+00 : f32
      %195 = vector.broadcast %cst_80 : f32 to vector<2x2048xf32>
      %196 = arith.maximumf %194, %195 : vector<2x2048xf32>
      %cst_81 = arith.constant dense<0.000000e+00> : vector<2x32xf32>
      %197 = tpu.matmul %196, %20, %cst_81 {dimension_numbers = #tpu.dot_dimension_numbers<[1], [0], [0], [1], [0, 0, 1, 1], [], []>} : vector<2x2048xf32>, vector<2048x32xf32>, vector<2x32xf32> -> vector<2x32xf32>
      %198 = vector.broadcast %22 : vector<1x32xf32> to vector<2x32xf32>
      %199 = arith.addf %197, %198 : vector<2x32xf32>
      %200 = arith.addf %191, %199 : vector<2x32xf32>
      %cst_82 = arith.constant dense<0.000000e+00> : vector<2xf32>
      %201 = vector.multi_reduction <add>, %200, %cst_82 [1] : vector<2x32xf32> to vector<2xf32>
      %202 = vector.shape_cast %201 : vector<2xf32> to vector<2x1xf32>
      %cst_83 = arith.constant 3.200000e+01 : f32
      %203 = vector.broadcast %cst_83 : f32 to vector<2x1xf32>
      %204 = arith.divf %202, %203 : vector<2x1xf32>
      %205 = vector.broadcast %204 : vector<2x1xf32> to vector<2x32xf32>
      %206 = arith.subf %200, %205 : vector<2x32xf32>
      %207 = arith.mulf %206, %206 : vector<2x32xf32>
      %cst_84 = arith.constant dense<0.000000e+00> : vector<2xf32>
      %208 = vector.multi_reduction <add>, %207, %cst_84 [1] : vector<2x32xf32> to vector<2xf32>
      %209 = vector.shape_cast %208 : vector<2xf32> to vector<2x1xf32>
      %cst_85 = arith.constant 3.200000e+01 : f32
      %210 = vector.broadcast %cst_85 : f32 to vector<2x1xf32>
      %211 = arith.divf %209, %210 : vector<2x1xf32>
      %cst_86 = arith.constant 9.99999974E-6 : f32
      %212 = vector.broadcast %cst_86 : f32 to vector<2x1xf32>
      %213 = arith.addf %211, %212 : vector<2x1xf32>
      %214 = math.rsqrt %213 : vector<2x1xf32>
      %215 = vector.broadcast %214 : vector<2x1xf32> to vector<2x32xf32>
      %216 = arith.mulf %206, %215 : vector<2x32xf32>
      %217 = vector.broadcast %24 : vector<1x32xf32> to vector<2x32xf32>
      %218 = arith.mulf %216, %217 : vector<2x32xf32>
      %219 = vector.broadcast %26 : vector<1x32xf32> to vector<2x32xf32>
      %220 = arith.addf %218, %219 : vector<2x32xf32>
      %c0_87 = arith.constant 0 : index
      %c0_88 = arith.constant 0 : index
      %221 = vector.load %arg17[%c0_87, %c0_88] : memref<2x32xf32, #tpu.memory_space<vmem>>, vector<2x32xf32>
      tpu.vector_store %arg17[%c0_87, %c0_88], %220 {strides = array<i32>} : memref<2x32xf32, #tpu.memory_space<vmem>>, vector<2x32xf32>,
    } else {
    }
    return
  }
  func.func @transform_0(%arg0: i32) -> (i32, i32) {
    %c0_i32 = arith.constant 0 : i32
    %c0_i32_0 = arith.constant 0 : i32
    %c0_i32_1 = arith.constant 0 : i32
    return %c0_i32, %c0_i32_0 : i32, i32
  }
  func.func @transform_1(%arg0: i32) -> (i32, i32) {
    %c0_i32 = arith.constant 0 : i32
    %c0_i32_0 = arith.constant 0 : i32
    %c0_i32_1 = arith.constant 0 : i32
    return %c0_i32, %c0_i32_0 : i32, i32
  }
  func.func @transform_2(%arg0: i32) -> (i32, i32) {
    %c0_i32 = arith.constant 0 : i32
    %c0_i32_0 = arith.constant 0 : i32
    %c0_i32_1 = arith.constant 0 : i32
    return %c0_i32, %c0_i32_0 : i32, i32
  }
  func.func @transform_3(%arg0: i32) -> (i32, i32) {
    %c0_i32 = arith.constant 0 : i32
    %c0_i32_0 = arith.constant 0 : i32
    %c0_i32_1 = arith.constant 0 : i32
    return %c0_i32, %c0_i32_0 : i32, i32
  }
  func.func @transform_4(%arg0: i32) -> (i32, i32, i32) {
    %c0_i32 = arith.constant 0 : i32
    %c0_i32_0 = arith.constant 0 : i32
    %c0_i32_1 = arith.constant 0 : i32
    return %arg0, %c0_i32, %c0_i32_0 : i32, i32, i32
  }
  func.func @transform_5(%arg0: i32) -> (i32, i32, i32) {
    %c0_i32 = arith.constant 0 : i32
    %c0_i32_0 = arith.constant 0 : i32
    %c0_i32_1 = arith.constant 0 : i32
    return %arg0, %c0_i32, %c0_i32_0 : i32, i32, i32
  }
  func.func @transform_6(%arg0: i32) -> (i32, i32, i32) {
    %c0_i32 = arith.constant 0 : i32
    %c0_i32_0 = arith.constant 0 : i32
    %c0_i32_1 = arith.constant 0 : i32
    return %arg0, %c0_i32, %c0_i32_0 : i32, i32, i32
  }
  func.func @transform_7(%arg0: i32) -> (i32, i32, i32) {
    %c0_i32 = arith.constant 0 : i32
    %c0_i32_0 = arith.constant 0 : i32
    %c0_i32_1 = arith.constant 0 : i32
    return %arg0, %c0_i32, %c0_i32_0 : i32, i32, i32
  }
  func.func @transform_8(%arg0: i32) -> (i32, i32, i32) {
    %c0_i32 = arith.constant 0 : i32
    %c0_i32_0 = arith.constant 0 : i32
    %c0_i32_1 = arith.constant 0 : i32
    return %arg0, %c0_i32, %c0_i32_0 : i32, i32, i32
  }
  func.func @transform_9(%arg0: i32) -> (i32, i32, i32) {
    %c0_i32 = arith.constant 0 : i32
    %c0_i32_0 = arith.constant 0 : i32
    %c0_i32_1 = arith.constant 0 : i32
    return %arg0, %c0_i32, %c0_i32_0 : i32, i32, i32
  }
  func.func @transform_10(%arg0: i32) -> (i32, i32, i32) {
    %c0_i32 = arith.constant 0 : i32
    %c0_i32_0 = arith.constant 0 : i32
    %c0_i32_1 = arith.constant 0 : i32
    return %arg0, %c0_i32, %c0_i32_0 : i32, i32, i32
  }
  func.func @transform_11(%arg0: i32) -> (i32, i32, i32) {
    %c0_i32 = arith.constant 0 : i32
    %c0_i32_0 = arith.constant 0 : i32
    %c0_i32_1 = arith.constant 0 : i32
    return %arg0, %c0_i32, %c0_i32_0 : i32, i32, i32
  }
  func.func @transform_12(%arg0: i32) -> (i32, i32, i32) {
    %c0_i32 = arith.constant 0 : i32
    %c0_i32_0 = arith.constant 0 : i32
    %c0_i32_1 = arith.constant 0 : i32
    return %arg0, %c0_i32, %c0_i32_0 : i32, i32, i32
  }
  func.func @transform_13(%arg0: i32) -> (i32, i32, i32) {
    %c0_i32 = arith.constant 0 : i32
    %c0_i32_0 = arith.constant 0 : i32
    %c0_i32_1 = arith.constant 0 : i32
    return %arg0, %c0_i32, %c0_i32_0 : i32, i32, i32
  }
  func.func @transform_14(%arg0: i32) -> (i32, i32, i32) {
    %c0_i32 = arith.constant 0 : i32
    %c0_i32_0 = arith.constant 0 : i32
    %c0_i32_1 = arith.constant 0 : i32
    return %arg0, %c0_i32, %c0_i32_0 : i32, i32, i32
  }
  func.func @transform_15(%arg0: i32) -> (i32, i32, i32) {
    %c0_i32 = arith.constant 0 : i32
    %c0_i32_0 = arith.constant 0 : i32
    %c0_i32_1 = arith.constant 0 : i32
    return %arg0, %c0_i32, %c0_i32_0 : i32, i32, i32
  }
  func.func @transform_16(%arg0: i32) -> (i32, i32) {
    %c0_i32 = arith.constant 0 : i32
    %c0_i32_0 = arith.constant 0 : i32
    %c0_i32_1 = arith.constant 0 : i32
    return %c0_i32, %c0_i32_0 : i32, i32
  }
}

</mosaic_0001>

<bundles_post_ra>
// kernel: transformer_forward.1
= control target key start
LH: loop header
LB: loop body
LE: loop exit
PB: predicated region body
PF: predicated region fallthrough
CT: control target
= control target key end

     0   :  { %s10629_s0 = inlined_call_operand.vmem [shape: f32[16,16], index: 0, kind: input, shape index: {}]   ;;  %s10630_s1 = inlined_call_operand.vmem [shape: f32[16,32], index: 1, kind: input, shape index: {}]   ;;  %s10631_s2 = inlined_call_operand.vmem [shape: f32[1,32], index: 2, kind: input, shape index: {}]   ;;  %s10632_s3 = inlined_call_operand.vmem [shape: f32[1,32], index: 3, kind: input, shape index: {}]   ;;  %s10633_s4 = inlined_call_operand.vmem [shape: f32[2,32,96], index: 4, kind: input, shape index: {}]   ;;  %s10634_s5 = inlined_call_operand.vmem [shape: f32[2,1,96], index: 5, kind: input, shape index: {}]   ;;  %s10635_s6 = inlined_call_operand.vmem [shape: f32[2,32,32], index: 6, kind: input, shape index: {}]   ;;  %s10636_s7 = inlined_call_operand.vmem [shape: f32[2,1,32], index: 7, kind: input, shape index: {}]   ;;  %s10637_s8 = inlined_call_operand.vmem [shape: f32[2,1,32], index: 8, kind: input, shape index: {}]   ;;  %s10638_s9 = inlined_call_operand.vmem [shape: f32[2,1,32], index: 9, kind: input, shape index: {}]   ;;  %s10639_s10 = inlined_call_operand.vmem [shape: f32[2,32,2048], index: 10, kind: input, shape index: {}]   ;;  %s10640_s11 = inlined_call_operand.vmem [shape: f32[2,1,2048], index: 11, kind: input, shape index: {}]   ;;  %s10641_s12 = inlined_call_operand.vmem [shape: f32[2,2048,32], index: 12, kind: input, shape index: {}]   ;;  %s10642_s13 = inlined_call_operand.vmem [shape: f32[2,1,32], index: 13, kind: input, shape index: {}]   ;;  %s10643_s14 = inlined_call_operand.vmem [shape: f32[2,1,32], index: 14, kind: input, shape index: {}]   ;;  %s10644_s15 = inlined_call_operand.vmem [shape: f32[2,1,32], index: 15, kind: input, shape index: {}]   ;;  %s10645_s16 = inlined_call_operand.hbm [shape: f32[2,32], index: 16, kind: output, shape index: {}]  }
   0x1   :  { %10688 = sst [smem:[#allocation333_spill]] %s10629_s0 }
   0x2   :  { %10689 = sst [smem:[#allocation334_spill]] %s10631_s2 }
   0x3   :  { %10690 = sst [smem:[#allocation335_spill]] %s10632_s3 }
   0x4   :  { %10691 = sst [smem:[#allocation336_spill]] %s10633_s4 }
   0x5   :  { %10692 = sst [smem:[#allocation337_spill]] %s10634_s5 }
   0x6   :  { %10693 = sst [smem:[#allocation338_spill]] %s10635_s6 }
   0x7   :  { %10694 = sst [smem:[#allocation339_spill]] %s10645_s16 }
   0x8   :  { %21 = vsyncpa [#allocation4], 0  ;;  %s8105_s21 = smov 0  }
   0x9 LB: > { %10695 = sst [smem:[#allocation6_spill]] %s7997_s21  ;;  %s8111_s22 = sadd.s32 4294967295, %s7997_s21   ;;  %s7997_s21 = sphi %s8105_s21, %s27_s21  }
   0xa   : > { %p6051_p0 = scmp.ge.s32.totalorder %s7997_s21, 1  ;;  %p553_p1 = scmp.lt.s32.totalorder %s7997_s21, 3 }
   0xc   : > { %p554_p2 = pnand %p6051_p0, %p553_p1 }
   0xe   : > { %557 = sbr.rel (%p554_p2) target bundleno = 7501 (0x1d4d), region = 84 }
  0x15   : > { %p638_p3 = scmp.lt.s32.totalorder %s8111_s22, 1  ;;  %s10697_s4 = sld [smem:[#allocation336_spill]] }
  0x16   : > { %s10698_s6 = sld [smem:[#allocation338_spill]]  ;;  %p6061_p4 = scmp.ne.s32.totalorder %s8111_s22, 0 }
  0x17   : > { %s8117_s23 = scalar_select %p638_p3, %s8111_s22, 1 }
  0x18   : > { %686 = sbr.rel (%p6061_p4) target bundleno = 252 (0xfc), region = 88  ;;  %v689_v0 = vld [vmem:[%s10630_s1] sm:$0xff] (!%p6061_p4)  ;;  %v690_v1 = vld [vmem:[%s10630_s1 + $0x8] sm:$0xff] (!%p6061_p4)  ;;  %s10699_s26 = sld [smem:[#allocation333_spill]] (!%p6061_p4)  ;;  %vm698_vm0 = vcmask (!%p6061_p4), 130048   ;;  %v785_v5 = vlaneseq (!%p6061_p4)  ;;  %vm801_vm1 = vcmask (!%p6061_p4), 254976  }
  0x19   : > { %s6167_s24 = sshll.u32 %s8117_s23, 5  ;;  %s6169_s28 = sshll.u32 %s8117_s23, 9  ;;  %v7014_v3 = vpack.c.bf16 (!%p6061_p4), %v690_v1, %v689_v0  ;;  %vm793_vm2 = vcmask (!%p6061_p4), 1040384   ;;  %vm796_vm3 = vcmask (!%p6061_p4), 1041408   ;;  %vm798_vm4 = vcmask (!%p6061_p4), 261120  }
  0x1a   : > { %s8150_s5 = scalar_lea.vmem %s10639_s10, %s6169_s28  ;;  %s6170_s20 = sshll.u32 %s8117_s23, 11  ;;  %v786_v6 = vshrl.u32 (!%p6061_p4), %v785_v5, 7 }
  0x1b   : > { %s8127_s30 = scalar_lea.vmem %s10697_s4, %s6167_s24  ;;  %s8162_s16 = scalar_lea.vmem %s10641_s12, %s6170_s20  ;;  %7015 = vmatprep.subr.bf16.mxu0 (!%p6061_p4), %v7014_v3 }
  0x1c   : > { %s8132_s18 = scalar_lea.vmem %s10698_s6, %s6167_s24  ;;  %s6058_s24 = sshll.u32 %s8117_s23, 4  ;;  %7017 = vmatpush3.bf16.msra.mxu0 (!%p6061_p4), %v7014_v3  ;;  %v787_v8 = vsub.s32 (!%p6061_p4), 0, %v786_v6 }
  0x1d   : > { %s8156_s19 = scalar_lea.vmem %s10640_s11, %s6058_s24  ;;  %s676_s27 = scalar_lea.vmem %s10642_s13, %s8117_s23 }
  0x1e   : > { %s679_s28 = scalar_lea.vmem %s10643_s14, %s8117_s23  ;;  %s682_s0 = scalar_lea.vmem %s10644_s15, %s8117_s23  ;;  %v687_v2 = vld [vmem:[%s10699_s26] sm:$0xff] (!%p6061_p4)  ;;  %v688_v4 = vld [vmem:[%s10699_s26 + $0x8] sm:$0xff] (!%p6061_p4) }
  0x1f   : > { %6865 = vmatprep.mubr.msk.f32.mxu0 %vm698_vm0, %v687_v2  ;;  %s10700_s24 = sld [smem:[#allocation334_spill]]  ;;  %s10701_s20 = sld [smem:[#allocation335_spill]] }
  0x20   : > { %6866 = vmatmul.mubr.msk.f32.vlgmr.msra.gmra.mrb[0].mxu0 %vm698_vm0, %v688_v4 }
  0x25   : > { %v6062_v7 = vld [vmem:[%s10700_s24] ss:$0 sm:$0xff] }
  0x26   : > { %v780_v9 = vld [vmem:[%s10701_s20] sm:$0x1] }
  0x27   : > { %v788_v14 = vrot.slane %v780_v9, %v787_v8 }
  0xf3   : > { %v6867_v10 = vpop.f32.mrb[0].mxu0 }
  0xf4   : > { %v777_v11 = vadd.f32 %v6867_v10, %v6062_v7  ;;  %v771_v12 = vpop.f32.mrb[1].mxu0 }
  0xf5   : > { %v772_v13 = vadd.f32 %v6062_v7, %v771_v12 }
  0xf6   : > { %v791_v15 = vrot.slane %v777_v11, 6 }
  0xf7   : > { %v782_v16 = vrot.slane %v772_v13, 7 }
  0xf8   : > { %802 = vst.msk [vmem:[#allocation2 + $0x10] sm:$0x3] %vm801_vm1, %v791_v15 }
  0xf9   : > { %v794_v17 = vsel %vm793_vm2, %v780_v9, %v782_v16  ;;  %v795_v18 = vsel %vm793_vm2, %v782_v16, %v788_v14 }
  0xfa   : > { %v797_v19 = vsel %vm796_vm3, %v795_v18, %v791_v15  ;;  %799 = vst.msk [vmem:[#allocation2] sm:$0xff] %vm798_vm4, %v794_v17 }
  0xfb   : > { %800 = vst.msk [vmem:[#allocation2 + $0x8] sm:$0xff] %vm798_vm4, %v797_v19 }
  0xfc PF: > { %s10702_s2 = scalar_lea.vmem %s10637_s8, %s8117_s23  ;;  %s10704_s29 = scalar_lea.vmem %s10638_s9, %s8117_s23  ;;  %v8210_v22 = vld [vmem:[%s8150_s5] sm:$0xff]  ;;  %v8213_v23 = vld [vmem:[%s8150_s5 + $0x8] sm:$0xff]  ;;  %v8216_v24 = vld [vmem:[%s8150_s5 + $0x10] sm:$0xff]  ;;  %v10651_v26 = vmov 0.0|0.0   ;;  %vm8000_vm5 = vmmov 0   ;;  %v10649_v30 = vmov 0.0  }
  0xfd   : > { %v8200_v20 = vld [vmem:[%s10702_s2] sm:$0x1]  ;;  %10706 = vst [vmem:[#allocation9_spill] sm:$0xff] %v8210_v22  ;;  %10707 = vst [vmem:[#allocation10_spill] sm:$0xff] %v8216_v24  ;;  %v8219_v25 = vld [vmem:[%s8150_s5 + $0x18] sm:$0xff]  ;;  %7018 = vmatprep.subr.bf16.mxu0 %v10651_v26  ;;  %6876 = vmatprep.mubr.msk.f32.mxu0 %vm8000_vm5, %v10649_v30  ;;  %vm1149_vm6 = vcmask 261120  }
  0xfe   : > { %10703 = vst [vmem:[#allocation7_spill] sm:$0xff] %v8200_v20  ;;  %v8207_v21 = vld [vmem:[%s10704_s29] sm:$0x1]  ;;  %10708 = vst [vmem:[#allocation11_spill] sm:$0xff] %v8219_v25  ;;  %v8226_v28 = vld [vmem:[%s8150_s5 + $0x28] sm:$0xff]  ;;  %vm1245_vm7 = vcmask 64512  }
  0xff   : > { %10705 = vst [vmem:[#allocation8_spill] sm:$0xff] %v8207_v21  ;;  %v8223_v27 = vld [vmem:[%s8150_s5 + $0x20] sm:$0xff]  ;;  %10710 = vst [vmem:[#allocation13_spill] sm:$0xff] %v8226_v28  ;;  %v8229_v29 = vld [vmem:[%s8150_s5 + $0x30] sm:$0xff]  ;;  %s8003_s3 = smov 96   ;;  %s8004_s25 = smov 88  }
 0x100   : > { %10709 = vst [vmem:[#allocation12_spill] sm:$0xff] %v8223_v27  ;;  %10711 = vst [vmem:[#allocation14_spill] sm:$0xff] %v8229_v29  ;;  %v8234_v31 = vld [vmem:[%s8150_s5 + $0x38] sm:$0xff]  ;;  %v8237_v32 = vld [vmem:[%s8150_s5 + $0x40] sm:$0xff]  ;;  %vm1333_vm9 = vcmask 65536   ;;  %vm1329_vm10 = vcmask 72704  }
 0x101   : > { %10712 = vst [vmem:[#allocation15_spill] sm:$0xff] %v8234_v31  ;;  %10713 = vst [vmem:[#allocation16_spill] sm:$0xff] %v8237_v32  ;;  %v8240_v33 = vld [vmem:[%s8150_s5 + $0x48] sm:$0xff]  ;;  %v8243_v34 = vld [vmem:[%s8150_s5 + $0x50] sm:$0xff]  ;;  %s8005_s2 = smov 64   ;;  %vm1364_vm11 = vcmask 1040384  }
 0x102   : > { %10714 = vst [vmem:[#allocation17_spill] sm:$0xff] %v8240_v33  ;;  %10715 = vst [vmem:[#allocation18_spill] sm:$0xff] %v8243_v34  ;;  %v8246_v35 = vld [vmem:[%s8150_s5 + $0x58] sm:$0xff]  ;;  %v8249_v36 = vld [vmem:[%s8150_s5 + $0x60] sm:$0xff]  ;;  %vm8006_vm12 = vmmov 1   ;;  %s8007_s6 = smov 80  }
 0x103   : > { %10716 = vst [vmem:[#allocation19_spill] sm:$0xff] %v8246_v35  ;;  %10717 = vst [vmem:[#allocation20_spill] sm:$0xff] %v8249_v36  ;;  %v8252_v37 = vld [vmem:[%s8150_s5 + $0x68] sm:$0xff]  ;;  %v8255_v38 = vld [vmem:[%s8150_s5 + $0x70] sm:$0xff]  ;;  %s8008_s4 = smov 56   ;;  %s8009_s29 = smov 112  }
 0x104   : > { %10718 = vst [vmem:[#allocation21_spill] sm:$0xff] %v8252_v37  ;;  %10719 = vst [vmem:[#allocation22_spill] sm:$0xff] %v8255_v38  ;;  %v8258_v39 = vld [vmem:[%s8150_s5 + $0x78] sm:$0xff]  ;;  %v8261_v40 = vld [vmem:[%s8150_s5 + $0x80] sm:$0xff]  ;;  %s8012_s24 = smov 48   ;;  %vm2078_vm14 = vcmask 1046528  }
 0x105   : > { %10720 = vst [vmem:[#allocation23_spill] sm:$0xff] %v8258_v39  ;;  %10721 = vst [vmem:[#allocation24_spill] sm:$0xff] %v8261_v40  ;;  %v8264_v41 = vld [vmem:[%s8150_s5 + $0x88] sm:$0xff]  ;;  %v8267_v42 = vld [vmem:[%s8150_s5 + $0x90] sm:$0xff]  ;;  %s8013_s17 = smov 40   ;;  %s8014_s21 = smov 8  }
 0x106   : > { %10722 = vst [vmem:[#allocation25_spill] sm:$0xff] %v8264_v41  ;;  %10723 = vst [vmem:[#allocation26_spill] sm:$0xff] %v8267_v42  ;;  %v8270_v43 = vld [vmem:[%s8150_s5 + $0x98] sm:$0xff]  ;;  %v8273_v44 = vld [vmem:[%s8150_s5 + $0xa0] sm:$0xff]  ;;  %s8015_s20 = smov 16   ;;  %vm2071_vm15 = vcmask 130048  }
 0x107   : > { %10724 = vst [vmem:[#allocation27_spill] sm:$0xff] %v8270_v43  ;;  %10725 = vst [vmem:[#allocation28_spill] sm:$0xff] %v8273_v44  ;;  %v8276_v45 = vld [vmem:[%s8150_s5 + $0xa8] sm:$0xff]  ;;  %v8279_v46 = vld [vmem:[%s8150_s5 + $0xb0] sm:$0xff]  ;;  %vm2074_vm0 = vcmask 195584   ;;  %p6129_p5 = scmp.ge.s32.totalorder %s8111_s22, 1 }
 0x108   : > { %10726 = vst [vmem:[#allocation29_spill] sm:$0xff] %v8276_v45  ;;  %10727 = vst [vmem:[#allocation30_spill] sm:$0xff] %v8279_v46  ;;  %v8282_v47 = vld [vmem:[%s8150_s5 + $0xb8] sm:$0xff]  ;;  %v8285_v48 = vld [vmem:[%s8150_s5 + $0xc0] sm:$0xff]  ;;  %vm3026_vm1 = vcmask (!%p6129_p5), 254976  }
 0x109   : > { %10728 = vst [vmem:[#allocation31_spill] sm:$0xff] %v8282_v47  ;;  %10729 = vst [vmem:[#allocation32_spill] sm:$0xff] %v8285_v48  ;;  %v8288_v49 = vld [vmem:[%s8150_s5 + $0xc8] sm:$0xff]  ;;  %v8291_v50 = vld [vmem:[%s8150_s5 + $0xd0] sm:$0xff] }
 0x10a   : > { %10730 = vst [vmem:[#allocation33_spill] sm:$0xff] %v8288_v49  ;;  %10731 = vst [vmem:[#allocation34_spill] sm:$0xff] %v8291_v50  ;;  %v8294_v51 = vld [vmem:[%s8150_s5 + $0xd8] sm:$0xff]  ;;  %v8297_v52 = vld [vmem:[%s8150_s5 + $0xe0] sm:$0xff] }
 0x10b   : > { %10732 = vst [vmem:[#allocation35_spill] sm:$0xff] %v8294_v51  ;;  %10733 = vst [vmem:[#allocation36_spill] sm:$0xff] %v8297_v52  ;;  %v8300_v53 = vld [vmem:[%s8150_s5 + $0xe8] sm:$0xff]  ;;  %v8303_v54 = vld [vmem:[%s8150_s5 + $0xf0] sm:$0xff] }
 0x10c   : > { %10734 = vst [vmem:[#allocation37_spill] sm:$0xff] %v8300_v53  ;;  %10735 = vst [vmem:[#allocation38_spill] sm:$0xff] %v8303_v54  ;;  %v8306_v55 = vld [vmem:[%s8150_s5 + $0xf8] sm:$0xff]  ;;  %v8309_v56 = vld [vmem:[%s8150_s5 + $0x100] sm:$0xff] }
 0x10d   : > { %10736 = vst [vmem:[#allocation39_spill] sm:$0xff] %v8306_v55  ;;  %10737 = vst [vmem:[#allocation40_spill] sm:$0xff] %v8309_v56  ;;  %v8312_v57 = vld [vmem:[%s8150_s5 + $0x108] sm:$0xff]  ;;  %v8315_v58 = vld [vmem:[%s8150_s5 + $0x110] sm:$0xff] }
 0x10e   : > { %10738 = vst [vmem:[#allocation41_spill] sm:$0xff] %v8312_v57  ;;  %10739 = vst [vmem:[#allocation42_spill] sm:$0xff] %v8315_v58  ;;  %v8318_v59 = vld [vmem:[%s8150_s5 + $0x118] sm:$0xff]  ;;  %v8321_v60 = vld [vmem:[%s8150_s5 + $0x120] sm:$0xff] }
 0x10f   : > { %10740 = vst [vmem:[#allocation43_spill] sm:$0xff] %v8318_v59  ;;  %10741 = vst [vmem:[#allocation44_spill] sm:$0xff] %v8321_v60  ;;  %v8324_v61 = vld [vmem:[%s8150_s5 + $0x128] sm:$0xff]  ;;  %v8327_v62 = vld [vmem:[%s8150_s5 + $0x130] sm:$0xff] }
 0x110   : > { %10742 = vst [vmem:[#allocation45_spill] sm:$0xff] %v8324_v61  ;;  %10743 = vst [vmem:[#allocation46_spill] sm:$0xff] %v8327_v62  ;;  %v8330_v63 = vld [vmem:[%s8150_s5 + $0x138] sm:$0xff]  ;;  %v8333_v0 = vld [vmem:[%s8150_s5 + $0x140] sm:$0xff] }
 0x111   : > { %10744 = vst [vmem:[#allocation47_spill] sm:$0xff] %v8330_v63  ;;  %10745 = vst [vmem:[#allocation48_spill] sm:$0xff] %v8333_v0  ;;  %v8336_v1 = vld [vmem:[%s8150_s5 + $0x148] sm:$0xff]  ;;  %v8339_v2 = vld [vmem:[%s8150_s5 + $0x150] sm:$0xff] }
 0x112   : > { %10746 = vst [vmem:[#allocation49_spill] sm:$0xff] %v8336_v1  ;;  %10747 = vst [vmem:[#allocation50_spill] sm:$0xff] %v8339_v2  ;;  %v8342_v3 = vld [vmem:[%s8150_s5 + $0x158] sm:$0xff]  ;;  %v8345_v4 = vld [vmem:[%s8150_s5 + $0x160] sm:$0xff] }
 0x113   : > { %10748 = vst [vmem:[#allocation51_spill] sm:$0xff] %v8342_v3  ;;  %10749 = vst [vmem:[#allocation52_spill] sm:$0xff] %v8345_v4  ;;  %v8348_v5 = vld [vmem:[%s8150_s5 + $0x168] sm:$0xff]  ;;  %v8351_v6 = vld [vmem:[%s8150_s5 + $0x170] sm:$0xff] }
 0x114   : > { %10750 = vst [vmem:[#allocation53_spill] sm:$0xff] %v8348_v5  ;;  %10751 = vst [vmem:[#allocation54_spill] sm:$0xff] %v8351_v6  ;;  %v8354_v7 = vld [vmem:[%s8150_s5 + $0x178] sm:$0xff]  ;;  %v8357_v8 = vld [vmem:[%s8150_s5 + $0x180] sm:$0xff] }
 0x115   : > { %10752 = vst [vmem:[#allocation55_spill] sm:$0xff] %v8354_v7  ;;  %10753 = vst [vmem:[#allocation56_spill] sm:$0xff] %v8357_v8  ;;  %v8360_v9 = vld [vmem:[%s8150_s5 + $0x188] sm:$0xff]  ;;  %v8363_v10 = vld [vmem:[%s8150_s5 + $0x190] sm:$0xff] }
 0x116   : > { %10754 = vst [vmem:[#allocation57_spill] sm:$0xff] %v8360_v9  ;;  %10755 = vst [vmem:[#allocation58_spill] sm:$0xff] %v8363_v10  ;;  %v8366_v11 = vld [vmem:[%s8150_s5 + $0x198] sm:$0xff]  ;;  %v8369_v12 = vld [vmem:[%s8150_s5 + $0x1a0] sm:$0xff] }
 0x117   : > { %10756 = vst [vmem:[#allocation59_spill] sm:$0xff] %v8366_v11  ;;  %10757 = vst [vmem:[#allocation60_spill] sm:$0xff] %v8369_v12  ;;  %v8372_v13 = vld [vmem:[%s8150_s5 + $0x1a8] sm:$0xff]  ;;  %v8375_v14 = vld [vmem:[%s8150_s5 + $0x1b0] sm:$0xff] }
 0x118   : > { %10758 = vst [vmem:[#allocation61_spill] sm:$0xff] %v8372_v13  ;;  %10759 = vst [vmem:[#allocation62_spill] sm:$0xff] %v8375_v14  ;;  %v8378_v15 = vld [vmem:[%s8150_s5 + $0x1b8] sm:$0xff]  ;;  %v8381_v16 = vld [vmem:[%s8150_s5 + $0x1c0] sm:$0xff] }
 0x119   : > { %10760 = vst [vmem:[#allocation63_spill] sm:$0xff] %v8378_v15  ;;  %10761 = vst [vmem:[#allocation64_spill] sm:$0xff] %v8381_v16  ;;  %v8384_v17 = vld [vmem:[%s8150_s5 + $0x1c8] sm:$0xff]  ;;  %v8387_v18 = vld [vmem:[%s8150_s5 + $0x1d0] sm:$0xff] }
 0x11a   : > { %10762 = vst [vmem:[#allocation65_spill] sm:$0xff] %v8384_v17  ;;  %10763 = vst [vmem:[#allocation66_spill] sm:$0xff] %v8387_v18  ;;  %v8390_v19 = vld [vmem:[%s8150_s5 + $0x1d8] sm:$0xff]  ;;  %v8393_v30 = vld [vmem:[%s8150_s5 + $0x1e0] sm:$0xff] }
 0x11b   : > { %10764 = vst [vmem:[#allocation67_spill] sm:$0xff] %v8390_v19  ;;  %10765 = vst [vmem:[#allocation68_spill] sm:$0xff] %v8393_v30  ;;  %v8396_v26 = vld [vmem:[%s8150_s5 + $0x1e8] sm:$0xff]  ;;  %v8399_v6 = vld [vmem:[%s8150_s5 + $0x1f0] sm:$0xff] }
 0x11c   : > { %10766 = vst [vmem:[#allocation69_spill] sm:$0xff] %v8396_v26  ;;  %10767 = vst [vmem:[#allocation70_spill] sm:$0xff] %v8399_v6  ;;  %v8402_v4 = vld [vmem:[%s8150_s5 + $0x1f8] sm:$0xff]  ;;  %v8405_v7 = vld [vmem:[%s8156_s19] sm:$0xff]  ;;  %s8010_s5 = smov 72  }
 0x11d   : > { %10768 = vst [vmem:[#allocation71_spill] sm:$0xff] %v8402_v4  ;;  %10769 = vst [vmem:[#allocation72_spill] sm:$0xff] %v8405_v7  ;;  %v8408_v5 = vld [vmem:[%s8156_s19 + $0x8] sm:$0xff]  ;;  %v8411_v54 = vld [vmem:[%s8162_s16] sm:$0xff]  ;;  %s8011_s19 = smov 104  }
 0x11e   : > { %10770 = vst [vmem:[#allocation73_spill] sm:$0xff] %v8408_v5  ;;  %10771 = vst [vmem:[#allocation74_spill] sm:$0xff] %v8411_v54  ;;  %v8414_v30 = vld [vmem:[%s8162_s16 + $0x8] sm:$0xff]  ;;  %v8417_v26 = vld [vmem:[%s8162_s16 + $0x10] sm:$0xff] }
 0x11f   : > { %10772 = vst [vmem:[#allocation75_spill] sm:$0xff] %v8414_v30  ;;  %10773 = vst [vmem:[#allocation76_spill] sm:$0xff] %v8417_v26  ;;  %v8420_v6 = vld [vmem:[%s8162_s16 + $0x18] sm:$0xff]  ;;  %v8423_v4 = vld [vmem:[%s8162_s16 + $0x20] sm:$0xff] }
 0x120   : > { %10774 = vst [vmem:[#allocation77_spill] sm:$0xff] %v8420_v6  ;;  %10775 = vst [vmem:[#allocation78_spill] sm:$0xff] %v8423_v4  ;;  %v8426_v7 = vld [vmem:[%s8162_s16 + $0x28] sm:$0xff]  ;;  %v8429_v5 = vld [vmem:[%s8162_s16 + $0x30] sm:$0xff] }
 0x121   : > { %10776 = vst [vmem:[#allocation79_spill] sm:$0xff] %v8426_v7  ;;  %10777 = vst [vmem:[#allocation80_spill] sm:$0xff] %v8429_v5  ;;  %v8432_v54 = vld [vmem:[%s8162_s16 + $0x38] sm:$0xff]  ;;  %v8435_v30 = vld [vmem:[%s8162_s16 + $0x40] sm:$0xff] }
 0x122   : > { %10778 = vst [vmem:[#allocation81_spill] sm:$0xff] %v8432_v54  ;;  %10779 = vst [vmem:[#allocation82_spill] sm:$0xff] %v8435_v30  ;;  %v8438_v26 = vld [vmem:[%s8162_s16 + $0x48] sm:$0xff]  ;;  %v8441_v6 = vld [vmem:[%s8162_s16 + $0x50] sm:$0xff] }
 0x123   : > { %10780 = vst [vmem:[#allocation83_spill] sm:$0xff] %v8438_v26  ;;  %10781 = vst [vmem:[#allocation84_spill] sm:$0xff] %v8441_v6  ;;  %v8444_v4 = vld [vmem:[%s8162_s16 + $0x58] sm:$0xff]  ;;  %v8447_v7 = vld [vmem:[%s8162_s16 + $0x60] sm:$0xff] }
 0x124   : > { %10782 = vst [vmem:[#allocation85_spill] sm:$0xff] %v8444_v4  ;;  %10783 = vst [vmem:[#allocation86_spill] sm:$0xff] %v8447_v7  ;;  %v8450_v5 = vld [vmem:[%s8162_s16 + $0x68] sm:$0xff]  ;;  %v8453_v54 = vld [vmem:[%s8162_s16 + $0x70] sm:$0xff] }
 0x125   : > { %10784 = vst [vmem:[#allocation87_spill] sm:$0xff] %v8450_v5  ;;  %10785 = vst [vmem:[#allocation88_spill] sm:$0xff] %v8453_v54  ;;  %v8456_v30 = vld [vmem:[%s8162_s16 + $0x78] sm:$0xff]  ;;  %v8459_v26 = vld [vmem:[%s8162_s16 + $0x80] sm:$0xff] }
 0x126   : > { %10786 = vst [vmem:[#allocation89_spill] sm:$0xff] %v8456_v30  ;;  %10787 = vst [vmem:[#allocation90_spill] sm:$0xff] %v8459_v26  ;;  %v8462_v6 = vld [vmem:[%s8162_s16 + $0x88] sm:$0xff]  ;;  %v8465_v4 = vld [vmem:[%s8162_s16 + $0x90] sm:$0xff] }
 0x127   : > { %10788 = vst [vmem:[#allocation91_spill] sm:$0xff] %v8462_v6  ;;  %10789 = vst [vmem:[#allocation92_spill] sm:$0xff] %v8465_v4  ;;  %v8468_v7 = vld [vmem:[%s8162_s16 + $0x98] sm:$0xff]  ;;  %v8471_v5 = vld [vmem:[%s8162_s16 + $0xa0] sm:$0xff] }
 0x128   : > { %10790 = vst [vmem:[#allocation93_spill] sm:$0xff] %v8468_v7  ;;  %10791 = vst [vmem:[#allocation94_spill] sm:$0xff] %v8471_v5  ;;  %v8474_v54 = vld [vmem:[%s8162_s16 + $0xa8] sm:$0xff]  ;;  %v8477_v30 = vld [vmem:[%s8162_s16 + $0xb0] sm:$0xff] }
 0x129   : > { %10792 = vst [vmem:[#allocation95_spill] sm:$0xff] %v8474_v54  ;;  %10793 = vst [vmem:[#allocation96_spill] sm:$0xff] %v8477_v30  ;;  %v8480_v26 = vld [vmem:[%s8162_s16 + $0xb8] sm:$0xff]  ;;  %v8483_v6 = vld [vmem:[%s8162_s16 + $0xc0] sm:$0xff] }
 0x12a   : > { %10794 = vst [vmem:[#allocation97_spill] sm:$0xff] %v8480_v26  ;;  %10795 = vst [vmem:[#allocation98_spill] sm:$0xff] %v8483_v6  ;;  %v8486_v4 = vld [vmem:[%s8162_s16 + $0xc8] sm:$0xff]  ;;  %v8489_v7 = vld [vmem:[%s8162_s16 + $0xd0] sm:$0xff] }
 0x12b   : > { %10796 = vst [vmem:[#allocation99_spill] sm:$0xff] %v8486_v4  ;;  %10797 = vst [vmem:[#allocation100_spill] sm:$0xff] %v8489_v7  ;;  %v8492_v5 = vld [vmem:[%s8162_s16 + $0xd8] sm:$0xff]  ;;  %v8495_v54 = vld [vmem:[%s8162_s16 + $0xe0] sm:$0xff] }
 0x12c   : > { %10798 = vst [vmem:[#allocation101_spill] sm:$0xff] %v8492_v5  ;;  %10799 = vst [vmem:[#allocation102_spill] sm:$0xff] %v8495_v54  ;;  %v8498_v30 = vld [vmem:[%s8162_s16 + $0xe8] sm:$0xff]  ;;  %v8501_v26 = vld [vmem:[%s8162_s16 + $0xf0] sm:$0xff] }
 0x12d   : > { %10800 = vst [vmem:[#allocation103_spill] sm:$0xff] %v8498_v30  ;;  %10801 = vst [vmem:[#allocation104_spill] sm:$0xff] %v8501_v26  ;;  %v8504_v6 = vld [vmem:[%s8162_s16 + $0xf8] sm:$0xff]  ;;  %v8507_v4 = vld [vmem:[%s8162_s16 + $0x100] sm:$0xff] }
 0x12e   : > { %10802 = vst [vmem:[#allocation105_spill] sm:$0xff] %v8504_v6  ;;  %10803 = vst [vmem:[#allocation106_spill] sm:$0xff] %v8507_v4  ;;  %v8510_v7 = vld [vmem:[%s8162_s16 + $0x108] sm:$0xff]  ;;  %v8513_v5 = vld [vmem:[%s8162_s16 + $0x110] sm:$0xff] }
 0x12f   : > { %10804 = vst [vmem:[#allocation107_spill] sm:$0xff] %v8510_v7  ;;  %10805 = vst [vmem:[#allocation108_spill] sm:$0xff] %v8513_v5  ;;  %v8516_v54 = vld [vmem:[%s8162_s16 + $0x118] sm:$0xff]  ;;  %v8519_v30 = vld [vmem:[%s8162_s16 + $0x120] sm:$0xff] }
 0x130   : > { %10806 = vst [vmem:[#allocation109_spill] sm:$0xff] %v8516_v54  ;;  %10807 = vst [vmem:[#allocation110_spill] sm:$0xff] %v8519_v30  ;;  %v8522_v26 = vld [vmem:[%s8162_s16 + $0x128] sm:$0xff]  ;;  %v8525_v6 = vld [vmem:[%s8162_s16 + $0x130] sm:$0xff] }
 0x131   : > { %10808 = vst [vmem:[#allocation111_spill] sm:$0xff] %v8522_v26  ;;  %10809 = vst [vmem:[#allocation112_spill] sm:$0xff] %v8525_v6  ;;  %v8528_v4 = vld [vmem:[%s8162_s16 + $0x138] sm:$0xff]  ;;  %v8531_v7 = vld [vmem:[%s8162_s16 + $0x140] sm:$0xff] }
 0x132   : > { %10810 = vst [vmem:[#allocation113_spill] sm:$0xff] %v8528_v4  ;;  %10811 = vst [vmem:[#allocation114_spill] sm:$0xff] %v8531_v7  ;;  %v8534_v5 = vld [vmem:[%s8162_s16 + $0x148] sm:$0xff]  ;;  %v8537_v54 = vld [vmem:[%s8162_s16 + $0x150] sm:$0xff] }
 0x133   : > { %10812 = vst [vmem:[#allocation115_spill] sm:$0xff] %v8534_v5  ;;  %10813 = vst [vmem:[#allocation116_spill] sm:$0xff] %v8537_v54  ;;  %v8540_v30 = vld [vmem:[%s8162_s16 + $0x158] sm:$0xff]  ;;  %v8543_v26 = vld [vmem:[%s8162_s16 + $0x160] sm:$0xff] }
 0x134   : > { %10814 = vst [vmem:[#allocation117_spill] sm:$0xff] %v8540_v30  ;;  %10815 = vst [vmem:[#allocation118_spill] sm:$0xff] %v8543_v26  ;;  %v8546_v6 = vld [vmem:[%s8162_s16 + $0x168] sm:$0xff]  ;;  %v8549_v4 = vld [vmem:[%s8162_s16 + $0x170] sm:$0xff] }
 0x135   : > { %10816 = vst [vmem:[#allocation119_spill] sm:$0xff] %v8546_v6  ;;  %10817 = vst [vmem:[#allocation120_spill] sm:$0xff] %v8549_v4  ;;  %v8552_v7 = vld [vmem:[%s8162_s16 + $0x178] sm:$0xff]  ;;  %v8555_v5 = vld [vmem:[%s8162_s16 + $0x180] sm:$0xff] }
 0x136   : > { %10818 = vst [vmem:[#allocation121_spill] sm:$0xff] %v8552_v7  ;;  %10819 = vst [vmem:[#allocation122_spill] sm:$0xff] %v8555_v5  ;;  %v8558_v54 = vld [vmem:[%s8162_s16 + $0x188] sm:$0xff]  ;;  %v8561_v30 = vld [vmem:[%s8162_s16 + $0x190] sm:$0xff] }
 0x137   : > { %10820 = vst [vmem:[#allocation123_spill] sm:$0xff] %v8558_v54  ;;  %10821 = vst [vmem:[#allocation124_spill] sm:$0xff] %v8561_v30  ;;  %v8564_v26 = vld [vmem:[%s8162_s16 + $0x198] sm:$0xff]  ;;  %v8567_v6 = vld [vmem:[%s8162_s16 + $0x1a0] sm:$0xff] }
 0x138   : > { %10822 = vst [vmem:[#allocation125_spill] sm:$0xff] %v8564_v26  ;;  %10823 = vst [vmem:[#allocation126_spill] sm:$0xff] %v8567_v6  ;;  %v8570_v4 = vld [vmem:[%s8162_s16 + $0x1a8] sm:$0xff]  ;;  %v8573_v7 = vld [vmem:[%s8162_s16 + $0x1b0] sm:$0xff] }
 0x139   : > { %10824 = vst [vmem:[#allocation127_spill] sm:$0xff] %v8570_v4  ;;  %10825 = vst [vmem:[#allocation128_spill] sm:$0xff] %v8573_v7  ;;  %v8576_v5 = vld [vmem:[%s8162_s16 + $0x1b8] sm:$0xff]  ;;  %v8579_v54 = vld [vmem:[%s8162_s16 + $0x1c0] sm:$0xff] }
 0x13a   : > { %10826 = vst [vmem:[#allocation129_spill] sm:$0xff] %v8576_v5  ;;  %10827 = vst [vmem:[#allocation130_spill] sm:$0xff] %v8579_v54  ;;  %v8582_v30 = vld [vmem:[%s8162_s16 + $0x1c8] sm:$0xff]  ;;  %v8585_v26 = vld [vmem:[%s8162_s16 + $0x1d0] sm:$0xff] }
 0x13b   : > { %10828 = vst [vmem:[#allocation131_spill] sm:$0xff] %v8582_v30  ;;  %10829 = vst [vmem:[#allocation132_spill] sm:$0xff] %v8585_v26  ;;  %v8588_v6 = vld [vmem:[%s8162_s16 + $0x1d8] sm:$0xff]  ;;  %v8591_v4 = vld [vmem:[%s8162_s16 + $0x1e0] sm:$0xff] }
 0x13c   : > { %10830 = vst [vmem:[#allocation133_spill] sm:$0xff] %v8588_v6  ;;  %10831 = vst [vmem:[#allocation134_spill] sm:$0xff] %v8591_v4  ;;  %v8594_v7 = vld [vmem:[%s8162_s16 + $0x1e8] sm:$0xff]  ;;  %v8597_v5 = vld [vmem:[%s8162_s16 + $0x1f0] sm:$0xff] }
 0x13d   : > { %10832 = vst [vmem:[#allocation135_spill] sm:$0xff] %v8594_v7  ;;  %10833 = vst [vmem:[#allocation136_spill] sm:$0xff] %v8597_v5  ;;  %v8600_v54 = vld [vmem:[%s8162_s16 + $0x1f8] sm:$0xff]  ;;  %v8603_v30 = vld [vmem:[%s8162_s16 + $0x200] sm:$0xff] }
 0x13e   : > { %10834 = vst [vmem:[#allocation137_spill] sm:$0xff] %v8600_v54  ;;  %10835 = vst [vmem:[#allocation138_spill] sm:$0xff] %v8603_v30  ;;  %v8606_v26 = vld [vmem:[%s8162_s16 + $0x208] sm:$0xff]  ;;  %v8609_v6 = vld [vmem:[%s8162_s16 + $0x210] sm:$0xff] }
 0x13f   : > { %10836 = vst [vmem:[#allocation139_spill] sm:$0xff] %v8606_v26  ;;  %10837 = vst [vmem:[#allocation140_spill] sm:$0xff] %v8609_v6  ;;  %v8612_v4 = vld [vmem:[%s8162_s16 + $0x218] sm:$0xff]  ;;  %v8615_v7 = vld [vmem:[%s8162_s16 + $0x220] sm:$0xff] }
 0x140   : > { %10838 = vst [vmem:[#allocation141_spill] sm:$0xff] %v8612_v4  ;;  %10839 = vst [vmem:[#allocation142_spill] sm:$0xff] %v8615_v7  ;;  %v8618_v5 = vld [vmem:[%s8162_s16 + $0x228] sm:$0xff]  ;;  %v8621_v54 = vld [vmem:[%s8162_s16 + $0x230] sm:$0xff] }
 0x141   : > { %10840 = vst [vmem:[#allocation143_spill] sm:$0xff] %v8618_v5  ;;  %10841 = vst [vmem:[#allocation144_spill] sm:$0xff] %v8621_v54  ;;  %v8624_v30 = vld [vmem:[%s8162_s16 + $0x238] sm:$0xff]  ;;  %v8627_v26 = vld [vmem:[%s8162_s16 + $0x240] sm:$0xff] }
 0x142   : > { %10842 = vst [vmem:[#allocation145_spill] sm:$0xff] %v8624_v30  ;;  %10843 = vst [vmem:[#allocation146_spill] sm:$0xff] %v8627_v26  ;;  %v8630_v6 = vld [vmem:[%s8162_s16 + $0x248] sm:$0xff]  ;;  %v8633_v4 = vld [vmem:[%s8162_s16 + $0x250] sm:$0xff] }
 0x143   : > { %10844 = vst [vmem:[#allocation147_spill] sm:$0xff] %v8630_v6  ;;  %10845 = vst [vmem:[#allocation148_spill] sm:$0xff] %v8633_v4  ;;  %v8636_v7 = vld [vmem:[%s8162_s16 + $0x258] sm:$0xff]  ;;  %v8639_v5 = vld [vmem:[%s8162_s16 + $0x260] sm:$0xff] }
 0x144   : > { %10846 = vst [vmem:[#allocation149_spill] sm:$0xff] %v8636_v7  ;;  %10847 = vst [vmem:[#allocation150_spill] sm:$0xff] %v8639_v5  ;;  %v8642_v54 = vld [vmem:[%s8162_s16 + $0x268] sm:$0xff]  ;;  %v8645_v30 = vld [vmem:[%s8162_s16 + $0x270] sm:$0xff] }
 0x145   : > { %10848 = vst [vmem:[#allocation151_spill] sm:$0xff] %v8642_v54  ;;  %10849 = vst [vmem:[#allocation152_spill] sm:$0xff] %v8645_v30  ;;  %v8648_v26 = vld [vmem:[%s8162_s16 + $0x278] sm:$0xff]  ;;  %v8651_v6 = vld [vmem:[%s8162_s16 + $0x280] sm:$0xff] }
 0x146   : > { %10850 = vst [vmem:[#allocation153_spill] sm:$0xff] %v8648_v26  ;;  %10851 = vst [vmem:[#allocation154_spill] sm:$0xff] %v8651_v6  ;;  %v8654_v4 = vld [vmem:[%s8162_s16 + $0x288] sm:$0xff]  ;;  %v8657_v7 = vld [vmem:[%s8162_s16 + $0x290] sm:$0xff] }
 0x147   : > { %10852 = vst [vmem:[#allocation155_spill] sm:$0xff] %v8654_v4  ;;  %10853 = vst [vmem:[#allocation156_spill] sm:$0xff] %v8657_v7  ;;  %v8660_v5 = vld [vmem:[%s8162_s16 + $0x298] sm:$0xff]  ;;  %v8663_v54 = vld [vmem:[%s8162_s16 + $0x2a0] sm:$0xff] }
 0x148   : > { %10854 = vst [vmem:[#allocation157_spill] sm:$0xff] %v8660_v5  ;;  %10855 = vst [vmem:[#allocation158_spill] sm:$0xff] %v8663_v54  ;;  %v8666_v30 = vld [vmem:[%s8162_s16 + $0x2a8] sm:$0xff]  ;;  %v8669_v26 = vld [vmem:[%s8162_s16 + $0x2b0] sm:$0xff] }
 0x149   : > { %10856 = vst [vmem:[#allocation159_spill] sm:$0xff] %v8666_v30  ;;  %10857 = vst [vmem:[#allocation160_spill] sm:$0xff] %v8669_v26  ;;  %v8672_v6 = vld [vmem:[%s8162_s16 + $0x2b8] sm:$0xff]  ;;  %v8675_v4 = vld [vmem:[%s8162_s16 + $0x2c0] sm:$0xff] }
 0x14a   : > { %10858 = vst [vmem:[#allocation161_spill] sm:$0xff] %v8672_v6  ;;  %10859 = vst [vmem:[#allocation162_spill] sm:$0xff] %v8675_v4  ;;  %v8678_v7 = vld [vmem:[%s8162_s16 + $0x2c8] sm:$0xff]  ;;  %v8681_v5 = vld [vmem:[%s8162_s16 + $0x2d0] sm:$0xff] }
 0x14b   : > { %10860 = vst [vmem:[#allocation163_spill] sm:$0xff] %v8678_v7  ;;  %10861 = vst [vmem:[#allocation164_spill] sm:$0xff] %v8681_v5  ;;  %v8684_v54 = vld [vmem:[%s8162_s16 + $0x2d8] sm:$0xff]  ;;  %v8687_v30 = vld [vmem:[%s8162_s16 + $0x2e0] sm:$0xff] }
 0x14c   : > { %10862 = vst [vmem:[#allocation165_spill] sm:$0xff] %v8684_v54  ;;  %10863 = vst [vmem:[#allocation166_spill] sm:$0xff] %v8687_v30  ;;  %v8690_v26 = vld [vmem:[%s8162_s16 + $0x2e8] sm:$0xff]  ;;  %v8693_v6 = vld [vmem:[%s8162_s16 + $0x2f0] sm:$0xff] }
 0x14d   : > { %10864 = vst [vmem:[#allocation167_spill] sm:$0xff] %v8690_v26  ;;  %10865 = vst [vmem:[#allocation168_spill] sm:$0xff] %v8693_v6  ;;  %v8696_v4 = vld [vmem:[%s8162_s16 + $0x2f8] sm:$0xff]  ;;  %v8699_v7 = vld [vmem:[%s8162_s16 + $0x300] sm:$0xff] }
 0x14e   : > { %10866 = vst [vmem:[#allocation169_spill] sm:$0xff] %v8696_v4  ;;  %10867 = vst [vmem:[#allocation170_spill] sm:$0xff] %v8699_v7  ;;  %v8702_v5 = vld [vmem:[%s8162_s16 + $0x308] sm:$0xff]  ;;  %v8705_v54 = vld [vmem:[%s8162_s16 + $0x310] sm:$0xff] }
 0x14f   : > { %10868 = vst [vmem:[#allocation171_spill] sm:$0xff] %v8702_v5  ;;  %10869 = vst [vmem:[#allocation172_spill] sm:$0xff] %v8705_v54  ;;  %v8708_v30 = vld [vmem:[%s8162_s16 + $0x318] sm:$0xff]  ;;  %v8711_v26 = vld [vmem:[%s8162_s16 + $0x320] sm:$0xff] }
 0x150   : > { %10870 = vst [vmem:[#allocation173_spill] sm:$0xff] %v8708_v30  ;;  %10871 = vst [vmem:[#allocation174_spill] sm:$0xff] %v8711_v26  ;;  %v8714_v6 = vld [vmem:[%s8162_s16 + $0x328] sm:$0xff]  ;;  %v8717_v4 = vld [vmem:[%s8162_s16 + $0x330] sm:$0xff] }
 0x151   : > { %10872 = vst [vmem:[#allocation175_spill] sm:$0xff] %v8714_v6  ;;  %10873 = vst [vmem:[#allocation176_spill] sm:$0xff] %v8717_v4  ;;  %v8720_v7 = vld [vmem:[%s8162_s16 + $0x338] sm:$0xff]  ;;  %v8723_v5 = vld [vmem:[%s8162_s16 + $0x340] sm:$0xff] }
 0x152   : > { %10874 = vst [vmem:[#allocation177_spill] sm:$0xff] %v8720_v7  ;;  %10875 = vst [vmem:[#allocation178_spill] sm:$0xff] %v8723_v5  ;;  %v8726_v54 = vld [vmem:[%s8162_s16 + $0x348] sm:$0xff]  ;;  %v8729_v30 = vld [vmem:[%s8162_s16 + $0x350] sm:$0xff] }
 0x153   : > { %10876 = vst [vmem:[#allocation179_spill] sm:$0xff] %v8726_v54  ;;  %10877 = vst [vmem:[#allocation180_spill] sm:$0xff] %v8729_v30  ;;  %v8732_v26 = vld [vmem:[%s8162_s16 + $0x358] sm:$0xff]  ;;  %v8735_v6 = vld [vmem:[%s8162_s16 + $0x360] sm:$0xff] }
 0x154   : > { %10878 = vst [vmem:[#allocation181_spill] sm:$0xff] %v8732_v26  ;;  %10879 = vst [vmem:[#allocation182_spill] sm:$0xff] %v8735_v6  ;;  %v8738_v4 = vld [vmem:[%s8162_s16 + $0x368] sm:$0xff]  ;;  %v8741_v7 = vld [vmem:[%s8162_s16 + $0x370] sm:$0xff] }
 0x155   : > { %10880 = vst [vmem:[#allocation183_spill] sm:$0xff] %v8738_v4  ;;  %10881 = vst [vmem:[#allocation184_spill] sm:$0xff] %v8741_v7  ;;  %v8744_v5 = vld [vmem:[%s8162_s16 + $0x378] sm:$0xff]  ;;  %v8747_v54 = vld [vmem:[%s8162_s16 + $0x380] sm:$0xff] }
 0x156   : > { %10882 = vst [vmem:[#allocation185_spill] sm:$0xff] %v8744_v5  ;;  %10883 = vst [vmem:[#allocation186_spill] sm:$0xff] %v8747_v54  ;;  %v8750_v30 = vld [vmem:[%s8162_s16 + $0x388] sm:$0xff]  ;;  %v8753_v26 = vld [vmem:[%s8162_s16 + $0x390] sm:$0xff] }
 0x157   : > { %10884 = vst [vmem:[#allocation187_spill] sm:$0xff] %v8750_v30  ;;  %10885 = vst [vmem:[#allocation188_spill] sm:$0xff] %v8753_v26  ;;  %v8756_v6 = vld [vmem:[%s8162_s16 + $0x398] sm:$0xff]  ;;  %v8759_v4 = vld [vmem:[%s8162_s16 + $0x3a0] sm:$0xff] }
 0x158   : > { %10886 = vst [vmem:[#allocation189_spill] sm:$0xff] %v8756_v6  ;;  %10887 = vst [vmem:[#allocation190_spill] sm:$0xff] %v8759_v4  ;;  %v8762_v7 = vld [vmem:[%s8162_s16 + $0x3a8] sm:$0xff]  ;;  %v8765_v5 = vld [vmem:[%s8162_s16 + $0x3b0] sm:$0xff] }
 0x159   : > { %10888 = vst [vmem:[#allocation191_spill] sm:$0xff] %v8762_v7  ;;  %10889 = vst [vmem:[#allocation192_spill] sm:$0xff] %v8765_v5  ;;  %v8768_v54 = vld [vmem:[%s8162_s16 + $0x3b8] sm:$0xff]  ;;  %v8771_v30 = vld [vmem:[%s8162_s16 + $0x3c0] sm:$0xff] }
 0x15a   : > { %10890 = vst [vmem:[#allocation193_spill] sm:$0xff] %v8768_v54  ;;  %10891 = vst [vmem:[#allocation194_spill] sm:$0xff] %v8771_v30  ;;  %v8774_v26 = vld [vmem:[%s8162_s16 + $0x3c8] sm:$0xff]  ;;  %v8777_v6 = vld [vmem:[%s8162_s16 + $0x3d0] sm:$0xff] }
 0x15b   : > { %10892 = vst [vmem:[#allocation195_spill] sm:$0xff] %v8774_v26  ;;  %10893 = vst [vmem:[#allocation196_spill] sm:$0xff] %v8777_v6  ;;  %v8780_v4 = vld [vmem:[%s8162_s16 + $0x3d8] sm:$0xff]  ;;  %v8783_v7 = vld [vmem:[%s8162_s16 + $0x3e0] sm:$0xff] }
 0x15c   : > { %10894 = vst [vmem:[#allocation197_spill] sm:$0xff] %v8780_v4  ;;  %10895 = vst [vmem:[#allocation198_spill] sm:$0xff] %v8783_v7  ;;  %v8786_v5 = vld [vmem:[%s8162_s16 + $0x3e8] sm:$0xff]  ;;  %v8789_v54 = vld [vmem:[%s8162_s16 + $0x3f0] sm:$0xff] }
 0x15d   : > { %10896 = vst [vmem:[#allocation199_spill] sm:$0xff] %v8786_v5  ;;  %10897 = vst [vmem:[#allocation200_spill] sm:$0xff] %v8789_v54  ;;  %v8792_v30 = vld [vmem:[%s8162_s16 + $0x3f8] sm:$0xff]  ;;  %v8795_v26 = vld [vmem:[%s8162_s16 + $0x400] sm:$0xff] }
 0x15e   : > { %10898 = vst [vmem:[#allocation201_spill] sm:$0xff] %v8792_v30  ;;  %10899 = vst [vmem:[#allocation202_spill] sm:$0xff] %v8795_v26  ;;  %v8798_v6 = vld [vmem:[%s8162_s16 + $0x408] sm:$0xff]  ;;  %v8801_v4 = vld [vmem:[%s8162_s16 + $0x410] sm:$0xff] }
 0x15f   : > { %10900 = vst [vmem:[#allocation203_spill] sm:$0xff] %v8798_v6  ;;  %10901 = vst [vmem:[#allocation204_spill] sm:$0xff] %v8801_v4  ;;  %v8804_v7 = vld [vmem:[%s8162_s16 + $0x418] sm:$0xff]  ;;  %v8807_v5 = vld [vmem:[%s8162_s16 + $0x420] sm:$0xff] }
 0x160   : > { %10902 = vst [vmem:[#allocation205_spill] sm:$0xff] %v8804_v7  ;;  %10903 = vst [vmem:[#allocation206_spill] sm:$0xff] %v8807_v5  ;;  %v8810_v54 = vld [vmem:[%s8162_s16 + $0x428] sm:$0xff]  ;;  %v8813_v30 = vld [vmem:[%s8162_s16 + $0x430] sm:$0xff] }
 0x161   : > { %10904 = vst [vmem:[#allocation207_spill] sm:$0xff] %v8810_v54  ;;  %10905 = vst [vmem:[#allocation208_spill] sm:$0xff] %v8813_v30  ;;  %v8816_v26 = vld [vmem:[%s8162_s16 + $0x438] sm:$0xff]  ;;  %v8819_v6 = vld [vmem:[%s8162_s16 + $0x440] sm:$0xff] }
 0x162   : > { %10906 = vst [vmem:[#allocation209_spill] sm:$0xff] %v8816_v26  ;;  %10907 = vst [vmem:[#allocation210_spill] sm:$0xff] %v8819_v6  ;;  %v8822_v4 = vld [vmem:[%s8162_s16 + $0x448] sm:$0xff]  ;;  %v8825_v7 = vld [vmem:[%s8162_s16 + $0x450] sm:$0xff] }
 0x163   : > { %10908 = vst [vmem:[#allocation211_spill] sm:$0xff] %v8822_v4  ;;  %10909 = vst [vmem:[#allocation212_spill] sm:$0xff] %v8825_v7  ;;  %v8828_v5 = vld [vmem:[%s8162_s16 + $0x458] sm:$0xff]  ;;  %v8831_v54 = vld [vmem:[%s8162_s16 + $0x460] sm:$0xff] }
 0x164   : > { %10910 = vst [vmem:[#allocation213_spill] sm:$0xff] %v8828_v5  ;;  %10911 = vst [vmem:[#allocation214_spill] sm:$0xff] %v8831_v54  ;;  %v8834_v30 = vld [vmem:[%s8162_s16 + $0x468] sm:$0xff]  ;;  %v8837_v26 = vld [vmem:[%s8162_s16 + $0x470] sm:$0xff] }
 0x165   : > { %10912 = vst [vmem:[#allocation215_spill] sm:$0xff] %v8834_v30  ;;  %10913 = vst [vmem:[#allocation216_spill] sm:$0xff] %v8837_v26  ;;  %v8840_v6 = vld [vmem:[%s8162_s16 + $0x478] sm:$0xff]  ;;  %v8843_v4 = vld [vmem:[%s8162_s16 + $0x480] sm:$0xff] }
 0x166   : > { %10914 = vst [vmem:[#allocation217_spill] sm:$0xff] %v8840_v6  ;;  %10915 = vst [vmem:[#allocation218_spill] sm:$0xff] %v8843_v4  ;;  %v8846_v7 = vld [vmem:[%s8162_s16 + $0x488] sm:$0xff]  ;;  %v8849_v5 = vld [vmem:[%s8162_s16 + $0x490] sm:$0xff] }
 0x167   : > { %10916 = vst [vmem:[#allocation219_spill] sm:$0xff] %v8846_v7  ;;  %10917 = vst [vmem:[#allocation220_spill] sm:$0xff] %v8849_v5  ;;  %v8852_v54 = vld [vmem:[%s8162_s16 + $0x498] sm:$0xff]  ;;  %v8855_v30 = vld [vmem:[%s8162_s16 + $0x4a0] sm:$0xff] }
 0x168   : > { %10918 = vst [vmem:[#allocation221_spill] sm:$0xff] %v8852_v54  ;;  %10919 = vst [vmem:[#allocation222_spill] sm:$0xff] %v8855_v30  ;;  %v8858_v26 = vld [vmem:[%s8162_s16 + $0x4a8] sm:$0xff]  ;;  %v8861_v6 = vld [vmem:[%s8162_s16 + $0x4b0] sm:$0xff] }
 0x169   : > { %10920 = vst [vmem:[#allocation223_spill] sm:$0xff] %v8858_v26  ;;  %10921 = vst [vmem:[#allocation224_spill] sm:$0xff] %v8861_v6  ;;  %v8864_v4 = vld [vmem:[%s8162_s16 + $0x4b8] sm:$0xff]  ;;  %v8867_v7 = vld [vmem:[%s8162_s16 + $0x4c0] sm:$0xff] }
 0x16a   : > { %10922 = vst [vmem:[#allocation225_spill] sm:$0xff] %v8864_v4  ;;  %10923 = vst [vmem:[#allocation226_spill] sm:$0xff] %v8867_v7  ;;  %v8870_v5 = vld [vmem:[%s8162_s16 + $0x4c8] sm:$0xff]  ;;  %v8873_v54 = vld [vmem:[%s8162_s16 + $0x4d0] sm:$0xff] }
 0x16b   : > { %10924 = vst [vmem:[#allocation227_spill] sm:$0xff] %v8870_v5  ;;  %10925 = vst [vmem:[#allocation228_spill] sm:$0xff] %v8873_v54  ;;  %v8876_v30 = vld [vmem:[%s8162_s16 + $0x4d8] sm:$0xff]  ;;  %v8879_v26 = vld [vmem:[%s8162_s16 + $0x4e0] sm:$0xff] }
 0x16c   : > { %10926 = vst [vmem:[#allocation229_spill] sm:$0xff] %v8876_v30  ;;  %10927 = vst [vmem:[#allocation230_spill] sm:$0xff] %v8879_v26  ;;  %v8882_v6 = vld [vmem:[%s8162_s16 + $0x4e8] sm:$0xff]  ;;  %v8885_v4 = vld [vmem:[%s8162_s16 + $0x4f0] sm:$0xff] }
 0x16d   : > { %10928 = vst [vmem:[#allocation231_spill] sm:$0xff] %v8882_v6  ;;  %10929 = vst [vmem:[#allocation232_spill] sm:$0xff] %v8885_v4  ;;  %v8888_v7 = vld [vmem:[%s8162_s16 + $0x4f8] sm:$0xff]  ;;  %v8891_v5 = vld [vmem:[%s8162_s16 + $0x500] sm:$0xff] }
 0x16e   : > { %10930 = vst [vmem:[#allocation233_spill] sm:$0xff] %v8888_v7  ;;  %10931 = vst [vmem:[#allocation234_spill] sm:$0xff] %v8891_v5  ;;  %v8894_v54 = vld [vmem:[%s8162_s16 + $0x508] sm:$0xff]  ;;  %v8897_v30 = vld [vmem:[%s8162_s16 + $0x510] sm:$0xff] }
 0x16f   : > { %10932 = vst [vmem:[#allocation235_spill] sm:$0xff] %v8894_v54  ;;  %10933 = vst [vmem:[#allocation236_spill] sm:$0xff] %v8897_v30  ;;  %v8900_v26 = vld [vmem:[%s8162_s16 + $0x518] sm:$0xff]  ;;  %v8903_v6 = vld [vmem:[%s8162_s16 + $0x520] sm:$0xff] }
 0x170   : > { %10934 = vst [vmem:[#allocation237_spill] sm:$0xff] %v8900_v26  ;;  %10935 = vst [vmem:[#allocation238_spill] sm:$0xff] %v8903_v6  ;;  %v8906_v4 = vld [vmem:[%s8162_s16 + $0x528] sm:$0xff]  ;;  %v8909_v7 = vld [vmem:[%s8162_s16 + $0x530] sm:$0xff] }
 0x171   : > { %10936 = vst [vmem:[#allocation239_spill] sm:$0xff] %v8906_v4  ;;  %10937 = vst [vmem:[#allocation240_spill] sm:$0xff] %v8909_v7  ;;  %v8912_v5 = vld [vmem:[%s8162_s16 + $0x538] sm:$0xff]  ;;  %v8915_v54 = vld [vmem:[%s8162_s16 + $0x540] sm:$0xff] }
 0x172   : > { %10938 = vst [vmem:[#allocation241_spill] sm:$0xff] %v8912_v5  ;;  %10939 = vst [vmem:[#allocation242_spill] sm:$0xff] %v8915_v54  ;;  %v8918_v30 = vld [vmem:[%s8162_s16 + $0x548] sm:$0xff]  ;;  %v8921_v26 = vld [vmem:[%s8162_s16 + $0x550] sm:$0xff] }
 0x173   : > { %10940 = vst [vmem:[#allocation243_spill] sm:$0xff] %v8918_v30  ;;  %10941 = vst [vmem:[#allocation244_spill] sm:$0xff] %v8921_v26  ;;  %v8924_v6 = vld [vmem:[%s8162_s16 + $0x558] sm:$0xff]  ;;  %v8927_v4 = vld [vmem:[%s8162_s16 + $0x560] sm:$0xff] }
 0x174   : > { %10942 = vst [vmem:[#allocation245_spill] sm:$0xff] %v8924_v6  ;;  %10943 = vst [vmem:[#allocation246_spill] sm:$0xff] %v8927_v4  ;;  %v8930_v7 = vld [vmem:[%s8162_s16 + $0x568] sm:$0xff]  ;;  %v8933_v5 = vld [vmem:[%s8162_s16 + $0x570] sm:$0xff] }
 0x175   : > { %10944 = vst [vmem:[#allocation247_spill] sm:$0xff] %v8930_v7  ;;  %10945 = vst [vmem:[#allocation248_spill] sm:$0xff] %v8933_v5  ;;  %v8936_v54 = vld [vmem:[%s8162_s16 + $0x578] sm:$0xff]  ;;  %v8939_v30 = vld [vmem:[%s8162_s16 + $0x580] sm:$0xff] }
 0x176   : > { %10946 = vst [vmem:[#allocation249_spill] sm:$0xff] %v8936_v54  ;;  %10947 = vst [vmem:[#allocation250_spill] sm:$0xff] %v8939_v30  ;;  %v8942_v26 = vld [vmem:[%s8162_s16 + $0x588] sm:$0xff]  ;;  %v8945_v6 = vld [vmem:[%s8162_s16 + $0x590] sm:$0xff] }
 0x177   : > { %10948 = vst [vmem:[#allocation251_spill] sm:$0xff] %v8942_v26  ;;  %10949 = vst [vmem:[#allocation252_spill] sm:$0xff] %v8945_v6  ;;  %v8948_v4 = vld [vmem:[%s8162_s16 + $0x598] sm:$0xff]  ;;  %v8951_v7 = vld [vmem:[%s8162_s16 + $0x5a0] sm:$0xff] }
 0x178   : > { %10950 = vst [vmem:[#allocation253_spill] sm:$0xff] %v8948_v4  ;;  %10951 = vst [vmem:[#allocation254_spill] sm:$0xff] %v8951_v7  ;;  %v8954_v5 = vld [vmem:[%s8162_s16 + $0x5a8] sm:$0xff]  ;;  %v8957_v54 = vld [vmem:[%s8162_s16 + $0x5b0] sm:$0xff] }
 0x179   : > { %10952 = vst [vmem:[#allocation255_spill] sm:$0xff] %v8954_v5  ;;  %10953 = vst [vmem:[#allocation256_spill] sm:$0xff] %v8957_v54  ;;  %v8960_v30 = vld [vmem:[%s8162_s16 + $0x5b8] sm:$0xff]  ;;  %v8963_v26 = vld [vmem:[%s8162_s16 + $0x5c0] sm:$0xff] }
 0x17a   : > { %10954 = vst [vmem:[#allocation257_spill] sm:$0xff] %v8960_v30  ;;  %10955 = vst [vmem:[#allocation258_spill] sm:$0xff] %v8963_v26  ;;  %v8966_v6 = vld [vmem:[%s8162_s16 + $0x5c8] sm:$0xff]  ;;  %v8969_v4 = vld [vmem:[%s8162_s16 + $0x5d0] sm:$0xff] }
 0x17b   : > { %10956 = vst [vmem:[#allocation259_spill] sm:$0xff] %v8966_v6  ;;  %10957 = vst [vmem:[#allocation260_spill] sm:$0xff] %v8969_v4  ;;  %v8972_v7 = vld [vmem:[%s8162_s16 + $0x5d8] sm:$0xff]  ;;  %v8975_v5 = vld [vmem:[%s8162_s16 + $0x5e0] sm:$0xff] }
 0x17c   : > { %10958 = vst [vmem:[#allocation261_spill] sm:$0xff] %v8972_v7  ;;  %10959 = vst [vmem:[#allocation262_spill] sm:$0xff] %v8975_v5  ;;  %v8978_v54 = vld [vmem:[%s8162_s16 + $0x5e8] sm:$0xff]  ;;  %v8981_v30 = vld [vmem:[%s8162_s16 + $0x5f0] sm:$0xff] }
 0x17d   : > { %10960 = vst [vmem:[#allocation263_spill] sm:$0xff] %v8978_v54  ;;  %10961 = vst [vmem:[#allocation264_spill] sm:$0xff] %v8981_v30  ;;  %v8984_v26 = vld [vmem:[%s8162_s16 + $0x5f8] sm:$0xff]  ;;  %v8987_v6 = vld [vmem:[%s8162_s16 + $0x600] sm:$0xff] }
 0x17e   : > { %10962 = vst [vmem:[#allocation265_spill] sm:$0xff] %v8984_v26  ;;  %10963 = vst [vmem:[#allocation266_spill] sm:$0xff] %v8987_v6  ;;  %v8990_v4 = vld [vmem:[%s8162_s16 + $0x608] sm:$0xff]  ;;  %v8993_v7 = vld [vmem:[%s8162_s16 + $0x610] sm:$0xff] }
 0x17f   : > { %10964 = vst [vmem:[#allocation267_spill] sm:$0xff] %v8990_v4  ;;  %10965 = vst [vmem:[#allocation268_spill] sm:$0xff] %v8993_v7  ;;  %v8996_v5 = vld [vmem:[%s8162_s16 + $0x618] sm:$0xff]  ;;  %v8999_v54 = vld [vmem:[%s8162_s16 + $0x620] sm:$0xff] }
 0x180   : > { %10966 = vst [vmem:[#allocation269_spill] sm:$0xff] %v8996_v5  ;;  %10967 = vst [vmem:[#allocation270_spill] sm:$0xff] %v8999_v54  ;;  %v9002_v30 = vld [vmem:[%s8162_s16 + $0x628] sm:$0xff]  ;;  %v9005_v26 = vld [vmem:[%s8162_s16 + $0x630] sm:$0xff] }
 0x181   : > { %10968 = vst [vmem:[#allocation271_spill] sm:$0xff] %v9002_v30  ;;  %10969 = vst [vmem:[#allocation272_spill] sm:$0xff] %v9005_v26  ;;  %v9008_v6 = vld [vmem:[%s8162_s16 + $0x638] sm:$0xff]  ;;  %v9011_v4 = vld [vmem:[%s8162_s16 + $0x640] sm:$0xff] }
 0x182   : > { %10970 = vst [vmem:[#allocation273_spill] sm:$0xff] %v9008_v6  ;;  %10971 = vst [vmem:[#allocation274_spill] sm:$0xff] %v9011_v4  ;;  %v9014_v7 = vld [vmem:[%s8162_s16 + $0x648] sm:$0xff]  ;;  %v9017_v5 = vld [vmem:[%s8162_s16 + $0x650] sm:$0xff] }
 0x183   : > { %10972 = vst [vmem:[#allocation275_spill] sm:$0xff] %v9014_v7  ;;  %10973 = vst [vmem:[#allocation276_spill] sm:$0xff] %v9017_v5  ;;  %v9020_v54 = vld [vmem:[%s8162_s16 + $0x658] sm:$0xff]  ;;  %v9023_v30 = vld [vmem:[%s8162_s16 + $0x660] sm:$0xff] }
 0x184   : > { %10974 = vst [vmem:[#allocation277_spill] sm:$0xff] %v9020_v54  ;;  %10975 = vst [vmem:[#allocation278_spill] sm:$0xff] %v9023_v30  ;;  %v9026_v26 = vld [vmem:[%s8162_s16 + $0x668] sm:$0xff]  ;;  %v9029_v6 = vld [vmem:[%s8162_s16 + $0x670] sm:$0xff] }
 0x185   : > { %10976 = vst [vmem:[#allocation279_spill] sm:$0xff] %v9026_v26  ;;  %10977 = vst [vmem:[#allocation280_spill] sm:$0xff] %v9029_v6  ;;  %v9032_v4 = vld [vmem:[%s8162_s16 + $0x678] sm:$0xff]  ;;  %v9035_v7 = vld [vmem:[%s8162_s16 + $0x680] sm:$0xff] }
 0x186   : > { %10978 = vst [vmem:[#allocation281_spill] sm:$0xff] %v9032_v4  ;;  %10979 = vst [vmem:[#allocation282_spill] sm:$0xff] %v9035_v7  ;;  %v9038_v5 = vld [vmem:[%s8162_s16 + $0x688] sm:$0xff]  ;;  %v9041_v54 = vld [vmem:[%s8162_s16 + $0x690] sm:$0xff] }
 0x187   : > { %10980 = vst [vmem:[#allocation283_spill] sm:$0xff] %v9038_v5  ;;  %10981 = vst [vmem:[#allocation284_spill] sm:$0xff] %v9041_v54  ;;  %v9044_v30 = vld [vmem:[%s8162_s16 + $0x698] sm:$0xff]  ;;  %v9047_v26 = vld [vmem:[%s8162_s16 + $0x6a0] sm:$0xff] }
 0x188   : > { %10982 = vst [vmem:[#allocation285_spill] sm:$0xff] %v9044_v30  ;;  %10983 = vst [vmem:[#allocation286_spill] sm:$0xff] %v9047_v26  ;;  %v9050_v6 = vld [vmem:[%s8162_s16 + $0x6a8] sm:$0xff]  ;;  %v9053_v4 = vld [vmem:[%s8162_s16 + $0x6b0] sm:$0xff] }
 0x189   : > { %10984 = vst [vmem:[#allocation287_spill] sm:$0xff] %v9050_v6  ;;  %10985 = vst [vmem:[#allocation288_spill] sm:$0xff] %v9053_v4  ;;  %v9056_v7 = vld [vmem:[%s8162_s16 + $0x6b8] sm:$0xff]  ;;  %v9059_v5 = vld [vmem:[%s8162_s16 + $0x6c0] sm:$0xff] }
 0x18a   : > { %10986 = vst [vmem:[#allocation289_spill] sm:$0xff] %v9056_v7  ;;  %10987 = vst [vmem:[#allocation290_spill] sm:$0xff] %v9059_v5  ;;  %v9062_v54 = vld [vmem:[%s8162_s16 + $0x6c8] sm:$0xff]  ;;  %v9065_v30 = vld [vmem:[%s8162_s16 + $0x6d0] sm:$0xff] }
 0x18b   : > { %10988 = vst [vmem:[#allocation291_spill] sm:$0xff] %v9062_v54  ;;  %10989 = vst [vmem:[#allocation292_spill] sm:$0xff] %v9065_v30  ;;  %v9068_v26 = vld [vmem:[%s8162_s16 + $0x6d8] sm:$0xff]  ;;  %v9071_v6 = vld [vmem:[%s8162_s16 + $0x6e0] sm:$0xff] }
 0x18c   : > { %10990 = vst [vmem:[#allocation293_spill] sm:$0xff] %v9068_v26  ;;  %10991 = vst [vmem:[#allocation294_spill] sm:$0xff] %v9071_v6  ;;  %v9074_v4 = vld [vmem:[%s8162_s16 + $0x6e8] sm:$0xff]  ;;  %v9077_v7 = vld [vmem:[%s8162_s16 + $0x6f0] sm:$0xff] }
 0x18d   : > { %10992 = vst [vmem:[#allocation295_spill] sm:$0xff] %v9074_v4  ;;  %10993 = vst [vmem:[#allocation296_spill] sm:$0xff] %v9077_v7  ;;  %v9080_v5 = vld [vmem:[%s8162_s16 + $0x6f8] sm:$0xff]  ;;  %v9083_v54 = vld [vmem:[%s8162_s16 + $0x700] sm:$0xff] }
 0x18e   : > { %10994 = vst [vmem:[#allocation297_spill] sm:$0xff] %v9080_v5  ;;  %10995 = vst [vmem:[#allocation298_spill] sm:$0xff] %v9083_v54  ;;  %v9086_v30 = vld [vmem:[%s8162_s16 + $0x708] sm:$0xff]  ;;  %v9089_v26 = vld [vmem:[%s8162_s16 + $0x710] sm:$0xff] }
 0x18f   : > { %10996 = vst [vmem:[#allocation299_spill] sm:$0xff] %v9086_v30  ;;  %10997 = vst [vmem:[#allocation300_spill] sm:$0xff] %v9089_v26  ;;  %v9092_v6 = vld [vmem:[%s8162_s16 + $0x718] sm:$0xff]  ;;  %v9095_v4 = vld [vmem:[%s8162_s16 + $0x720] sm:$0xff] }
 0x190   : > { %10998 = vst [vmem:[#allocation301_spill] sm:$0xff] %v9092_v6  ;;  %10999 = vst [vmem:[#allocation302_spill] sm:$0xff] %v9095_v4  ;;  %v9098_v7 = vld [vmem:[%s8162_s16 + $0x728] sm:$0xff]  ;;  %v9101_v5 = vld [vmem:[%s8162_s16 + $0x730] sm:$0xff] }
 0x191   : > { %11000 = vst [vmem:[#allocation303_spill] sm:$0xff] %v9098_v7  ;;  %11001 = vst [vmem:[#allocation304_spill] sm:$0xff] %v9101_v5  ;;  %v9104_v54 = vld [vmem:[%s8162_s16 + $0x738] sm:$0xff]  ;;  %v9107_v30 = vld [vmem:[%s8162_s16 + $0x740] sm:$0xff] }
 0x192   : > { %11002 = vst [vmem:[#allocation305_spill] sm:$0xff] %v9104_v54  ;;  %11003 = vst [vmem:[#allocation306_spill] sm:$0xff] %v9107_v30  ;;  %v9110_v26 = vld [vmem:[%s8162_s16 + $0x748] sm:$0xff]  ;;  %v9113_v6 = vld [vmem:[%s8162_s16 + $0x750] sm:$0xff] }
 0x193   : > { %11004 = vst [vmem:[#allocation307_spill] sm:$0xff] %v9110_v26  ;;  %11005 = vst [vmem:[#allocation308_spill] sm:$0xff] %v9113_v6  ;;  %v9116_v4 = vld [vmem:[%s8162_s16 + $0x758] sm:$0xff]  ;;  %v9119_v7 = vld [vmem:[%s8162_s16 + $0x760] sm:$0xff] }
 0x194   : > { %11006 = vst [vmem:[#allocation309_spill] sm:$0xff] %v9116_v4  ;;  %11007 = vst [vmem:[#allocation310_spill] sm:$0xff] %v9119_v7  ;;  %v9122_v5 = vld [vmem:[%s8162_s16 + $0x768] sm:$0xff]  ;;  %v9125_v54 = vld [vmem:[%s8162_s16 + $0x770] sm:$0xff] }
 0x195   : > { %11008 = vst [vmem:[#allocation311_spill] sm:$0xff] %v9122_v5  ;;  %11009 = vst [vmem:[#allocation312_spill] sm:$0xff] %v9125_v54  ;;  %v9128_v30 = vld [vmem:[%s8162_s16 + $0x778] sm:$0xff]  ;;  %v9131_v26 = vld [vmem:[%s8162_s16 + $0x780] sm:$0xff] }
 0x196   : > { %11010 = vst [vmem:[#allocation313_spill] sm:$0xff] %v9128_v30  ;;  %11011 = vst [vmem:[#allocation314_spill] sm:$0xff] %v9131_v26  ;;  %v9134_v6 = vld [vmem:[%s8162_s16 + $0x788] sm:$0xff]  ;;  %v9137_v4 = vld [vmem:[%s8162_s16 + $0x790] sm:$0xff] }
 0x197   : > { %11012 = vst [vmem:[#allocation315_spill] sm:$0xff] %v9134_v6  ;;  %11013 = vst [vmem:[#allocation316_spill] sm:$0xff] %v9137_v4  ;;  %v9140_v7 = vld [vmem:[%s8162_s16 + $0x798] sm:$0xff]  ;;  %v9143_v5 = vld [vmem:[%s8162_s16 + $0x7a0] sm:$0xff] }
 0x198   : > { %11014 = vst [vmem:[#allocation317_spill] sm:$0xff] %v9140_v7  ;;  %11015 = vst [vmem:[#allocation318_spill] sm:$0xff] %v9143_v5  ;;  %v9146_v54 = vld [vmem:[%s8162_s16 + $0x7a8] sm:$0xff]  ;;  %v9149_v30 = vld [vmem:[%s8162_s16 + $0x7b0] sm:$0xff] }
 0x199   : > { %11016 = vst [vmem:[#allocation319_spill] sm:$0xff] %v9146_v54  ;;  %11017 = vst [vmem:[#allocation320_spill] sm:$0xff] %v9149_v30  ;;  %v9152_v38 = vld [vmem:[%s8162_s16 + $0x7b8] sm:$0xff]  ;;  %v9155_v26 = vld [vmem:[%s8162_s16 + $0x7c0] sm:$0xff] }
 0x19a   : > { %11018 = vst [vmem:[#allocation321_spill] sm:$0xff] %v9152_v38  ;;  %11019 = vst [vmem:[#allocation322_spill] sm:$0xff] %v9155_v26  ;;  %v9158_v6 = vld [vmem:[%s8162_s16 + $0x7c8] sm:$0xff]  ;;  %v9161_v4 = vld [vmem:[%s8162_s16 + $0x7d0] sm:$0xff]  ;;  %v11030_v26 = vmov 0.0|0.0  }
 0x19b   : > { %11020 = vst [vmem:[#allocation323_spill] sm:$0xff] %v9158_v6  ;;  %11021 = vst [vmem:[#allocation324_spill] sm:$0xff] %v9161_v4  ;;  %v9164_v52 = vld [vmem:[%s8162_s16 + $0x7d8] sm:$0xff]  ;;  %v9167_v7 = vld [vmem:[%s8162_s16 + $0x7e0] sm:$0xff] }
 0x19c   : > { %11022 = vst [vmem:[#allocation325_spill] sm:$0xff] %v9164_v52  ;;  %11023 = vst [vmem:[#allocation326_spill] sm:$0xff] %v9167_v7  ;;  %v9170_v5 = vld [vmem:[%s8162_s16 + $0x7e8] sm:$0xff]  ;;  %v9173_v36 = vld [vmem:[%s8162_s16 + $0x7f0] sm:$0xff] }
 0x19d   : > { %11024 = vst [vmem:[#allocation327_spill] sm:$0xff] %v9170_v5  ;;  %11025 = vst [vmem:[#allocation328_spill] sm:$0xff] %v9173_v36  ;;  %v9176_v54 = vld [vmem:[%s8162_s16 + $0x7f8] sm:$0xff]  ;;  %v9183_v38 = vld [vmem:[%s676_s27] sm:$0x1]  ;;  %s11032_s16 = sld [smem:[#allocation337_spill]] }
 0x19e   : > { %11026 = vst [vmem:[#allocation329_spill] sm:$0xff] %v9176_v54  ;;  %11027 = vst [vmem:[#allocation330_spill] sm:$0xff] %v9183_v38  ;;  %v9190_v4 = vld [vmem:[%s679_s28] sm:$0x1]  ;;  %v804_v54 = vld [vmem:[%s8127_s30 + $0x8] sm:$0xff]  ;;  %s8016_s27 = smov 24  }
 0x19f   : > { %11028 = vst [vmem:[#allocation331_spill] sm:$0xff] %v9190_v4  ;;  %v9197_v5 = vld [vmem:[%s682_s0] sm:$0x1]  ;;  %v805_v7 = vld [vmem:[%s8127_s30 + $0x10] sm:$0xff]  ;;  %v806_v6 = vld [vmem:[%s8127_s30 + $0x18] sm:$0xff]  ;;  %v11031_v4 = vmov 0.0  }
 0x1a0   : > { %11029 = vst [vmem:[#allocation332_spill] sm:$0xff] %v9197_v5  ;;  %v803_v36 = vld [vmem:[%s8127_s30] sm:$0xff]  ;;  %v7022_v38 = vpack.c.bf16 %v806_v6, %v805_v7  ;;  %v9210_v5 = vld [vmem:[#allocation2 + $0x8] sm:$0xff]  ;;  %s8002_s0 = smov 120   ;;  %vm9247_vm8 = vmpackc.low %vm1245_vm7, %vm1245_vm7 }
 0x1a1   : > { %v7019_v52 = vpack.c.bf16 %v804_v54, %v803_v36  ;;  %v9204_v30 = vld [vmem:[#allocation2] sm:$0xff]  ;;  %v9216_v36 = vld [vmem:[#allocation2 + $0x10] sm:$0x3]  ;;  %vm9270_vm13 = vmpackc.low %vm1364_vm11, %vm8006_vm12 }
 0x1a3   : > { %7020 = vmatpush3.bf16.msra.mxu0 %v7019_v52  ;;  %s11033_s28 = scalar_lea.vmem %s11032_s16, %s8117_s23  ;;  %s11038_s16 = scalar_lea.vmem %s10636_s7, %s8117_s23 }
 0x1a4   : > { %7021 = vmatprep.subr.bf16.mxu0 %v11030_v26 }
 0x1a7   : > { %7023 = vmatpush3.bf16.msra.mxu0 %v7022_v38  ;;  %v6065_v38 = vld [vmem:[%s11033_s28] ss:$0 sm:$0xff] }
 0x1aa   : > { %6877 = vmatmul.mubr.msk.f32.vlgmr.msra.gmra.mrb[0].mxu0 %vm1149_vm6, %v9204_v30 }
 0x1ab   : > { %6879 = vmatprep.mubr.msk.f32.mxu0 %vm8000_vm5, %v11031_v4 }
 0x1ae   : > { %6880 = vmatmul.mubr.msk.f32.gmra.mrb[2].mxu0 %vm1149_vm6, %v9210_v5 }
 0x1af   : > { %6882 = vmatprep.mubr.msk.f32.mxu0 %vm8000_vm5, %v11031_v4 }
 0x1b2   : > { %6883 = vmatmul.mubr.msk.f32.gmra.mrb[4].mxu0 %vm1149_vm6, %v9216_v36 }
 0x27d   : > { %v1225_v52 = vpop.f32.mrb[0].mxu0 }
 0x27e   : > { %v9225_v54 = vadd.f32 %v6065_v38, %v1225_v52  ;;  %v6878_v6 = vpop.f32.mrb[1].mxu0 }
 0x280   : > { %1442 = vrot.lane.b32.xlu1 %v9225_v54, %s8002_s0  ;;  %6889 = vmatprep.mubr.msk.f32.mxu0 %vm1245_vm7, %v9225_v54 }
 0x281   : > { %v1230_v7 = vpop.f32.mrb[2].mxu0 }
 0x282   : > { %v9231_v55 = vadd.f32 %v6065_v38, %v1230_v7  ;;  %v6881_v39 = vpop.f32.mrb[3].mxu0 }
 0x284   : > { %1444 = vrot.lane.b32.xlu1 %v9231_v55, %s8002_s0  ;;  %v9237_v53 = vpack.i.bf16 %v9231_v55, %v9225_v54 }
 0x285   : > { %v1235_v52 = vpop.f32.mrb[4].mxu0 }
 0x286   : > { %v9239_v6 = vadd.f32 %v6065_v38, %v1235_v52  ;;  %7802 = vrot.lane.b32.xlu0 %v9237_v53, %s8003_s3  ;;  %v6884_v37 = vpop.f32.mrb[5].mxu0 }
 0x28a   : > { %7807 = vrot.lane.b32.xlu0 %v9237_v53, %s8004_s25 }
 0x2f8   : > { %v7803_v39 = vpop.permute.xlu0 %7802 }
 0x2f9   : > { %v7805_v7 = vunpack.i.h.bf16 %v7803_v39  ;;  %v7804_v18 = vunpack.i.l.bf16 %v7803_v39  ;;  %v1443_v39 = vpop.permute.xlu1 %1442 }
 0x2fb   : > { %v7024_v38 = vpack.c.bf16 %v7805_v7, %v7804_v18 }
 0x2fc   : > { %v7808_v52 = vpop.permute.xlu0 %7807 }
 0x2fd   : > { %v7810_v16 = vunpack.i.h.bf16 %v7808_v52  ;;  %v7809_v0 = vunpack.i.l.bf16 %v7808_v52  ;;  %7026 = vmatprep.subr.msk.bf16.mxu0 %vm9247_vm8, %v7024_v38  ;;  %v1445_v18 = vpop.permute.xlu1 %1444 }
 0x2fe   : > { %7029 = vmatpush3.bf16.xpose.msk.msra.mxu0 %vm9247_vm8, %v7024_v38 }
 0x2ff   : > { %v7036_v37 = vpack.c.bf16 %v7810_v16, %v7809_v0 }
 0x301   : > { %7038 = vmatprep.subr.msk.bf16.mxu0 %vm9247_vm8, %v7036_v37 }
 0x305   : > { %6890 = vmatmul.mubr.msk.f32.vlgmr.msra.gmra.mrb[6].mxu0 %vm1245_vm7, %v9231_v55 }
 0x306   : > { %7041 = vmatpush3.bf16.xpose.msk.msra.mxu0 %vm9247_vm8, %v7036_v37  ;;  %6903 = vmatprep.mubr.msk.f32.mxu0 %vm1245_vm7, %v1443_v39 }
 0x30d   : > { %6904 = vmatmul.mubr.msk.f32.vlgmr.msra.gmra.mrb[8].mxu0 %vm1245_vm7, %v1445_v18 }
 0x3d8   : > { %v6891_v7 = vpop.f32.mrb[6].mxu0 }
 0x3d9   : > { %v1320_v38 = vpop.f32.mrb[7].mxu0  ;;  %v1334_v0 = vsel %vm1333_vm9, %v6891_v7, -inf }
 0x3da   : > { %1335 = vmax.xlane.f32.xlu1 %v1334_v0  ;;  %v1330_v16 = vsel %vm1329_vm10, %v1320_v38, -inf }
 0x3db   : > { %1331 = vmax.xlane.f32.xlu0 %v1330_v16 }
 0x3e0   : > { %v6905_v52 = vpop.f32.mrb[8].mxu0 }
 0x3e1   : > { %v1524_v19 = vpop.f32.mrb[9].mxu0  ;;  %v1536_v37 = vsel %vm1333_vm9, %v6905_v52, -inf }
 0x3e2   : > { %v1533_v3 = vsel %vm1329_vm10, %v1524_v19, -inf }
 0x3e3   : > { %1534 = vmax.xlane.f32.xlu0 %v1533_v3 }
 0x3e7   : > { %1537 = vmax.xlane.f32.xlu0 %v1536_v37 }
 0x3eb   : > { %7812 = vrot.lane.b32.xlu1 %v9237_v53, %s8005_s2 }
 0x467   : > { %v1336_v39 = vpop.xlane.xlu1 %1335 }
 0x468   : > { %v1338_v18 = vsub.f32 %v6891_v7, %v1336_v39  ;;  %v1332_v17 = vpop.xlane.xlu0 %1331 }
 0x469   : > { %v1337_v1 = vsub.f32 %v1320_v38, %v1332_v17 }
 0x46a   : > { %v1341_v0 = vmul.f32 1.442695, %v1338_v18 }
 0x46b   : > { %v1339_v50 = vmul.f32 1.442695, %v1337_v1  ;;  %v7813_v16 = vpop.permute.xlu1 %7812 }
 0x46c   : > { %7881 = vpow2.f32 %v1341_v0  ;;  %v7815_v34 = vunpack.i.h.bf16 %v7813_v16  ;;  %v7814_v48 = vunpack.i.l.bf16 %v7813_v16 }
 0x46d   : > { %7883 = vpow2.f32 %v1339_v50 }
 0x46e   : > { %v7030_v37 = vpack.c.bf16 %v7815_v34, %v7814_v48 }
 0x470   : > { %7032 = vmatprep.subr.msk.bf16.mxu1 %vm9270_vm13, %v7030_v37  ;;  %v1535_v7 = vpop.xlane.xlu0 %1534 }
 0x471   : > { %7035 = vmatpush3.bf16.msk.msra.mxu1 %vm9270_vm13, %v7030_v37  ;;  %v1539_v16 = vsub.f32 %v1524_v19, %v1535_v7 }
 0x474   : > { %v1538_v1 = vpop.xlane.xlu0 %1537 }
 0x475   : > { %v1540_v17 = vsub.f32 %v6905_v52, %v1538_v1  ;;  %v1541_v52 = vmul.f32 1.442695, %v1539_v16 }
 0x476   : > { %v7882_v38 = vpop.eup %7881 }
 0x477   : > { %v7884_v39 = vpop.eup %7883  ;;  %v1543_v18 = vmul.f32 1.442695, %v1540_v17  ;;  %v1346_v50 = vsel %vm1333_vm9, %v7882_v38, 0.0 }
 0x478   : > { %1347 = vadd.xlane.f32.xlu0 %v1346_v50  ;;  %v1343_v0 = vsel %vm1329_vm10, %v7884_v39, 0.0 }
 0x479   : > { %7885 = vpow2.f32 %v1543_v18  ;;  %1344 = vadd.xlane.f32.xlu1 %v1343_v0 }
 0x47a   : > { %7887 = vpow2.f32 %v1541_v52 }
 0x483   : > { %v7886_v34 = vpop.eup %7885 }
 0x484   : > { %v1548_v48 = vsel %vm1333_vm9, %v7886_v34, 0.0  ;;  %v7888_v37 = vpop.eup %7887 }
 0x485   : > { %1549 = vadd.xlane.f32.xlu0 %v1548_v48  ;;  %v1545_v1 = vsel %vm1329_vm10, %v7888_v37, 0.0 }
 0x48a   : > { %7822 = vrot.lane.b32.xlu1 %v9237_v53, %s8007_s6 }
 0x49b   : > { %7817 = vrot.lane.b32.xlu0 %v9237_v53, %s8008_s4 }
 0x49f   : > { %1645 = vrot.lane.b32.xlu0 %v9231_v55, %s8009_s29 }
 0x4ae   : > { %1546 = vadd.xlane.f32.xlu1 %v1545_v1 }
 0x4bf   : > { %1643 = vrot.lane.b32.xlu1 %v9225_v54, %s8009_s29 }
 0x505   : > { %v1348_v17 = vpop.xlane.xlu0 %1347 }
 0x506   : > { %7889 = vrcp.f32 %v1348_v17  ;;  %v1345_v19 = vpop.xlane.xlu1 %1344 }
 0x507   : > { %7891 = vrcp.f32 %v1345_v19 }
 0x50a   : > { %v7823_v16 = vpop.permute.xlu1 %7822 }
 0x50b   : > { %v7825_v32 = vunpack.i.h.bf16 %v7823_v16  ;;  %v7824_v1 = vunpack.i.l.bf16 %v7823_v16 }
 0x50d   : > { %v7048_v33 = vpack.c.bf16 %v7825_v32, %v7824_v1 }
 0x510   : > { %v7890_v7 = vpop.eup %7889 }
 0x511   : > { %v7892_v18 = vpop.eup %7891  ;;  %v1352_v48 = vmul.f32 %v7890_v7, %v7882_v38 }
 0x512   : > { %v1550_v50 = vpop.xlane.xlu0 %1549  ;;  %v1351_v0 = vmul.f32 %v7892_v18, %v7884_v39 }
 0x513   : > { %7893 = vrcp.f32 %v1550_v50 }
 0x514   : > { %6896 = vmatprep.mubr.msk.f32.mxu1 %vm1329_vm10, %v1351_v0 }
 0x515   : > { %6897 = vmatmul.mubr.msk.f32.vlgmr.msra.gmra.mrb[0].mxu1 %vm1329_vm10, %v1352_v48 }
 0x516   : > { %v7818_v52 = vpop.permute.xlu0 %7817 }
 0x517   : > { %v7820_v51 = vunpack.i.h.bf16 %v7818_v52  ;;  %v7819_v35 = vunpack.i.l.bf16 %v7818_v52 }
 0x519   : > { %v7042_v49 = vpack.c.bf16 %v7820_v51, %v7819_v35 }
 0x51a   : > { %v1646_v32 = vpop.permute.xlu0 %1645 }
 0x51b   : > { %7044 = vmatprep.subr.msk.bf16.mxu1 %vm9270_vm13, %v7042_v49 }
 0x51c   : > { %7047 = vmatpush3.bf16.msk.msra.mxu1 %vm9270_vm13, %v7042_v49 }
 0x51d   : > { %7050 = vmatprep.subr.msk.bf16.mxu1 %vm9247_vm8, %v7048_v33  ;;  %v7894_v39 = vpop.eup %7893 }
 0x51e   : > { %v1554_v7 = vmul.f32 %v7894_v39, %v7886_v34 }
 0x53b   : > { %v1547_v38 = vpop.xlane.xlu1 %1546 }
 0x53c   : > { %7895 = vrcp.f32 %v1547_v38 }
 0x53f   : > { %v1644_v35 = vpop.permute.xlu1 %1643 }
 0x546   : > { %v7896_v17 = vpop.eup %7895 }
 0x547   : > { %v1553_v19 = vmul.f32 %v7896_v17, %v7888_v37 }
 0x549   : > { %6910 = vmatprep.mubr.msk.f32.mxu1 %vm1329_vm10, %v1553_v19 }
 0x54a   : > { %6911 = vmatmul.mubr.msk.f32.vlgmr.msra.gmra.mrb[2].mxu1 %vm1329_vm10, %v1554_v7 }
 0x54b   : > { %7053 = vmatpush3.bf16.xpose.msk.msra.mxu1 %vm9247_vm8, %v7048_v33  ;;  %6917 = vmatprep.mubr.msk.f32.mxu1 %vm1245_vm7, %v1644_v35 }
 0x552   : > { %6918 = vmatmul.mubr.msk.f32.vlgmr.msra.gmra.mrb[4].mxu1 %vm1245_vm7, %v1646_v32 }
 0x5e8   : > { %v9304_v49 = vpop.f32.mrb[0].mxu1 }
 0x5e9   : > { %v9306_v51 = vpop.f32.mrb[1].mxu1 }
 0x61d   : > { %v9308_v18 = vpop.f32.mrb[2].mxu1 }
 0x61e   : > { %v9310_v34 = vpop.f32.mrb[3].mxu1 }
 0x625   : > { %v6919_v37 = vpop.f32.mrb[4].mxu1 }
 0x626   : > { %v1725_v50 = vpop.f32.mrb[5].mxu1  ;;  %v1737_v0 = vsel %vm1333_vm9, %v6919_v37, -inf }
 0x627   : > { %1738 = vmax.xlane.f32.xlu0 %v1737_v0  ;;  %v1734_v33 = vsel %vm1329_vm10, %v1725_v50, -inf }
 0x628   : > { %1735 = vmax.xlane.f32.xlu1 %v1734_v33 }
 0x6b4   : > { %v1739_v48 = vpop.xlane.xlu0 %1738 }
 0x6b5   : > { %v1741_v16 = vsub.f32 %v6919_v37, %v1739_v48  ;;  %v1736_v52 = vpop.xlane.xlu1 %1735 }
 0x6b6   : > { %v1740_v1 = vsub.f32 %v1725_v50, %v1736_v52 }
 0x6b7   : > { %v1744_v38 = vmul.f32 1.442695, %v1741_v16 }
 0x6b8   : > { %v1742_v39 = vmul.f32 1.442695, %v1740_v1 }
 0x6b9   : > { %7897 = vpow2.f32 %v1744_v38 }
 0x6ba   : > { %7899 = vpow2.f32 %v1742_v39 }
 0x6c3   : > { %v7898_v17 = vpop.eup %7897 }
 0x6c4   : > { %v7900_v19 = vpop.eup %7899  ;;  %v1749_v7 = vsel %vm1333_vm9, %v7898_v17, 0.0 }
 0x6c5   : > { %1750 = vadd.xlane.f32.xlu1 %v1749_v7  ;;  %v1746_v35 = vsel %vm1329_vm10, %v7900_v19, 0.0 }
 0x6c6   : > { %1747 = vadd.xlane.f32.xlu0 %v1746_v35 }
 0x6d6   : > { %7832 = vrot.lane.b32.xlu1 %v9237_v53, %s8010_s5 }
 0x6da   : > { %1844 = vrot.lane.b32.xlu1 %v9225_v54, %s8011_s19 }
 0x6dc   : > { %7827 = vrot.lane.b32.xlu0 %v9237_v53, %s8012_s24 }
 0x6e0   : > { %1846 = vrot.lane.b32.xlu0 %v9231_v55, %s8011_s19 }
 0x752   : > { %v1751_v32 = vpop.xlane.xlu1 %1750 }
 0x753   : > { %7901 = vrcp.f32 %v1751_v32  ;;  %v1748_v37 = vpop.xlane.xlu0 %1747 }
 0x754   : > { %7903 = vrcp.f32 %v1748_v37 }
 0x756   : > { %v7833_v50 = vpop.permute.xlu1 %7832 }
 0x757   : > { %v7828_v0 = vpop.permute.xlu0 %7827  ;;  %v7835_v33 = vunpack.i.h.bf16 %v7833_v50  ;;  %v7834_v48 = vunpack.i.l.bf16 %v7833_v50 }
 0x758   : > { %v7830_v16 = vunpack.i.h.bf16 %v7828_v0  ;;  %v7829_v52 = vunpack.i.l.bf16 %v7828_v0 }
 0x759   : > { %v7060_v38 = vpack.c.bf16 %v7835_v33, %v7834_v48 }
 0x75a   : > { %v7054_v1 = vpack.c.bf16 %v7830_v16, %v7829_v52  ;;  %v1845_v32 = vpop.permute.xlu1 %1844 }
 0x75b   : > { %v1847_v37 = vpop.permute.xlu0 %1846 }
 0x75c   : > { %7056 = vmatprep.subr.msk.bf16.mxu0 %vm9270_vm13, %v7054_v1 }
 0x75d   : > { %v7902_v54 = vpop.eup %7901  ;;  %7059 = vmatpush3.bf16.msk.msra.mxu0 %vm9270_vm13, %v7054_v1 }
 0x75e   : > { %v7904_v39 = vpop.eup %7903  ;;  %7062 = vmatprep.subr.msk.bf16.mxu0 %vm9247_vm8, %v7060_v38  ;;  %v1755_v35 = vmul.f32 %v7902_v54, %v7898_v17 }
 0x75f   : > { %v1754_v7 = vmul.f32 %v7904_v39, %v7900_v19 }
 0x761   : > { %6924 = vmatprep.mubr.msk.f32.mxu0 %vm1329_vm10, %v1754_v7 }
 0x762   : > { %6925 = vmatmul.mubr.msk.f32.vlgmr.msra.gmra.mrb[10].mxu0 %vm1329_vm10, %v1755_v35 }
 0x763   : > { %6931 = vmatprep.mubr.msk.f32.mxu0 %vm1245_vm7, %v1845_v32 }
 0x766   : > { %7065 = vmatpush3.bf16.xpose.msk.msra.mxu0 %vm9247_vm8, %v7060_v38 }
 0x76d   : > { %6932 = vmatmul.mubr.msk.f32.vlgmr.msra.gmra.mrb[12].mxu0 %vm1245_vm7, %v1847_v37 }
 0x835   : > { %v9336_v50 = vpop.f32.mrb[10].mxu0 }
 0x836   : > { %v9338_v0 = vpop.f32.mrb[11].mxu0 }
 0x840   : > { %v6933_v33 = vpop.f32.mrb[12].mxu0 }
 0x841   : > { %v1926_v19 = vpop.f32.mrb[13].mxu0  ;;  %v1938_v17 = vsel %vm1333_vm9, %v6933_v33, -inf }
 0x842   : > { %1939 = vmax.xlane.f32.xlu0 %v1938_v17  ;;  %v1935_v48 = vsel %vm1329_vm10, %v1926_v19, -inf  ;;  %v9345_v17 = vrot.slane %v9239_v6, 1 }
 0x843   : > { %1936 = vmax.xlane.f32.xlu1 %v1935_v48 }
 0x8cf   : > { %v1940_v16 = vpop.xlane.xlu0 %1939 }
 0x8d0   : > { %v1942_v52 = vsub.f32 %v6933_v33, %v1940_v16  ;;  %v1937_v1 = vpop.xlane.xlu1 %1936  ;;  %v2079_v33 = vrot.slane %v9231_v55, 1 }
 0x8d1   : > { %v1941_v54 = vsub.f32 %v1926_v19, %v1937_v1 }
 0x8d2   : > { %v1945_v38 = vmul.f32 1.442695, %v1942_v52  ;;  %v9349_v19 = vsel %vm2078_vm14, %v2079_v33, %v9345_v17 }
 0x8d3   : > { %v1943_v39 = vmul.f32 1.442695, %v1941_v54  ;;  %v9353_v48 = vpack.i.bf16 %v9345_v17, %v9349_v19 }
 0x8d4   : > { %7905 = vpow2.f32 %v1945_v38 }
 0x8d5   : > { %7907 = vpow2.f32 %v1943_v39 }
 0x8de   : > { %v7906_v7 = vpop.eup %7905 }
 0x8df   : > { %v7908_v35 = vpop.eup %7907  ;;  %v1950_v32 = vsel %vm1333_vm9, %v7906_v7, 0.0 }
 0x8e0   : > { %1951 = vadd.xlane.f32.xlu1 %v1950_v32  ;;  %v1947_v37 = vsel %vm1329_vm10, %v7908_v35, 0.0 }
 0x8e1   : > { %1948 = vadd.xlane.f32.xlu0 %v1947_v37 }
 0x8f1   : > { %7842 = vrot.lane.b32.xlu1 %v9353_v48, %s8003_s3 }
 0x8f7   : > { %7837 = vrot.lane.b32.xlu0 %v9237_v53, %s8013_s17 }
 0x96d   : > { %v1952_v16 = vpop.xlane.xlu1 %1951 }
 0x96e   : > { %7909 = vrcp.f32 %v1952_v16  ;;  %v1949_v6 = vpop.xlane.xlu0 %1948 }
 0x96f   : > { %7911 = vrcp.f32 %v1949_v6 }
 0x971   : > { %v7843_v52 = vpop.permute.xlu1 %7842 }
 0x972   : > { %v7838_v55 = vpop.permute.xlu0 %7837  ;;  %v7845_v1 = vunpack.i.h.bf16 %v7843_v52  ;;  %v7844_v54 = vunpack.i.l.bf16 %v7843_v52 }
 0x973   : > { %v7840_v38 = vunpack.i.h.bf16 %v7838_v55  ;;  %v7839_v39 = vunpack.i.l.bf16 %v7838_v55 }
 0x974   : > { %v7072_v37 = vpack.c.bf16 %v7845_v1, %v7844_v54 }
 0x975   : > { %v7066_v32 = vpack.c.bf16 %v7840_v38, %v7839_v39 }
 0x977   : > { %7068 = vmatprep.subr.msk.bf16.mxu1 %vm9270_vm13, %v7066_v32 }
 0x978   : > { %v7910_v33 = vpop.eup %7909  ;;  %7071 = vmatpush3.bf16.msk.msra.mxu1 %vm9270_vm13, %v7066_v32 }
 0x979   : > { %v7912_v53 = vpop.eup %7911  ;;  %7074 = vmatprep.subr.msk.bf16.mxu1 %vm9247_vm8, %v7072_v37  ;;  %v1956_v6 = vmul.f32 %v7910_v33, %v7906_v7 }
 0x97a   : > { %v1955_v16 = vmul.f32 %v7912_v53, %v7908_v35 }
 0x97c   : > { %6938 = vmatprep.mubr.msk.f32.mxu1 %vm1329_vm10, %v1955_v16 }
 0x97d   : > { %6939 = vmatmul.mubr.msk.f32.vlgmr.msra.gmra.mrb[6].mxu1 %vm1329_vm10, %v1956_v6 }
 0x97e   : > { %6945 = vmatprep.mubr.msk.f32.mxu1 %vm1245_vm7, %v9349_v19 }
 0x981   : > { %7077 = vmatpush3.bf16.xpose.msk.msra.mxu1 %vm9247_vm8, %v7072_v37 }
 0x988   : > { %6946 = vmatmul.mubr.msk.f32.vlgmr.msra.gmra.mrb[8].mxu1 %vm1245_vm7, %v9345_v17 }
 0xa50   : > { %v9373_v52 = vpop.f32.mrb[6].mxu1 }
 0xa51   : > { %v9375_v55 = vpop.f32.mrb[7].mxu1 }
 0xa5b   : > { %v6947_v1 = vpop.f32.mrb[8].mxu1 }
 0xa5c   : > { %v2160_v35 = vpop.f32.mrb[9].mxu1  ;;  %v2172_v7 = vsel %vm1333_vm9, %v6947_v1, -inf }
 0xa5d   : > { %2173 = vmax.xlane.f32.xlu0 %v2172_v7  ;;  %v2169_v54 = vsel %vm1329_vm10, %v2160_v35, -inf }
 0xa5e   : > { %2170 = vmax.xlane.f32.xlu1 %v2169_v54 }
 0xaea   : > { %v2174_v38 = vpop.xlane.xlu0 %2173 }
 0xaeb   : > { %v2176_v39 = vsub.f32 %v6947_v1, %v2174_v38  ;;  %v2171_v32 = vpop.xlane.xlu1 %2170 }
 0xaec   : > { %v2175_v33 = vsub.f32 %v2160_v35, %v2171_v32 }
 0xaed   : > { %v2179_v37 = vmul.f32 1.442695, %v2176_v39 }
 0xaee   : > { %v2177_v53 = vmul.f32 1.442695, %v2175_v33 }
 0xaef   : > { %7913 = vpow2.f32 %v2179_v37 }
 0xaf0   : > { %7915 = vpow2.f32 %v2177_v53 }
 0xaf9   : > { %v7914_v16 = vpop.eup %7913 }
 0xafa   : > { %v7916_v6 = vpop.eup %7915  ;;  %v2184_v14 = vsel %vm1333_vm9, %v7914_v16, 0.0 }
 0xafb   : > { %2185 = vadd.xlane.f32.xlu1 %v2184_v14  ;;  %v2181_v62 = vsel %vm1329_vm10, %v7916_v6, 0.0 }
 0xafc   : > { %2182 = vadd.xlane.f32.xlu0 %v2181_v62 }
 0xb0c   : > { %7852 = vrot.lane.b32.xlu1 %v9353_v48, %s8004_s25 }
 0xb10   : > { %2279 = vrot.lane.b32.xlu1 %v9349_v19, %s8002_s0 }
 0xb12   : > { %7847 = vrot.lane.b32.xlu0 %v9353_v48, %s8005_s2 }
 0xb16   : > { %2281 = vrot.lane.b32.xlu0 %v9345_v17, %s8002_s0 }
 0xb88   : > { %v2186_v1 = vpop.xlane.xlu1 %2185 }
 0xb89   : > { %7917 = vrcp.f32 %v2186_v1  ;;  %v2183_v35 = vpop.xlane.xlu0 %2182 }
 0xb8a   : > { %7919 = vrcp.f32 %v2183_v35 }
 0xb8c   : > { %v7853_v14 = vpop.permute.xlu1 %7852 }
 0xb8d   : > { %v7848_v7 = vpop.permute.xlu0 %7847  ;;  %v7855_v54 = vunpack.i.h.bf16 %v7853_v14  ;;  %v7854_v62 = vunpack.i.l.bf16 %v7853_v14 }
 0xb8e   : > { %v7850_v38 = vunpack.i.h.bf16 %v7848_v7  ;;  %v7849_v39 = vunpack.i.l.bf16 %v7848_v7 }
 0xb8f   : > { %v7084_v33 = vpack.c.bf16 %v7855_v54, %v7854_v62 }
 0xb90   : > { %v7078_v32 = vpack.c.bf16 %v7850_v38, %v7849_v39  ;;  %v2280_v14 = vpop.permute.xlu1 %2279 }
 0xb91   : > { %v2282_v7 = vpop.permute.xlu0 %2281 }
 0xb92   : > { %7080 = vmatprep.subr.msk.bf16.mxu0 %vm9270_vm13, %v7078_v32 }
 0xb93   : > { %v7918_v37 = vpop.eup %7917  ;;  %7083 = vmatpush3.bf16.msk.msra.mxu0 %vm9270_vm13, %v7078_v32 }
 0xb94   : > { %v7920_v53 = vpop.eup %7919  ;;  %7086 = vmatprep.subr.msk.bf16.mxu0 %vm9247_vm8, %v7084_v33  ;;  %v2190_v35 = vmul.f32 %v7918_v37, %v7914_v16 }
 0xb95   : > { %v2189_v1 = vmul.f32 %v7920_v53, %v7916_v6 }
 0xb97   : > { %6952 = vmatprep.mubr.msk.f32.mxu0 %vm1329_vm10, %v2189_v1 }
 0xb98   : > { %6953 = vmatmul.mubr.msk.f32.vlgmr.msra.gmra.mrb[14].mxu0 %vm1329_vm10, %v2190_v35 }
 0xb99   : > { %6959 = vmatprep.mubr.msk.f32.mxu0 %vm1245_vm7, %v2280_v14 }
 0xb9c   : > { %7089 = vmatpush3.bf16.xpose.msk.msra.mxu0 %vm9247_vm8, %v7084_v33 }
 0xba3   : > { %6960 = vmatmul.mubr.msk.f32.vlgmr.msra.gmra.mrb[16].mxu0 %vm1245_vm7, %v2282_v7 }
 0xc6b   : > { %v9401_v54 = vpop.f32.mrb[14].mxu0 }
 0xc6c   : > { %v9403_v62 = vpop.f32.mrb[15].mxu0 }
 0xc76   : > { %v6961_v38 = vpop.f32.mrb[16].mxu0 }
 0xc77   : > { %v2361_v6 = vpop.f32.mrb[17].mxu0  ;;  %v2373_v16 = vsel %vm1333_vm9, %v6961_v38, -inf }
 0xc78   : > { %2374 = vmax.xlane.f32.xlu0 %v2373_v16  ;;  %v2370_v39 = vsel %vm1329_vm10, %v2361_v6, -inf }
 0xc79   : > { %2371 = vmax.xlane.f32.xlu1 %v2370_v39 }
 0xd05   : > { %v2375_v32 = vpop.xlane.xlu0 %2374 }
 0xd06   : > { %v2377_v37 = vsub.f32 %v6961_v38, %v2375_v32  ;;  %v2372_v53 = vpop.xlane.xlu1 %2371 }
 0xd07   : > { %v2376_v1 = vsub.f32 %v2361_v6, %v2372_v53 }
 0xd08   : > { %v2380_v33 = vmul.f32 1.442695, %v2377_v37 }
 0xd09   : > { %v2378_v35 = vmul.f32 1.442695, %v2376_v1 }
 0xd0a   : > { %7921 = vpow2.f32 %v2380_v33 }
 0xd0b   : > { %7923 = vpow2.f32 %v2378_v35 }
 0xd14   : > { %v7922_v14 = vpop.eup %7921 }
 0xd15   : > { %v7924_v7 = vpop.eup %7923  ;;  %v2385_v12 = vsel %vm1333_vm9, %v7922_v14, 0.0 }
 0xd16   : > { %2386 = vadd.xlane.f32.xlu1 %v2385_v12  ;;  %v2382_v60 = vsel %vm1329_vm10, %v7924_v7, 0.0 }
 0xd17   : > { %2383 = vadd.xlane.f32.xlu0 %v2382_v60 }
 0xd27   : > { %7862 = vrot.lane.b32.xlu1 %v9353_v48, %s8007_s6 }
 0xd2b   : > { %2480 = vrot.lane.b32.xlu1 %v9349_v19, %s8009_s29 }
 0xd2d   : > { %7857 = vrot.lane.b32.xlu0 %v9353_v48, %s8008_s4 }
 0xd31   : > { %2482 = vrot.lane.b32.xlu0 %v9345_v17, %s8009_s29 }
 0xda3   : > { %v2387_v38 = vpop.xlane.xlu1 %2386 }
 0xda4   : > { %7925 = vrcp.f32 %v2387_v38  ;;  %v2384_v6 = vpop.xlane.xlu0 %2383 }
 0xda5   : > { %7927 = vrcp.f32 %v2384_v6 }
 0xda7   : > { %v7863_v12 = vpop.permute.xlu1 %7862 }
 0xda8   : > { %v7858_v16 = vpop.permute.xlu0 %7857  ;;  %v7865_v39 = vunpack.i.h.bf16 %v7863_v12  ;;  %v7864_v60 = vunpack.i.l.bf16 %v7863_v12 }
 0xda9   : > { %v7860_v32 = vunpack.i.h.bf16 %v7858_v16  ;;  %v7859_v37 = vunpack.i.l.bf16 %v7858_v16 }
 0xdaa   : > { %v7096_v1 = vpack.c.bf16 %v7865_v39, %v7864_v60 }
 0xdab   : > { %v7090_v53 = vpack.c.bf16 %v7860_v32, %v7859_v37  ;;  %v2481_v12 = vpop.permute.xlu1 %2480 }
 0xdac   : > { %v2483_v16 = vpop.permute.xlu0 %2482 }
 0xdad   : > { %7092 = vmatprep.subr.msk.bf16.mxu1 %vm9270_vm13, %v7090_v53 }
 0xdae   : > { %v7926_v33 = vpop.eup %7925  ;;  %7095 = vmatpush3.bf16.msk.msra.mxu1 %vm9270_vm13, %v7090_v53 }
 0xdaf   : > { %v7928_v35 = vpop.eup %7927  ;;  %7098 = vmatprep.subr.msk.bf16.mxu1 %vm9247_vm8, %v7096_v1  ;;  %v2391_v6 = vmul.f32 %v7926_v33, %v7922_v14 }
 0xdb0   : > { %v2390_v38 = vmul.f32 %v7928_v35, %v7924_v7 }
 0xdb2   : > { %6966 = vmatprep.mubr.msk.f32.mxu1 %vm1329_vm10, %v2390_v38 }
 0xdb3   : > { %6967 = vmatmul.mubr.msk.f32.vlgmr.msra.gmra.mrb[10].mxu1 %vm1329_vm10, %v2391_v6 }
 0xdb4   : > { %6973 = vmatprep.mubr.msk.f32.mxu1 %vm1245_vm7, %v2481_v12 }
 0xdb7   : > { %7101 = vmatpush3.bf16.xpose.msk.msra.mxu1 %vm9247_vm8, %v7096_v1 }
 0xdbe   : > { %6974 = vmatmul.mubr.msk.f32.vlgmr.msra.gmra.mrb[12].mxu1 %vm1245_vm7, %v2483_v16 }
 0xe86   : > { %v9429_v39 = vpop.f32.mrb[10].mxu1 }
 0xe87   : > { %v9431_v60 = vpop.f32.mrb[11].mxu1 }
 0xe91   : > { %v6975_v32 = vpop.f32.mrb[12].mxu1 }
 0xe92   : > { %v2562_v7 = vpop.f32.mrb[13].mxu1  ;;  %v2574_v14 = vsel %vm1333_vm9, %v6975_v32, -inf }
 0xe93   : > { %2575 = vmax.xlane.f32.xlu0 %v2574_v14  ;;  %v2571_v37 = vsel %vm1329_vm10, %v2562_v7, -inf }
 0xe94   : > { %2572 = vmax.xlane.f32.xlu1 %v2571_v37 }
 0xf20   : > { %v2576_v53 = vpop.xlane.xlu0 %2575 }
 0xf21   : > { %v2578_v33 = vsub.f32 %v6975_v32, %v2576_v53  ;;  %v2573_v35 = vpop.xlane.xlu1 %2572 }
 0xf22   : > { %v2577_v38 = vsub.f32 %v2562_v7, %v2573_v35 }
 0xf23   : > { %v2581_v1 = vmul.f32 1.442695, %v2578_v33 }
 0xf24   : > { %v2579_v6 = vmul.f32 1.442695, %v2577_v38 }
 0xf25   : > { %7929 = vpow2.f32 %v2581_v1 }
 0xf26   : > { %7931 = vpow2.f32 %v2579_v6 }
 0xf2f   : > { %v7930_v12 = vpop.eup %7929 }
 0xf30   : > { %v7932_v16 = vpop.eup %7931  ;;  %v2586_v15 = vsel %vm1333_vm9, %v7930_v12, 0.0 }
 0xf31   : > { %2587 = vadd.xlane.f32.xlu1 %v2586_v15  ;;  %v2583_v63 = vsel %vm1329_vm10, %v7932_v16, 0.0 }
 0xf32   : > { %2584 = vadd.xlane.f32.xlu0 %v2583_v63 }
 0xf42   : > { %7872 = vrot.lane.b32.xlu1 %v9353_v48, %s8010_s5 }
 0xf46   : > { %2681 = vrot.lane.b32.xlu1 %v9349_v19, %s8011_s19 }
 0xf48   : > { %7867 = vrot.lane.b32.xlu0 %v9353_v48, %s8012_s24 }
 0xf4c   : > { %2683 = vrot.lane.b32.xlu0 %v9345_v17, %s8011_s19 }
 0xfbe   : > { %v2588_v32 = vpop.xlane.xlu1 %2587 }
 0xfbf   : > { %7933 = vrcp.f32 %v2588_v32  ;;  %v2585_v7 = vpop.xlane.xlu0 %2584 }
 0xfc0   : > { %7935 = vrcp.f32 %v2585_v7 }
 0xfc2   : > { %v7873_v15 = vpop.permute.xlu1 %7872 }
 0xfc3   : > { %v7868_v14 = vpop.permute.xlu0 %7867  ;;  %v7875_v37 = vunpack.i.h.bf16 %v7873_v15  ;;  %v7874_v63 = vunpack.i.l.bf16 %v7873_v15 }
 0xfc4   : > { %v7870_v53 = vunpack.i.h.bf16 %v7868_v14  ;;  %v7869_v33 = vunpack.i.l.bf16 %v7868_v14 }
 0xfc5   : > { %v7108_v38 = vpack.c.bf16 %v7875_v37, %v7874_v63 }
 0xfc6   : > { %v7102_v35 = vpack.c.bf16 %v7870_v53, %v7869_v33  ;;  %v2682_v32 = vpop.permute.xlu1 %2681 }
 0xfc7   : > { %v2684_v7 = vpop.permute.xlu0 %2683 }
 0xfc8   : > { %7104 = vmatprep.subr.msk.bf16.mxu0 %vm9270_vm13, %v7102_v35 }
 0xfc9   : > { %v7934_v19 = vpop.eup %7933  ;;  %7107 = vmatpush3.bf16.msk.msra.mxu0 %vm9270_vm13, %v7102_v35 }
 0xfca   : > { %v7936_v17 = vpop.eup %7935  ;;  %7110 = vmatprep.subr.msk.bf16.mxu0 %vm9247_vm8, %v7108_v38  ;;  %v2592_v6 = vmul.f32 %v7934_v19, %v7930_v12 }
 0xfcb   : > { %v2591_v1 = vmul.f32 %v7936_v17, %v7932_v16 }
 0xfcd   : > { %6980 = vmatprep.mubr.msk.f32.mxu0 %vm1329_vm10, %v2591_v1 }
 0xfce   : > { %6981 = vmatmul.mubr.msk.f32.vlgmr.msra.gmra.mrb[18].mxu0 %vm1329_vm10, %v2592_v6 }
 0xfcf   : > { %6987 = vmatprep.mubr.msk.f32.mxu0 %vm1245_vm7, %v2682_v32 }
 0xfd2   : > { %7113 = vmatpush3.bf16.xpose.msk.msra.mxu0 %vm9247_vm8, %v7108_v38 }
 0xfd9   : > { %6988 = vmatmul.mubr.msk.f32.vlgmr.msra.gmra.mrb[20].mxu0 %vm1245_vm7, %v2684_v7 }
0x10a1   : > { %v9457_v15 = vpop.f32.mrb[18].mxu0 }
0x10a2   : > { %v2672_v14 = vpop.f32.mrb[19].mxu0 }
0x10ac   : > { %v6989_v37 = vpop.f32.mrb[20].mxu0 }
0x10ad   : > { %v2763_v63 = vpop.f32.mrb[21].mxu0  ;;  %v2775_v12 = vsel %vm1333_vm9, %v6989_v37, -inf }
0x10ae   : > { %2776 = vmax.xlane.f32.xlu0 %v2775_v12  ;;  %v2772_v16 = vsel %vm1329_vm10, %v2763_v63, -inf }
0x10af   : > { %2773 = vmax.xlane.f32.xlu1 %v2772_v16 }
0x113b   : > { %v2777_v53 = vpop.xlane.xlu0 %2776 }
0x113c   : > { %v2779_v33 = vsub.f32 %v6989_v37, %v2777_v53  ;;  %v2774_v35 = vpop.xlane.xlu1 %2773  ;;  %v810_v53 = vld [vmem:[%s8132_s18 + $0x10] sm:$0xff] }
0x113d   : > { %v2778_v19 = vsub.f32 %v2763_v63, %v2774_v35 }
0x113e   : > { %v2782_v2 = vmul.f32 1.442695, %v2779_v33  ;;  %v811_v33 = vld [vmem:[%s8132_s18 + $0x18] sm:$0xff] }
0x113f   : > { %v2780_v38 = vmul.f32 1.442695, %v2778_v19  ;;  %v7124_v35 = vpack.c.bf16 %v811_v33, %v810_v53 }
0x1140   : > { %7937 = vpow2.f32 %v2782_v2 }
0x1141   : > { %7939 = vpow2.f32 %v2780_v38 }
0x114a   : > { %v7938_v17 = vpop.eup %7937 }
0x114b   : > { %v7940_v1 = vpop.eup %7939  ;;  %v2787_v6 = vsel %vm1333_vm9, %v7938_v17, 0.0 }
0x114c   : > { %2788 = vadd.xlane.f32.xlu1 %v2787_v6  ;;  %v2784_v32 = vsel %vm1329_vm10, %v7940_v1, 0.0 }
0x114d   : > { %2785 = vadd.xlane.f32.xlu0 %v2784_v32 }
0x115d   : > { %2047 = vrot.lane.b32.xlu1 %v9310_v34, %s8014_s21 }
0x1161   : > { %2055 = vrot.lane.b32.xlu1 %v9338_v0, %s8015_s20 }
0x1163   : > { %7877 = vrot.lane.b32.xlu0 %v9353_v48, %s8013_s17 }
0x1165   : > { %2063 = vrot.lane.b32.xlu1 %v9375_v55, %s8016_s27 }
0x1167   : > { %2884 = vrot.lane.b32.xlu0 %v9431_v60, %s8014_s21 }
0x1169   : > { %2049 = vrot.lane.b32.xlu1 %v9308_v18, %s8014_s21 }
0x116b   : > { %2892 = vrot.lane.b32.xlu0 %v2672_v14, %s8015_s20  ;;  %v809_v14 = vld [vmem:[%s8132_s18 + $0x8] sm:$0xff] }
0x116d   : > { %2057 = vrot.lane.b32.xlu1 %v9336_v50, %s8015_s20  ;;  %v808_v50 = vld [vmem:[%s8132_s18] sm:$0xff] }
0x116e   : > { %v7121_v63 = vpack.c.bf16 %v809_v14, %v808_v50 }
0x116f   : > { %2065 = vrot.lane.b32.xlu0 %v9373_v52, %s8016_s27 }
0x1171   : > { %2886 = vrot.lane.b32.xlu1 %v9429_v39, %s8014_s21 }
0x11d9   : > { %v2789_v34 = vpop.xlane.xlu1 %2788 }
0x11da   : > { %7941 = vrcp.f32 %v2789_v34  ;;  %v2786_v0 = vpop.xlane.xlu0 %2785 }
0x11db   : > { %7943 = vrcp.f32 %v2786_v0 }
0x11dd   : > { %v2048_v60 = vpop.permute.xlu1 %2047 }
0x11de   : > { %v7878_v48 = vpop.permute.xlu0 %7877  ;;  %v2069_v19 = vsel %vm1245_vm7, %v9306_v51, %v2048_v60  ;;  %v6125_v51 = vld [vmem:[%s11038_s16] ss:$0 sm:$0xff] }
0x11df   : > { %v7880_v55 = vunpack.i.h.bf16 %v7878_v48  ;;  %v7879_v18 = vunpack.i.l.bf16 %v7878_v48 }
0x11e1   : > { %v7114_v7 = vpack.c.bf16 %v7880_v55, %v7879_v18  ;;  %v2056_v16 = vpop.permute.xlu1 %2055 }
0x11e2   : > { %v2072_v2 = vsel %vm2071_vm15, %v2069_v19, %v2056_v16  ;;  %v2885_v34 = vpop.permute.xlu0 %2884 }
0x11e3   : > { %7116 = vmatprep.subr.msk.bf16.mxu1 %vm9270_vm13, %v7114_v7  ;;  %v2906_v60 = vsel %vm1245_vm7, %v9403_v62, %v2885_v34 }
0x11e4   : > { %v7942_v37 = vpop.eup %7941  ;;  %7119 = vmatpush3.bf16.msk.msra.mxu1 %vm9270_vm13, %v7114_v7 }
0x11e5   : > { %v7944_v52 = vpop.eup %7943  ;;  %7120 = vmatprep.subr.bf16.mxu1 %v11030_v26  ;;  %v2793_v12 = vmul.f32 %v7942_v37, %v7938_v17  ;;  %v2064_v3 = vpop.permute.xlu1 %2063 }
0x11e6   : > { %v2792_v39 = vmul.f32 %v7944_v52, %v7940_v1  ;;  %v2075_v38 = vsel %vm2074_vm0, %v2072_v2, %v2064_v3  ;;  %v2893_v48 = vpop.permute.xlu0 %2892 }
0x11e7   : > { %v2908_v7 = vsel %vm2071_vm15, %v2906_v60, %v2893_v48 }
0x11e8   : > { %6994 = vmatprep.mubr.msk.f32.mxu1 %vm1329_vm10, %v2792_v39 }
0x11e9   : > { %6995 = vmatmul.mubr.msk.f32.vlgmr.msra.gmra.mrb[14].mxu1 %vm1329_vm10, %v2793_v12  ;;  %v2050_v0 = vpop.permute.xlu1 %2049 }
0x11ea   : > { %7122 = vmatpush3.bf16.msra.mxu1 %v7121_v63  ;;  %7005 = vmatprep.mubr.msk.f32.mxu1 %vm8000_vm5, %v11031_v4  ;;  %v2066_v18 = vpop.permute.xlu0 %2065 }
0x11eb   : > { %7123 = vmatprep.subr.bf16.mxu1 %v11030_v26 }
0x11ed   : > { %v2058_v55 = vpop.permute.xlu1 %2057 }
0x11ee   : > { %7125 = vmatpush3.bf16.msra.mxu1 %v7124_v35 }
0x11f1   : > { %7006 = vmatmul.mubr.msk.f32.vlgmr.msra.gmra.mrb[16].mxu1 %vm1149_vm6, %v2075_v38  ;;  %v2887_v37 = vpop.permute.xlu1 %2886 }
0x11f2   : > { %7008 = vmatprep.mubr.msk.f32.mxu1 %vm8000_vm5, %v11031_v4  ;;  %v2907_v12 = vsel %vm1245_vm7, %v9401_v54, %v2887_v37 }
0x12bc   : > { %v6996_v17 = vpop.f32.mrb[14].mxu1 }
0x12bd   : > { %2902 = vrot.lane.b32.xlu1 %v6996_v17, %s8016_s27  ;;  %v2873_v26 = vpop.f32.mrb[15].mxu1 }
0x12be   : > { %2900 = vrot.lane.b32.xlu0 %v2873_v26, %s8016_s27 }
0x12c2   : > { %2894 = vrot.lane.b32.xlu0 %v9457_v15, %s8015_s20  ;;  %v2070_v15 = vsel %vm1245_vm7, %v9304_v49, %v2050_v0 }
0x12c3   : > { %v2073_v50 = vsel %vm2071_vm15, %v2070_v15, %v2058_v55 }
0x12c4   : > { %v2999_v1 = vpop.f32.mrb[16].mxu1  ;;  %v2076_v63 = vsel %vm2074_vm0, %v2073_v50, %v2066_v18 }
0x12c5   : > { %v9508_v6 = vadd.f32 %v6125_v51, %v2999_v1  ;;  %v7007_v32 = vpop.f32.mrb[17].mxu1 }
0x12c7   : > { %v3017_v1 = vadd.f32 (!%p6129_p5), %v9508_v6, %v9204_v30 }
0x12c9   : > { %v3020_v34 = vsel (!%p6129_p5), %vm1149_vm6, %v3017_v1, 0.0 }
0x12e1   : > { %3021 = vadd.xlane.f32.xlu0 (!%p6129_p5), %v3020_v34 }
0x132f   : > { %v2903_v53 = vpop.permute.xlu1 %2902 }
0x1330   : > { %v2901_v14 = vpop.permute.xlu0 %2900 }
0x1331   : > { %v2910_v52 = vsel %vm2074_vm0, %v2908_v7, %v2901_v14 }
0x1332   : > { %v2914_v39 = vrot.slane %v2910_v52, 7 }
0x1334   : > { %v2895_v16 = vpop.permute.xlu0 %2894  ;;  %v2918_v62 = vsel %vm1364_vm11, %v2076_v63, %v2914_v39 }
0x1335   : > { %v2909_v49 = vsel %vm2071_vm15, %v2907_v12, %v2895_v16  ;;  %7009 = vmatmul.mubr.msk.f32.gmra.mrb[18].mxu1 %vm1149_vm6, %v2918_v62  ;;  %v7126_v62 = vpack.c.bf16 (!%p6129_p5), %v8264_v41, %v8213_v23 }
0x1336   : > { %v2911_v33 = vsel %vm2074_vm0, %v2909_v49, %v2903_v53  ;;  %7011 = vmatprep.mubr.msk.f32.mxu1 %vm8000_vm5, %v11031_v4  ;;  %v7134_v53 = vpack.c.bf16 (!%p6129_p5), %v8270_v43, %v8219_v25  ;;  %v7128_v49 = vpack.c.bf16 (!%p6129_p5), %v8261_v40, %v8210_v22  ;;  %v11224_v40 = vld [vmem:[#allocation253_spill] sm:$0xff] (!%p6129_p5)  ;;  %v11225_v43 = vld [vmem:[#allocation204_spill] sm:$0xff] (!%p6129_p5) }
0x1337   : > { %v2915_v35 = vrot.slane %v2911_v33, 7  ;;  %v7136_v33 = vpack.c.bf16 (!%p6129_p5), %v8267_v42, %v8216_v24  ;;  %7127 = vmatprep.subr.bf16.mxu0 (!%p6129_p5), %v7126_v62 }
0x1338   : > { %7135 = vmatprep.subr.bf16.mxu1 (!%p6129_p5), %v7134_v53  ;;  %7129 = vmatpush1.bf16.msra.mxu0 (!%p6129_p5), %v7128_v49  ;;  %v7144_v49 = vpack.c.bf16 (!%p6129_p5), %v8273_v44, %v8223_v27 }
0x1339   : > { %v2916_v3 = vsel %vm1364_vm11, %v2914_v39, %v2915_v35  ;;  %7137 = vmatpush1.bf16.msra.mxu1 (!%p6129_p5), %v7136_v33  ;;  %v7130_v35 = vpack.c.bf16 (!%p6129_p5), %v8360_v9, %v8312_v57  ;;  %v7152_v33 = vpack.c.bf16 (!%p6129_p5), %v8279_v46, %v8229_v29  ;;  %v11220_v57 = vld [vmem:[#allocation235_spill] sm:$0xff] (!%p6129_p5) }
0x133a   : > { %7012 = vmatmul.mubr.msk.f32.gmra.mrb[20].mxu1 %vm1149_vm6, %v2916_v3  ;;  %v7138_v3 = vpack.c.bf16 (!%p6129_p5), %v8366_v11, %v8318_v59 }
0x133b   : > { %7131 = vmatprep.subr.bf16.mxu0 (!%p6129_p5), %v7130_v35 }
0x133c   : > { %7139 = vmatprep.subr.bf16.mxu1 (!%p6129_p5), %v7138_v3 }
0x136e   : > { %v3022_v48 = vpop.xlane.xlu0 (!%p6129_p5), %3021 }
0x136f   : > { %v3031_v18 = vmul.f32 (!%p6129_p5), 0.03125, %v3022_v48 }
0x1371   : > { %v3034_v15 = vsub.f32 (!%p6129_p5), %v3017_v1, %v3031_v18 }
0x1373   : > { %v3037_v14 = vmul.f32 (!%p6129_p5), %v3034_v15, %v3034_v15 }
0x1375   : > { %v3040_v39 = vsel (!%p6129_p5), %vm1149_vm6, %v3037_v14, 0.0 }
0x1408   : > { %v3004_v19 = vpop.f32.mrb[18].mxu1  ;;  %3016 = sbr.rel (%p6129_p5) target bundleno = 6304 (0x18a0), region = 92 }
0x1409   : > { %v9528_v54 = vadd.f32 %v6125_v51, %v3004_v19  ;;  %v7010_v2 = vpop.f32.mrb[19].mxu1  ;;  %v7132_v19 = vpack.c.bf16 (!%p6129_p5), %v8357_v8, %v8309_v56  ;;  %v11210_v56 = vld [vmem:[#allocation185_spill] sm:$0xff] (!%p6129_p5) }
0x140a   : > { %v7140_v2 = vpack.c.bf16 (!%p6129_p5), %v8363_v10, %v8315_v58  ;;  %v11204_v10 = vld [vmem:[#allocation201_spill] sm:$0xff] (!%p6129_p5) }
0x140b   : > { %v3018_v32 = vadd.f32 (!%p6129_p5), %v9528_v54, %v9210_v5  ;;  %7133 = vmatpush1.bf16.msra.mxu0 (!%p6129_p5), %v7132_v19  ;;  %v7146_v19 = vpack.c.bf16 (!%p6129_p5), %v8372_v13, %v8324_v61  ;;  %v11152_v13 = vld [vmem:[#allocation188_spill] sm:$0xff] (!%p6129_p5) }
0x140c   : > { %7141 = vmatpush1.bf16.msra.mxu1 (!%p6129_p5), %v7140_v2  ;;  %v11039_v2 = vld [vmem:[#allocation47_spill] sm:$0xff] (!%p6129_p5) }
0x140d   : > { %v3009_v38 = vpop.f32.mrb[20].mxu1 }
0x140e   : > { %v3010_v17 = vadd.f32 %v6125_v51, %v3009_v38  ;;  %v7013_v26 = vpop.f32.mrb[21].mxu1  ;;  %v3023_v51 = vsel (!%p6129_p5), %vm1149_vm6, %v3018_v32, 0.0  ;;  %v8017_v38 = vmov (!%p6129_p5), 0.0  }
0x140f   : > { %3024 = vadd.xlane.f32.xlu0 %v3023_v51  ;;  %3234 = vmatprep.mubr.f32.mxu0 %v8017_v38  ;;  %v7150_v26 = vpack.c.bf16 %v8282_v47, %v8234_v31 }
0x1410   : > { %v3019_v4 = vadd.f32 %v3010_v17, %v9216_v36  ;;  %3317 = vmatprep.mubr.f32.mxu1 %v8017_v38  ;;  %v7142_v17 = vpack.c.bf16 %v8276_v45, %v8226_v28  ;;  %v11200_v45 = vld [vmem:[#allocation183_spill] sm:$0xff]  ;;  %v11203_v28 = vld [vmem:[#allocation200_spill] sm:$0xff] }
0x1411   : > { %7151 = vmatprep.subr.bf16.mxu1 %v7150_v26  ;;  %v7314_v58 = vpack.c.bf16 %v11204_v10, %v11203_v28 }
0x1412   : > { %v3027_v0 = vsel %vm3026_vm1, %v3019_v4, 0.0  ;;  %7143 = vmatprep.subr.bf16.mxu0 %v7142_v17  ;;  %v11040_v17 = vld [vmem:[#allocation63_spill] sm:$0xff] }
0x1413   : > { %3028 = vadd.xlane.f32.xlu1 %v3027_v0  ;;  %v7154_v26 = vpack.c.bf16 %v11040_v17, %v11039_v2  ;;  %v11055_v2 = vld [vmem:[#allocation51_spill] sm:$0xff] }
0x1414   : > { %v11056_v17 = vld [vmem:[#allocation67_spill] sm:$0xff] }
0x1417   : > { %3041 = vadd.xlane.f32.xlu1 %v3040_v39 }
0x149c   : > { %v3025_v36 = vpop.xlane.xlu0 %3024 }
0x149d   : > { %v3032_v50 = vmul.f32 0.03125, %v3025_v36 }
0x149f   : > { %v3035_v52 = vsub.f32 %v3018_v32, %v3032_v50  ;;  %v3062_v32 = vlaneseq }
0x14a0   : > { %v3029_v55 = vpop.xlane.xlu1 %3028 }
0x14a1   : > { %v3033_v60 = vmul.f32 0.03125, %v3029_v55  ;;  %v3038_v12 = vmul.f32 %v3035_v52, %v3035_v52  ;;  %v9564_v18 = vshrl.u32 %v3062_v32, 7 }
0x14a3   : > { %v3036_v7 = vsub.f32 %v3019_v4, %v3033_v60  ;;  %v3043_v16 = vsel %vm1149_vm6, %v3038_v12, 0.0  ;;  %v9567_v50 = vsub.s32 0, %v9564_v18  ;;  %v11205_v8 = vsub.s32 1, %v9564_v18 }
0x14a4   : > { %3044 = vadd.xlane.f32.xlu0 %v3043_v16  ;;  %v3042_v1 = vpop.xlane.xlu1 %3041  ;;  %v11215_v9 = vsub.s32 5, %v9564_v18 }
0x14a5   : > { %v3039_v37 = vmul.f32 %v3036_v7, %v3036_v7  ;;  %v3049_v4 = vmul.f32 0.03125, %v3042_v1  ;;  %v3065_v14 = vrot.slane %v8200_v20, %v9567_v50  ;;  %v3074_v39 = vrot.slane %v8207_v21, %v9567_v50  ;;  %v11196_v20 = vld [vmem:[#allocation199_spill] sm:$0xff] }
0x14a7   : > { %v3046_v63 = vsel %vm3026_vm1, %v3039_v37, 0.0  ;;  %v3052_v34 = vadd.f32 1e-05, %v3049_v4 }
0x14a8   : > { %3047 = vadd.xlane.f32.xlu1 %v3046_v63 }
0x14a9   : > { %7945 = vrsqrt.f32 %v3052_v34  ;;  %v11043_v34 = vld [vmem:[#allocation46_spill] sm:$0xff] }
0x14b3   : > { %v7946_v37 = vpop.eup %7945 }
0x14b4   : > { %v3058_v63 = vmul.f32 %v7946_v37, %v3034_v15  ;;  %v11048_v37 = vld [vmem:[#allocation35_spill] sm:$0xff] }
0x14b6   : > { %v3067_v12 = vmul.f32 %v3065_v14, %v3058_v63 }
0x14b8   : > { %v9573_v53 = vadd.f32 %v3074_v39, %v3067_v12  ;;  %v11049_v12 = vld [vmem:[#allocation16_spill] sm:$0xff] }
0x14ba   : > { %6130 = vmatmul.mubr.msk.f32.vlgmr.msra.gmra.mrb[0].mxu0 %vm1149_vm6, %v9573_v53  ;;  %6133 = vmatmul.mubr.msk.f32.vlgmr.msra.gmra.mrb[0].mxu1 %vm1149_vm6, %v9573_v53 }
0x14bb   : > { %3240 = vmatprep.mubr.f32.mxu0 %v8017_v38  ;;  %3323 = vmatprep.mubr.f32.mxu1 %v8017_v38 }
0x14bc   : > { %7145 = vmatpush1.bf16.msra.mxu0 %v7144_v49  ;;  %7153 = vmatpush1.bf16.msra.mxu1 %v7152_v33  ;;  %v11051_v49 = vld [vmem:[#allocation18_spill] sm:$0xff] }
0x14bd   : > { %7147 = vmatprep.subr.bf16.mxu0 %v7146_v19  ;;  %7155 = vmatprep.subr.bf16.mxu1 %v7154_v26  ;;  %v7170_v26 = vpack.c.bf16 %v11056_v17, %v11055_v2  ;;  %v11073_v17 = vld [vmem:[#allocation52_spill] sm:$0xff] }
0x1531   : > { %v3045_v51 = vpop.xlane.xlu0 %3044 }
0x1532   : > { %v3050_v55 = vmul.f32 0.03125, %v3045_v51 }
0x1534   : > { %v3053_v36 = vadd.f32 1e-05, %v3050_v55  ;;  %v11046_v55 = vld [vmem:[#allocation33_spill] sm:$0xff] }
0x1535   : > { %v3048_v0 = vpop.xlane.xlu1 %3047 }
0x1536   : > { %v3051_v48 = vmul.f32 0.03125, %v3048_v0  ;;  %v11044_v0 = vld [vmem:[#allocation62_spill] sm:$0xff] }
0x1537   : > { %v7156_v51 = vpack.c.bf16 %v11044_v0, %v11043_v34  ;;  %v11061_v0 = vld [vmem:[#allocation21_spill] sm:$0xff] }
0x1538   : > { %v3054_v60 = vadd.f32 1e-05, %v3051_v48  ;;  %v11045_v48 = vld [vmem:[#allocation17_spill] sm:$0xff] }
0x1539   : > { %7157 = vmatpush1.bf16.msra.mxu1 %v7156_v51  ;;  %v11062_v51 = vld [vmem:[#allocation37_spill] sm:$0xff] }
0x153a   : > { %7947 = vrsqrt.f32 %v3054_v60  ;;  %v7158_v60 = vpack.c.bf16 %v11046_v55, %v11045_v48  ;;  %v7174_v48 = vpack.c.bf16 %v11062_v51, %v11061_v0  ;;  %v11063_v55 = vld [vmem:[#allocation23_spill] sm:$0xff]  ;;  %v11079_v51 = vld [vmem:[#allocation122_spill] sm:$0xff] }
0x153b   : > { %7949 = vrsqrt.f32 %v3053_v36  ;;  %v11047_v36 = vld [vmem:[#allocation19_spill] sm:$0xff] }
0x153c   : > { %v7166_v63 = vpack.c.bf16 %v11048_v37, %v11047_v36  ;;  %v11065_v37 = vld [vmem:[#allocation20_spill] sm:$0xff] }
0x153e   : > { %7167 = vmatprep.subr.bf16.mxu1 %v7166_v63  ;;  %v11066_v63 = vld [vmem:[#allocation36_spill] sm:$0xff] }
0x1544   : > { %v7948_v16 = vpop.eup %7947 }
0x1545   : > { %v7950_v62 = vpop.eup %7949  ;;  %v3060_v35 = vmul.f32 %v7948_v16, %v3036_v7  ;;  %v11041_v7 = vld [vmem:[#allocation44_spill] sm:$0xff] }
0x1546   : > { %v3059_v3 = vmul.f32 %v7950_v62, %v3035_v52  ;;  %v11042_v52 = vld [vmem:[#allocation60_spill] sm:$0xff] }
0x1547   : > { %v7148_v1 = vpack.c.bf16 %v11042_v52, %v11041_v7  ;;  %v3069_v4 = vmul.f32 %v3065_v14, %v3060_v35  ;;  %v11050_v16 = vld [vmem:[#allocation32_spill] sm:$0xff]  ;;  %v11053_v35 = vld [vmem:[#allocation49_spill] sm:$0xff] }
0x1548   : > { %v3068_v15 = vmul.f32 %v3065_v14, %v3059_v3  ;;  %v7160_v62 = vpack.c.bf16 %v11050_v16, %v11049_v12  ;;  %v11054_v3 = vld [vmem:[#allocation65_spill] sm:$0xff]  ;;  %v11058_v7 = vld [vmem:[#allocation64_spill] sm:$0xff]  ;;  %v7176_v12 = vpack.c.bf16 %v11066_v63, %v11065_v37  ;;  %v11067_v16 = vld [vmem:[#allocation22_spill] sm:$0xff] }
0x1549   : > { %v9605_v14 = vadd.f32 %v3074_v39, %v3069_v4  ;;  %7149 = vmatpush1.bf16.msra.mxu0 %v7148_v1  ;;  %v7162_v19 = vpack.c.bf16 %v11054_v3, %v11053_v35  ;;  %v11059_v1 = vld [vmem:[#allocation50_spill] sm:$0xff]  ;;  %v11071_v3 = vld [vmem:[#allocation55_spill] sm:$0xff] }
0x154a   : > { %v9591_v32 = vadd.f32 %v3074_v39, %v3068_v15  ;;  %7159 = vmatprep.subr.bf16.mxu0 %v7158_v60  ;;  %v11052_v39 = vld [vmem:[#allocation34_spill] sm:$0xff]  ;;  %v11057_v15 = vld [vmem:[#allocation48_spill] sm:$0xff]  ;;  %v11064_v60 = vld [vmem:[#allocation39_spill] sm:$0xff] }
0x154b   : > { %v7168_v33 = vpack.c.bf16 %v11052_v39, %v11051_v49  ;;  %v7164_v52 = vpack.c.bf16 %v11058_v7, %v11057_v15  ;;  %v11060_v4 = vld [vmem:[#allocation66_spill] sm:$0xff]  ;;  %v7182_v36 = vpack.c.bf16 %v11064_v60, %v11063_v55  ;;  %v11069_v39 = vld [vmem:[#allocation53_spill] sm:$0xff] }
0x154c   : > { %6131 = vmatmul.mubr.msk.f32.gmra.mrb[2].mxu0 %vm1149_vm6, %v9591_v32  ;;  %6134 = vmatmul.mubr.msk.f32.gmra.mrb[2].mxu1 %vm1149_vm6, %v9591_v32  ;;  %v7172_v34 = vpack.c.bf16 %v11060_v4, %v11059_v1  ;;  %v11075_v7 = vld [vmem:[#allocation54_spill] sm:$0xff] }
0x154d   : > { %3246 = vmatprep.mubr.f32.mxu0 %v8017_v38  ;;  %3329 = vmatprep.mubr.f32.mxu1 %v8017_v38  ;;  %v11077_v4 = vld [vmem:[#allocation90_spill] sm:$0xff] }
0x154e   : > { %v11081_v60 = vld [vmem:[#allocation74_spill] sm:$0xff] }
0x154f   : > { %v11083_v63 = vld [vmem:[#allocation106_spill] sm:$0xff] }
0x1550   : > { %6132 = vmatmul.mubr.msk.f32.gmra.mrb[4].mxu0 %vm1149_vm6, %v9605_v14  ;;  %6135 = vmatmul.mubr.msk.f32.gmra.mrb[4].mxu1 %vm1149_vm6, %v9605_v14 }
0x1551   : > { %3400 = vmatprep.mubr.f32.mxu0 %v8017_v38  ;;  %3483 = vmatprep.mubr.f32.mxu1 %v8017_v38 }
0x1554   : > { %6136 = vmatmul.mubr.msk.f32.vlgmr.msra.gmra.mrb[6].mxu0 %vm1149_vm6, %v9573_v53  ;;  %6139 = vmatmul.mubr.msk.f32.vlgmr.msra.gmra.mrb[6].mxu1 %vm1149_vm6, %v9573_v53 }
0x1555   : > { %3406 = vmatprep.mubr.f32.mxu0 %v8017_v38  ;;  %3489 = vmatprep.mubr.f32.mxu1 %v8017_v38 }
0x1556   : > { %7161 = vmatpush1.bf16.msra.mxu0 %v7160_v62  ;;  %7169 = vmatpush1.bf16.msra.mxu1 %v7168_v33  ;;  %v11068_v62 = vld [vmem:[#allocation38_spill] sm:$0xff]  ;;  %v11070_v33 = vld [vmem:[#allocation69_spill] sm:$0xff] }
0x1557   : > { %7163 = vmatprep.subr.bf16.mxu0 %v7162_v19  ;;  %7171 = vmatprep.subr.bf16.mxu1 %v7170_v26  ;;  %v7184_v49 = vpack.c.bf16 %v11068_v62, %v11067_v16  ;;  %v7178_v35 = vpack.c.bf16 %v11070_v33, %v11069_v39  ;;  %v11072_v19 = vld [vmem:[#allocation71_spill] sm:$0xff]  ;;  %v11074_v26 = vld [vmem:[#allocation68_spill] sm:$0xff] }
0x1558   : > { %6137 = vmatmul.mubr.msk.f32.gmra.mrb[8].mxu0 %vm1149_vm6, %v9591_v32  ;;  %6140 = vmatmul.mubr.msk.f32.gmra.mrb[8].mxu1 %vm1149_vm6, %v9591_v32  ;;  %v7186_v2 = vpack.c.bf16 %v11072_v19, %v11071_v3  ;;  %v7180_v15 = vpack.c.bf16 %v11074_v26, %v11073_v17  ;;  %v11085_v62 = vld [vmem:[#allocation92_spill] sm:$0xff] }
0x1559   : > { %3412 = vmatprep.mubr.f32.mxu0 %v8017_v38  ;;  %3495 = vmatprep.mubr.f32.mxu1 %v8017_v38  ;;  %v11087_v33 = vld [vmem:[#allocation124_spill] sm:$0xff] }
0x155a   : > { %7165 = vmatpush1.bf16.msra.mxu0 %v7164_v52  ;;  %7173 = vmatpush1.bf16.msra.mxu1 %v7172_v34  ;;  %v11076_v52 = vld [vmem:[#allocation70_spill] sm:$0xff]  ;;  %v11078_v34 = vld [vmem:[#allocation91_spill] sm:$0xff]  ;;  %v11089_v19 = vld [vmem:[#allocation76_spill] sm:$0xff] }
0x155b   : > { %7175 = vmatprep.subr.bf16.mxu0 %v7174_v48  ;;  %7183 = vmatprep.subr.bf16.mxu1 %v7182_v36  ;;  %v7188_v1 = vpack.c.bf16 %v11076_v52, %v11075_v7  ;;  %v7190_v0 = vpack.c.bf16 %v11078_v34, %v11077_v4  ;;  %v11080_v48 = vld [vmem:[#allocation123_spill] sm:$0xff]  ;;  %v11091_v26 = vld [vmem:[#allocation108_spill] sm:$0xff]  ;;  %v11093_v52 = vld [vmem:[#allocation94_spill] sm:$0xff] }
0x155c   : > { %6138 = vmatmul.mubr.msk.f32.gmra.mrb[10].mxu0 %vm1149_vm6, %v9605_v14  ;;  %6141 = vmatmul.mubr.msk.f32.gmra.mrb[10].mxu1 %vm1149_vm6, %v9605_v14  ;;  %v7222_v55 = vpack.c.bf16 %v11080_v48, %v11079_v51  ;;  %v11082_v36 = vld [vmem:[#allocation75_spill] sm:$0xff]  ;;  %v11095_v34 = vld [vmem:[#allocation126_spill] sm:$0xff] }
0x155d   : > { %3566 = vmatprep.mubr.f32.mxu0 %v8017_v38  ;;  %3649 = vmatprep.mubr.f32.mxu1 %v8017_v38  ;;  %v7192_v37 = vpack.c.bf16 %v11082_v36, %v11081_v60  ;;  %v11097_v48 = vld [vmem:[#allocation78_spill] sm:$0xff] }
0x155e   : > { %v11099_v36 = vld [vmem:[#allocation110_spill] sm:$0xff] }
0x1560   : > { %6142 = vmatmul.mubr.msk.f32.vlgmr.msra.gmra.mrb[12].mxu0 %vm1149_vm6, %v9573_v53  ;;  %6145 = vmatmul.mubr.msk.f32.vlgmr.msra.gmra.mrb[12].mxu1 %vm1149_vm6, %v9573_v53 }
0x1561   : > { %3572 = vmatprep.mubr.f32.mxu0 %v8017_v38  ;;  %3655 = vmatprep.mubr.f32.mxu1 %v8017_v38 }
0x1562   : > { %7177 = vmatpush1.bf16.msra.mxu0 %v7176_v12  ;;  %7185 = vmatpush1.bf16.msra.mxu1 %v7184_v49  ;;  %v11084_v12 = vld [vmem:[#allocation107_spill] sm:$0xff]  ;;  %v11086_v49 = vld [vmem:[#allocation93_spill] sm:$0xff] }
0x1563   : > { %7179 = vmatprep.subr.bf16.mxu0 %v7178_v35  ;;  %7187 = vmatprep.subr.bf16.mxu1 %v7186_v2  ;;  %v7224_v16 = vpack.c.bf16 %v11084_v12, %v11083_v63  ;;  %v7194_v39 = vpack.c.bf16 %v11086_v49, %v11085_v62  ;;  %v11088_v35 = vld [vmem:[#allocation125_spill] sm:$0xff]  ;;  %v11101_v12 = vld [vmem:[#allocation96_spill] sm:$0xff] }
0x1564   : > { %6143 = vmatmul.mubr.msk.f32.gmra.mrb[14].mxu0 %vm1149_vm6, %v9591_v32  ;;  %6146 = vmatmul.mubr.msk.f32.gmra.mrb[14].mxu1 %vm1149_vm6, %v9591_v32  ;;  %v7226_v3 = vpack.c.bf16 %v11088_v35, %v11087_v33  ;;  %v11090_v2 = vld [vmem:[#allocation77_spill] sm:$0xff]  ;;  %v11103_v49 = vld [vmem:[#allocation128_spill] sm:$0xff] }
0x1565   : > { %3578 = vmatprep.mubr.f32.mxu0 %v8017_v38  ;;  %3661 = vmatprep.mubr.f32.mxu1 %v8017_v38  ;;  %v7196_v17 = vpack.c.bf16 %v11090_v2, %v11089_v19  ;;  %v11106_v35 = vld [vmem:[#allocation81_spill] sm:$0xff]  ;;  %v11107_v19 = vld [vmem:[#allocation112_spill] sm:$0xff] }
0x1566   : > { %7181 = vmatpush1.bf16.msra.mxu0 %v7180_v15  ;;  %7189 = vmatpush1.bf16.msra.mxu1 %v7188_v1  ;;  %v11092_v15 = vld [vmem:[#allocation109_spill] sm:$0xff]  ;;  %v11094_v1 = vld [vmem:[#allocation95_spill] sm:$0xff] }
0x1567   : > { %7191 = vmatprep.subr.bf16.mxu0 %v7190_v0  ;;  %7223 = vmatprep.subr.bf16.mxu1 %v7222_v55  ;;  %v7228_v7 = vpack.c.bf16 %v11092_v15, %v11091_v26  ;;  %v7198_v4 = vpack.c.bf16 %v11094_v1, %v11093_v52  ;;  %v11096_v0 = vld [vmem:[#allocation127_spill] sm:$0xff]  ;;  %v11108_v2 = vld [vmem:[#allocation113_spill] sm:$0xff]  ;;  %v11109_v26 = vld [vmem:[#allocation98_spill] sm:$0xff] }
0x1568   : > { %6144 = vmatmul.mubr.msk.f32.gmra.mrb[16].mxu0 %vm1149_vm6, %v9605_v14  ;;  %6147 = vmatmul.mubr.msk.f32.gmra.mrb[16].mxu1 %vm1149_vm6, %v9605_v14  ;;  %v7230_v51 = vpack.c.bf16 %v11096_v0, %v11095_v34  ;;  %v11098_v55 = vld [vmem:[#allocation79_spill] sm:$0xff]  ;;  %v11111_v52 = vld [vmem:[#allocation130_spill] sm:$0xff] }
0x1569   : > { %3732 = vmatprep.mubr.f32.mxu0 %v8017_v38  ;;  %3815 = vmatprep.mubr.f32.mxu1 %v8017_v38  ;;  %v7200_v60 = vpack.c.bf16 %v11098_v55, %v11097_v48  ;;  %v11110_v15 = vld [vmem:[#allocation99_spill] sm:$0xff]  ;;  %v11113_v34 = vld [vmem:[#allocation82_spill] sm:$0xff] }
0x156a   : > { %v11112_v1 = vld [vmem:[#allocation131_spill] sm:$0xff]  ;;  %v11115_v48 = vld [vmem:[#allocation114_spill] sm:$0xff] }
0x156b   : > { %v11114_v0 = vld [vmem:[#allocation83_spill] sm:$0xff] }
0x156c   : > { %6148 = vmatmul.mubr.msk.f32.vlgmr.msra.gmra.mrb[18].mxu0 %vm1149_vm6, %v9573_v53  ;;  %6151 = vmatmul.mubr.msk.f32.vlgmr.msra.gmra.mrb[18].mxu1 %vm1149_vm6, %v9573_v53  ;;  %v11116_v55 = vld [vmem:[#allocation115_spill] sm:$0xff] }
0x156d   : > { %3738 = vmatprep.mubr.f32.mxu0 %v8017_v38  ;;  %3821 = vmatprep.mubr.f32.mxu1 %v8017_v38 }
0x156e   : > { %7193 = vmatpush3.bf16.msra.mxu0 %v7192_v37  ;;  %7225 = vmatpush3.bf16.msra.mxu1 %v7224_v16  ;;  %v11100_v37 = vld [vmem:[#allocation111_spill] sm:$0xff]  ;;  %v11102_v16 = vld [vmem:[#allocation97_spill] sm:$0xff] }
0x156f   : > { %7195 = vmatprep.subr.bf16.mxu0 %v7194_v39  ;;  %7227 = vmatprep.subr.bf16.mxu1 %v7226_v3  ;;  %v7232_v63 = vpack.c.bf16 %v11100_v37, %v11099_v36  ;;  %v7202_v62 = vpack.c.bf16 %v11102_v16, %v11101_v12  ;;  %v11104_v39 = vld [vmem:[#allocation129_spill] sm:$0xff]  ;;  %v11117_v36 = vld [vmem:[#allocation100_spill] sm:$0xff] }
0x1570   : > { %6149 = vmatmul.mubr.msk.f32.gmra.mrb[20].mxu0 %vm1149_vm6, %v9591_v32  ;;  %6152 = vmatmul.mubr.msk.f32.gmra.mrb[20].mxu1 %vm1149_vm6, %v9591_v32  ;;  %v7234_v33 = vpack.c.bf16 %v11104_v39, %v11103_v49  ;;  %v11118_v37 = vld [vmem:[#allocation101_spill] sm:$0xff]  ;;  %v11119_v12 = vld [vmem:[#allocation132_spill] sm:$0xff] }
0x1571   : > { %3744 = vmatprep.mubr.f32.mxu0 %v8017_v38  ;;  %3827 = vmatprep.mubr.f32.mxu1 %v8017_v38  ;;  %v11105_v38 = vld [vmem:[#allocation80_spill] sm:$0xff]  ;;  %v11120_v16 = vld [vmem:[#allocation133_spill] sm:$0xff] }
0x1572   : > { %7197 = vmatpush3.bf16.msra.mxu0 %v7196_v17  ;;  %7229 = vmatpush3.bf16.msra.mxu1 %v7228_v7  ;;  %v7204_v3 = vpack.c.bf16 %v11106_v35, %v11105_v38  ;;  %v7236_v17 = vpack.c.bf16 %v11108_v2, %v11107_v19  ;;  %v7206_v7 = vpack.c.bf16 %v11110_v15, %v11109_v26  ;;  %v11121_v49 = vld [vmem:[#allocation84_spill] sm:$0xff]  ;;  %v11122_v39 = vld [vmem:[#allocation85_spill] sm:$0xff]  ;;  %v11125_v19 = vld [vmem:[#allocation102_spill] sm:$0xff] }
0x1573   : > { %7199 = vmatprep.subr.bf16.mxu0 %v7198_v4  ;;  %7231 = vmatprep.subr.bf16.mxu1 %v7230_v51  ;;  %v7238_v4 = vpack.c.bf16 %v11112_v1, %v11111_v52  ;;  %v7208_v51 = vpack.c.bf16 %v11114_v0, %v11113_v34  ;;  %v11123_v38 = vld [vmem:[#allocation116_spill] sm:$0xff]  ;;  %v11124_v35 = vld [vmem:[#allocation117_spill] sm:$0xff]  ;;  %v11126_v2 = vld [vmem:[#allocation103_spill] sm:$0xff] }
0x1574   : > { %6150 = vmatmul.mubr.msk.f32.gmra.mrb[22].mxu0 %vm1149_vm6, %v9605_v14  ;;  %6153 = vmatmul.mubr.msk.f32.gmra.mrb[22].mxu1 %vm1149_vm6, %v9605_v14  ;;  %v11127_v26 = vld [vmem:[#allocation134_spill] sm:$0xff]  ;;  %v11128_v15 = vld [vmem:[#allocation135_spill] sm:$0xff] }
0x1575   : > { %v11129_v52 = vld [vmem:[#allocation86_spill] sm:$0xff]  ;;  %v11130_v1 = vld [vmem:[#allocation87_spill] sm:$0xff] }
0x1576   : > { %7201 = vmatpush3.bf16.msra.mxu0 %v7200_v60  ;;  %7233 = vmatpush3.bf16.msra.mxu1 %v7232_v63  ;;  %v7240_v60 = vpack.c.bf16 %v11116_v55, %v11115_v48  ;;  %v7210_v63 = vpack.c.bf16 %v11118_v37, %v11117_v36  ;;  %v11131_v34 = vld [vmem:[#allocation118_spill] sm:$0xff]  ;;  %v11132_v0 = vld [vmem:[#allocation119_spill] sm:$0xff]  ;;  %v11133_v48 = vld [vmem:[#allocation104_spill] sm:$0xff] }
0x1577   : > { %7203 = vmatprep.subr.bf16.mxu0 %v7202_v62  ;;  %7235 = vmatprep.subr.bf16.mxu1 %v7234_v33  ;;  %v7242_v62 = vpack.c.bf16 %v11120_v16, %v11119_v12  ;;  %v7212_v33 = vpack.c.bf16 %v11122_v39, %v11121_v49  ;;  %v11134_v55 = vld [vmem:[#allocation105_spill] sm:$0xff]  ;;  %v11135_v36 = vld [vmem:[#allocation136_spill] sm:$0xff] }
0x1578   : > { %v11136_v37 = vld [vmem:[#allocation137_spill] sm:$0xff]  ;;  %v11137_v12 = vld [vmem:[#allocation88_spill] sm:$0xff] }
0x1579   : > { %v11138_v16 = vld [vmem:[#allocation89_spill] sm:$0xff]  ;;  %v11139_v49 = vld [vmem:[#allocation120_spill] sm:$0xff] }
0x157a   : > { %7205 = vmatpush3.bf16.msra.mxu0 %v7204_v3  ;;  %7237 = vmatpush3.bf16.msra.mxu1 %v7236_v17  ;;  %v7244_v3 = vpack.c.bf16 %v11124_v35, %v11123_v38  ;;  %v7214_v17 = vpack.c.bf16 %v11126_v2, %v11125_v19  ;;  %v11140_v39 = vld [vmem:[#allocation121_spill] sm:$0xff]  ;;  %v11141_v38 = vld [vmem:[#allocation154_spill] sm:$0xff]  ;;  %v11142_v35 = vld [vmem:[#allocation155_spill] sm:$0xff] }
0x157b   : > { %7207 = vmatprep.subr.bf16.mxu0 %v7206_v7  ;;  %7239 = vmatprep.subr.bf16.mxu1 %v7238_v4  ;;  %v7246_v7 = vpack.c.bf16 %v11128_v15, %v11127_v26  ;;  %v7216_v4 = vpack.c.bf16 %v11130_v1, %v11129_v52  ;;  %v11143_v19 = vld [vmem:[#allocation186_spill] sm:$0xff]  ;;  %v11144_v2 = vld [vmem:[#allocation187_spill] sm:$0xff]  ;;  %v10659_v26 = vsub.s32 2, %v9564_v18  ;;  %v10658_v15 = vsub.s32 1, %v9564_v18  ;;  %v11145_v52 = vld [vmem:[#allocation72_spill] sm:$0xff] }
0x157c   : > { %v3084_v1 = vrot.slane %v11145_v52, %v9567_v50 }
0x157e   : > { %7209 = vmatpush3.bf16.msra.mxu0 %v7208_v51  ;;  %7241 = vmatpush3.bf16.msra.mxu1 %v7240_v60  ;;  %v7248_v51 = vpack.c.bf16 %v11132_v0, %v11131_v34  ;;  %v7218_v60 = vpack.c.bf16 %v11134_v55, %v11133_v48  ;;  %v3088_v34 = vrot.slane %v11145_v52, %v10658_v15 }
0x157f   : > { %7211 = vmatprep.subr.bf16.mxu0 %v7210_v63  ;;  %7243 = vmatprep.subr.bf16.mxu1 %v7242_v62  ;;  %v7250_v63 = vpack.c.bf16 %v11136_v37, %v11135_v36  ;;  %v7220_v62 = vpack.c.bf16 %v11138_v16, %v11137_v12  ;;  %v11146_v16 = vld [vmem:[#allocation138_spill] sm:$0xff] }
0x1582   : > { %7213 = vmatpush3.bf16.msra.mxu0 %v7212_v33  ;;  %7245 = vmatpush3.bf16.msra.mxu1 %v7244_v3  ;;  %v7252_v33 = vpack.c.bf16 %v11140_v39, %v11139_v49  ;;  %v7254_v3 = vpack.c.bf16 %v11142_v35, %v11141_v38  ;;  %v11148_v38 = vld [vmem:[#allocation170_spill] sm:$0xff]  ;;  %v11149_v35 = vld [vmem:[#allocation171_spill] sm:$0xff] }
0x1583   : > { %7215 = vmatprep.subr.bf16.mxu0 %v7214_v17  ;;  %7247 = vmatprep.subr.bf16.mxu1 %v7246_v7  ;;  %v7286_v17 = vpack.c.bf16 %v11144_v2, %v11143_v19  ;;  %v10657_v7 = vsub.s32 3, %v9564_v18  ;;  %v10664_v19 = vsub.s32 5, %v9564_v18 }
0x1585   : > { %v3096_v0 = vrot.slane %v11145_v52, %v10657_v7 }
0x1586   : > { %7217 = vmatpush3.bf16.msra.mxu0 %v7216_v4  ;;  %7249 = vmatpush3.bf16.msra.mxu1 %v7248_v51  ;;  %v3092_v4 = vrot.slane %v11145_v52, %v10659_v26 }
0x1587   : > { %7219 = vmatprep.subr.bf16.mxu0 %v7218_v60  ;;  %7251 = vmatprep.subr.bf16.mxu1 %v7250_v63 }
0x158a   : > { %7221 = vmatpush3.bf16.msra.mxu0 %v7220_v62  ;;  %7253 = vmatpush3.bf16.msra.mxu1 %v7252_v33  ;;  %v11147_v62 = vld [vmem:[#allocation139_spill] sm:$0xff] }
0x158b   : > { %7255 = vmatprep.subr.bf16.mxu0 %v7254_v3  ;;  %7287 = vmatprep.subr.bf16.mxu1 %v7286_v17  ;;  %v7256_v49 = vpack.c.bf16 %v11147_v62, %v11146_v16  ;;  %v7288_v3 = vpack.c.bf16 %v11149_v35, %v11148_v38  ;;  %v11155_v38 = vld [vmem:[#allocation141_spill] sm:$0xff] }
0x158d   : > { %v3236_v51 = vpop.f32.mrb[0].mxu0  ;;  %v3319_v48 = vpop.f32.mrb[0].mxu1 }
0x158e   : > { %v3237_v55 = vadd.f32 %v3236_v51, %v3084_v1  ;;  %v3320_v60 = vadd.f32 %v3319_v48, %v3092_v4  ;;  %v3238_v36 = vpop.f32.mrb[1].mxu0  ;;  %v3321_v37 = vpop.f32.mrb[1].mxu1  ;;  %v11150_v51 = vld [vmem:[#allocation156_spill] sm:$0xff]  ;;  %v11151_v48 = vld [vmem:[#allocation157_spill] sm:$0xff] }
0x158f   : > { %v3239_v63 = vadd.f32 %v3238_v36, %v3088_v34  ;;  %v3322_v12 = vadd.f32 %v3321_v37, %v3096_v0  ;;  %v7258_v26 = vpack.c.bf16 %v11151_v48, %v11150_v51  ;;  %v11153_v36 = vld [vmem:[#allocation189_spill] sm:$0xff]  ;;  %v11156_v51 = vld [vmem:[#allocation172_spill] sm:$0xff] }
0x1590   : > { %v3834_v2 = vmax.f32 %v3237_v55, 0.0  ;;  %v3836_v17 = vmax.f32 %v3320_v60, 0.0  ;;  %v7290_v37 = vpack.c.bf16 %v11153_v36, %v11152_v13  ;;  %v11154_v60 = vld [vmem:[#allocation140_spill] sm:$0xff]  ;;  %v11157_v48 = vld [vmem:[#allocation173_spill] sm:$0xff]  ;;  %v11160_v36 = vld [vmem:[#allocation190_spill] sm:$0xff] }
0x1591   : > { %v3835_v39 = vmax.f32 %v3239_v63, 0.0  ;;  %v3837_v33 = vmax.f32 %v3322_v12, 0.0  ;;  %v7260_v35 = vpack.c.bf16 %v11155_v38, %v11154_v60  ;;  %v7292_v13 = vpack.c.bf16 %v11157_v48, %v11156_v51 }
0x1593   : > { %3952 = vmatprep.mubr.f32.mxu0 %v3835_v39  ;;  %4032 = vmatprep.mubr.f32.mxu1 %v3837_v33 }
0x1594   : > { %3953 = vmatmul.mubr.f32.vlgmr.msra.gmra.mrb[24].mxu0 %v3834_v2  ;;  %4033 = vmatmul.mubr.f32.vlgmr.msra.gmra.mrb[24].mxu1 %v3836_v17  ;;  %v11158_v17 = vld [vmem:[#allocation158_spill] sm:$0xff] }
0x1595   : > { %7257 = vmatpush3.bf16.msra.mxu0 %v7256_v49  ;;  %7289 = vmatpush3.bf16.msra.mxu1 %v7288_v3  ;;  %v11159_v49 = vld [vmem:[#allocation159_spill] sm:$0xff] }
0x1596   : > { %7259 = vmatprep.subr.bf16.mxu0 %v7258_v26  ;;  %7291 = vmatprep.subr.bf16.mxu1 %v7290_v37  ;;  %v7262_v3 = vpack.c.bf16 %v11159_v49, %v11158_v17  ;;  %v11170_v17 = vld [vmem:[#allocation193_spill] sm:$0xff] }
0x1599   : > { %7261 = vmatpush3.bf16.msra.mxu0 %v7260_v35  ;;  %7293 = vmatpush3.bf16.msra.mxu1 %v7292_v13  ;;  %v11169_v13 = vld [vmem:[#allocation192_spill] sm:$0xff] }
0x159a   : > { %7263 = vmatprep.subr.bf16.mxu0 %v7262_v3  ;;  %v7298_v49 = vpack.c.bf16 %v11170_v17, %v11169_v13  ;;  %v11180_v13 = vld [vmem:[#allocation147_spill] sm:$0xff] }
0x161f   : > { %v3242_v7 = vpop.f32.mrb[2].mxu0  ;;  %v3325_v15 = vpop.f32.mrb[2].mxu1 }
0x1620   : > { %v3243_v61 = vadd.f32 %v3242_v7, %v3084_v1  ;;  %v3326_v46 = vadd.f32 %v3325_v15, %v3092_v4  ;;  %v3244_v16 = vpop.f32.mrb[3].mxu0  ;;  %v3327_v63 = vpop.f32.mrb[3].mxu1  ;;  %v9792_v15 = vrot.slane %v11145_v52, %v10664_v19 }
0x1621   : > { %v3245_v12 = vadd.f32 %v3244_v16, %v3088_v34  ;;  %v3328_v62 = vadd.f32 %v3327_v63, %v3096_v0  ;;  %v11161_v16 = vld [vmem:[#allocation191_spill] sm:$0xff] }
0x1622   : > { %v7294_v63 = vpack.c.bf16 %v11161_v16, %v11160_v36  ;;  %v3850_v60 = vmax.f32 %v3243_v61, 0.0  ;;  %v3852_v38 = vmax.f32 %v3326_v46, 0.0 }
0x1623   : > { %v3851_v7 = vmax.f32 %v3245_v12, 0.0  ;;  %v3853_v39 = vmax.f32 %v3328_v62, 0.0  ;;  %v3248_v33 = vpop.f32.mrb[4].mxu0  ;;  %v3331_v2 = vpop.f32.mrb[4].mxu1  ;;  %v11162_v12 = vsub.s32 7, %v9564_v18 }
0x1624   : > { %v3249_v51 = vadd.f32 %v3248_v33, %v3084_v1  ;;  %v3332_v48 = vadd.f32 %v3331_v2, %v3092_v4  ;;  %v3250_v55 = vpop.f32.mrb[5].mxu0  ;;  %v3333_v29 = vpop.f32.mrb[5].mxu1  ;;  %v11163_v1 = vld [vmem:[#allocation142_spill] sm:$0xff]  ;;  %v11164_v4 = vld [vmem:[#allocation143_spill] sm:$0xff]  ;;  %7295 = vmatprep.subr.bf16.mxu1 %v7294_v63 }
0x1625   : > { %v3251_v19 = vadd.f32 %v3250_v55, %v3088_v34  ;;  %v3334_v44 = vadd.f32 %v3333_v29, %v3096_v0  ;;  %3957 = vmatprep.mubr.f32.mxu0 %v3851_v7  ;;  %4037 = vmatprep.mubr.f32.mxu1 %v3853_v39  ;;  %v9801_v26 = vrot.slane %v11145_v52, %v11162_v12  ;;  %v11165_v34 = vld [vmem:[#allocation174_spill] sm:$0xff]  ;;  %v11166_v0 = vld [vmem:[#allocation175_spill] sm:$0xff] }
0x1626   : > { %3958 = vmatmul.mubr.f32.gmra.mrb[26].mxu0 %v3850_v60  ;;  %4038 = vmatmul.mubr.f32.gmra.mrb[26].mxu1 %v3852_v38  ;;  %v7264_v29 = vpack.c.bf16 %v11164_v4, %v11163_v1  ;;  %v7296_v55 = vpack.c.bf16 %v11166_v0, %v11165_v34  ;;  %v3866_v7 = vmax.f32 %v3249_v51, 0.0  ;;  %v3868_v39 = vmax.f32 %v3332_v48, 0.0  ;;  %v11171_v51 = vld [vmem:[#allocation144_spill] sm:$0xff]  ;;  %v11172_v48 = vld [vmem:[#allocation145_spill] sm:$0xff] }
0x1627   : > { %v3867_v37 = vmax.f32 %v3251_v19, 0.0  ;;  %v3869_v62 = vmax.f32 %v3334_v44, 0.0  ;;  %v9803_v46 = vpop.f32.mrb[6].mxu0  ;;  %v9805_v61 = vpop.f32.mrb[6].mxu1  ;;  %v11167_v19 = vld [vmem:[#allocation160_spill] sm:$0xff]  ;;  %v11168_v44 = vld [vmem:[#allocation161_spill] sm:$0xff]  ;;  %v7268_v12 = vpack.c.bf16 %v11172_v48, %v11171_v51 }
0x1628   : > { %v3404_v33 = vpop.f32.mrb[7].mxu0  ;;  %v3487_v2 = vpop.f32.mrb[7].mxu1  ;;  %v7266_v35 = vpack.c.bf16 %v11168_v44, %v11167_v19  ;;  %7265 = vmatpush3.bf16.msra.mxu0 %v7264_v29  ;;  %7297 = vmatpush3.bf16.msra.mxu1 %v7296_v55  ;;  %v11173_v1 = vld [vmem:[#allocation176_spill] sm:$0xff]  ;;  %v11174_v4 = vld [vmem:[#allocation177_spill] sm:$0xff]  ;;  %v11177_v55 = vld [vmem:[#allocation194_spill] sm:$0xff] }
0x1629   : > { %v3405_v36 = vadd.f32 %v3404_v33, %v9792_v15  ;;  %v3488_v16 = vadd.f32 %v3487_v2, %v9801_v26  ;;  %3962 = vmatprep.mubr.f32.mxu0 %v3867_v37  ;;  %4042 = vmatprep.mubr.f32.mxu1 %v3869_v62  ;;  %v7300_v34 = vpack.c.bf16 %v11174_v4, %v11173_v1  ;;  %v11175_v62 = vld [vmem:[#allocation162_spill] sm:$0xff]  ;;  %v11186_v1 = vld [vmem:[#allocation165_spill] sm:$0xff] }
0x162a   : > { %3963 = vmatmul.mubr.f32.gmra.mrb[28].mxu0 %v3866_v7  ;;  %4043 = vmatmul.mubr.f32.gmra.mrb[28].mxu1 %v3868_v39  ;;  %v11176_v7 = vld [vmem:[#allocation163_spill] sm:$0xff]  ;;  %v11179_v44 = vld [vmem:[#allocation146_spill] sm:$0xff] }
0x162b   : > { %v3839_v60 = vmax.f32 %v3405_v36, 0.0  ;;  %v3841_v38 = vmax.f32 %v3488_v16, 0.0  ;;  %v9817_v3 = vpop.f32.mrb[8].mxu0  ;;  %v9819_v63 = vpop.f32.mrb[8].mxu1  ;;  %7267 = vmatprep.subr.bf16.mxu0 %v7266_v35  ;;  %7299 = vmatprep.subr.bf16.mxu1 %v7298_v49  ;;  %v7270_v29 = vpack.c.bf16 %v11176_v7, %v11175_v62  ;;  %v11178_v39 = vld [vmem:[#allocation195_spill] sm:$0xff]  ;;  %v7272_v17 = vpack.c.bf16 %v11180_v13, %v11179_v44  ;;  %v11181_v36 = vld [vmem:[#allocation178_spill] sm:$0xff] }
0x162c   : > { %v9825_v0 = vpop.f32.mrb[9].mxu0  ;;  %v9827_v37 = vpop.f32.mrb[9].mxu1  ;;  %v7302_v33 = vpack.c.bf16 %v11178_v39, %v11177_v55  ;;  %7269 = vmatpush3.bf16.msra.mxu0 %v7268_v12  ;;  %7301 = vmatpush3.bf16.msra.mxu1 %v7300_v34  ;;  %v11182_v35 = vld [vmem:[#allocation179_spill] sm:$0xff]  ;;  %v11185_v12 = vld [vmem:[#allocation164_spill] sm:$0xff]  ;;  %v11188_v62 = vld [vmem:[#allocation197_spill] sm:$0xff]  ;;  %v3099_v55 = vsub.s32 4, %v9564_v18 }
0x162d   : > { %4112 = vmatprep.mubr.f32.mxu0 %v3839_v60  ;;  %4192 = vmatprep.mubr.f32.mxu1 %v3841_v38  ;;  %v7304_v49 = vpack.c.bf16 %v11182_v35, %v11181_v36  ;;  %v11183_v60 = vsub.s32 2, %v9564_v18  ;;  %v11184_v38 = vld [vmem:[#allocation73_spill] sm:$0xff]  ;;  %v7274_v4 = vpack.c.bf16 %v11186_v1, %v11185_v12  ;;  %v11187_v34 = vld [vmem:[#allocation196_spill] sm:$0xff]  ;;  %v3107_v39 = vsub.s32 6, %v9564_v18 }
0x162e   : > { %7271 = vmatprep.subr.bf16.mxu0 %v7270_v29  ;;  %7303 = vmatprep.subr.bf16.mxu1 %v7302_v33  ;;  %v7306_v7 = vpack.c.bf16 %v11188_v62, %v11187_v34  ;;  %v11189_v33 = vld [vmem:[#allocation148_spill] sm:$0xff]  ;;  %v11190_v13 = vld [vmem:[#allocation149_spill] sm:$0xff]  ;;  %v11193_v34 = vld [vmem:[#allocation166_spill] sm:$0xff]  ;;  %v9871_v31 = vrot.slane %v11145_v52, %v3099_v55 }
0x162f   : > { %v9833_v2 = vpop.f32.mrb[10].mxu0  ;;  %v9835_v19 = vpop.f32.mrb[10].mxu1  ;;  %v3124_v48 = vrot.slane %v11184_v38, %v11183_v60  ;;  %v7276_v36 = vpack.c.bf16 %v11190_v13, %v11189_v33  ;;  %v11191_v35 = vld [vmem:[#allocation180_spill] sm:$0xff]  ;;  %v11192_v60 = vld [vmem:[#allocation181_spill] sm:$0xff]  ;;  %v11195_v62 = vld [vmem:[#allocation198_spill] sm:$0xff]  ;;  %v9874_v33 = vrot.slane %v11145_v52, %v3107_v39  ;;  %v9910_v28 = vrot.slane %v11184_v38, %v3107_v39 }
0x1630   : > { %v9841_v16 = vpop.f32.mrb[11].mxu0  ;;  %v9843_v51 = vpop.f32.mrb[11].mxu1  ;;  %7273 = vmatpush3.bf16.msra.mxu0 %v7272_v17  ;;  %7305 = vmatpush3.bf16.msra.mxu1 %v7304_v49  ;;  %v7308_v27 = vpack.c.bf16 %v11192_v60, %v11191_v35  ;;  %v11194_v17 = vld [vmem:[#allocation167_spill] sm:$0xff]  ;;  %v7310_v47 = vpack.c.bf16 %v11196_v20, %v11195_v62  ;;  %v11197_v35 = vld [vmem:[#allocation150_spill] sm:$0xff]  ;;  %v11201_v52 = vld [vmem:[#allocation168_spill] sm:$0xff] }
0x1631   : > { %7275 = vmatprep.subr.bf16.mxu0 %v7274_v4  ;;  %7307 = vmatprep.subr.bf16.mxu1 %v7306_v7  ;;  %v7278_v49 = vpack.c.bf16 %v11194_v17, %v11193_v34  ;;  %v11198_v4 = vld [vmem:[#allocation151_spill] sm:$0xff]  ;;  %v11199_v60 = vld [vmem:[#allocation182_spill] sm:$0xff]  ;;  %v3486_v10 = vadd.f32 %v9805_v61, %v9874_v33 }
0x1632   : > { %v7280_v7 = vpack.c.bf16 %v11198_v4, %v11197_v35  ;;  %v7312_v34 = vpack.c.bf16 %v11200_v45, %v11199_v60  ;;  %v9895_v35 = vrot.slane %v11184_v38, %v11205_v8  ;;  %v11206_v45 = vsub.s32 3, %v9564_v18  ;;  %v11207_v4 = vld [vmem:[#allocation152_spill] sm:$0xff]  ;;  %v11208_v60 = vld [vmem:[#allocation153_spill] sm:$0xff]  ;;  %v11214_v61 = vld [vmem:[#allocation251_spill] sm:$0xff] }
0x1633   : > { %v9854_v44 = vpop.f32.mrb[12].mxu0  ;;  %v3651_v29 = vpop.f32.mrb[12].mxu1  ;;  %v3403_v8 = vadd.f32 %v9803_v46, %v9871_v31  ;;  %v11213_v46 = vld [vmem:[#allocation250_spill] sm:$0xff] }
0x1634   : > { %v9860_v21 = vadd.f32 %v3651_v29, %v3124_v48  ;;  %v9862_v12 = vpop.f32.mrb[13].mxu0  ;;  %v9864_v1 = vpop.f32.mrb[13].mxu1  ;;  %7277 = vmatpush3.bf16.msra.mxu0 %v7276_v36  ;;  %7309 = vmatpush3.bf16.msra.mxu1 %v7308_v27  ;;  %v11202_v36 = vld [vmem:[#allocation169_spill] sm:$0xff] }
0x1635   : > { %7279 = vmatprep.subr.bf16.mxu0 %v7278_v49  ;;  %7311 = vmatprep.subr.bf16.mxu1 %v7310_v47  ;;  %v7282_v27 = vpack.c.bf16 %v11202_v36, %v11201_v52  ;;  %v7284_v49 = vpack.c.bf16 %v11208_v60, %v11207_v4  ;;  %v11209_v47 = vld [vmem:[#allocation184_spill] sm:$0xff]  ;;  %v9907_v52 = vrot.slane %v11184_v38, %v3099_v55  ;;  %v11211_v4 = vld [vmem:[#allocation218_spill] sm:$0xff]  ;;  %v11212_v60 = vld [vmem:[#allocation219_spill] sm:$0xff]  ;;  %v3838_v41 = vmax.f32 %v3403_v8, 0.0 }
0x1636   : > { %v7316_v11 = vpack.c.bf16 %v11210_v56, %v11209_v47  ;;  %v7318_v56 = vpack.c.bf16 %v11212_v60, %v11211_v4  ;;  %v3411_v55 = vadd.f32 %v9825_v0, %v9792_v15  ;;  %v9935_v4 = vrot.slane %v11184_v38, %v11215_v9  ;;  %v11218_v60 = vld [vmem:[#allocation203_spill] sm:$0xff]  ;;  %v11226_v9 = vld [vmem:[#allocation205_spill] sm:$0xff] }
0x1637   : > { %v9876_v29 = vpop.f32.mrb[14].mxu0  ;;  %v3657_v13 = vpop.f32.mrb[14].mxu1  ;;  %v11216_v0 = vsub.s32 7, %v9564_v18  ;;  %v7324_v25 = vpack.c.bf16 %v11226_v9, %v11225_v43  ;;  %v3840_v18 = vmax.f32 %v3486_v10, 0.0 }
0x1638   : > { %v9882_v17 = vadd.f32 %v3657_v13, %v3124_v48  ;;  %v9884_v20 = vpop.f32.mrb[15].mxu0  ;;  %v9886_v62 = vpop.f32.mrb[15].mxu1  ;;  %v9900_v13 = vrot.slane %v11184_v38, %v11206_v45  ;;  %7281 = vmatpush3.bf16.msra.mxu0 %v7280_v7  ;;  %7313 = vmatpush3.bf16.msra.mxu1 %v7312_v34  ;;  %v7350_v7 = vpack.c.bf16 %v11214_v61, %v11213_v46  ;;  %v11221_v46 = vld [vmem:[#allocation220_spill] sm:$0xff]  ;;  %v11222_v61 = vld [vmem:[#allocation221_spill] sm:$0xff] }
0x1639   : > { %7283 = vmatprep.subr.bf16.mxu0 %v7282_v27  ;;  %7315 = vmatprep.subr.bf16.mxu1 %v7314_v58  ;;  %v3494_v34 = vadd.f32 %v9827_v37, %v9801_v26  ;;  %v11219_v58 = vld [vmem:[#allocation234_spill] sm:$0xff]  ;;  %v7322_v24 = vpack.c.bf16 %v11222_v61, %v11221_v46  ;;  %v11223_v37 = vld [vmem:[#allocation252_spill] sm:$0xff]  ;;  %v3417_v46 = vadd.f32 %v9841_v16, %v9792_v15  ;;  %v11228_v16 = vld [vmem:[#allocation237_spill] sm:$0xff] }
0x163a   : > { %v7352_v42 = vpack.c.bf16 %v11220_v57, %v11219_v58  ;;  %v7354_v22 = vpack.c.bf16 %v11224_v40, %v11223_v37  ;;  %v3855_v58 = vmax.f32 %v3411_v55, 0.0  ;;  %v11227_v15 = vld [vmem:[#allocation236_spill] sm:$0xff]  ;;  %v11229_v61 = vld [vmem:[#allocation222_spill] sm:$0xff]  ;;  %v11230_v37 = vld [vmem:[#allocation223_spill] sm:$0xff] }
0x163b   : > { %v9916_v36 = vpop.f32.mrb[16].mxu0  ;;  %v3663_v45 = vpop.f32.mrb[16].mxu1  ;;  %v7356_v55 = vpack.c.bf16 %v11228_v16, %v11227_v15  ;;  %v7326_v9 = vpack.c.bf16 %v11230_v37, %v11229_v61  ;;  %v11236_v16 = vld [vmem:[#allocation239_spill] sm:$0xff]  ;;  %v11237_v61 = vld [vmem:[#allocation224_spill] sm:$0xff]  ;;  %v11238_v37 = vld [vmem:[#allocation225_spill] sm:$0xff] }
0x163c   : > { %v9922_v47 = vadd.f32 %v3663_v45, %v3124_v48  ;;  %v9924_v39 = vpop.f32.mrb[17].mxu0  ;;  %v9926_v59 = vpop.f32.mrb[17].mxu1  ;;  %v9940_v48 = vrot.slane %v11184_v38, %v11216_v0  ;;  %v11217_v45 = vld [vmem:[#allocation202_spill] sm:$0xff]  ;;  %v3409_v0 = vadd.f32 %v9817_v3, %v9871_v31  ;;  %7285 = vmatpush3.bf16.msra.mxu0 %v7284_v49  ;;  %7317 = vmatpush3.bf16.msra.mxu1 %v7316_v11  ;;  %v3857_v3 = vmax.f32 %v3494_v34, 0.0 }
0x163d   : > { %v7320_v27 = vpack.c.bf16 %v11218_v60, %v11217_v45  ;;  %v3492_v45 = vadd.f32 %v9819_v63, %v9874_v33  ;;  %7319 = vmatprep.subr.bf16.mxu0 %v7318_v56  ;;  %7351 = vmatprep.subr.bf16.mxu1 %v7350_v7  ;;  %v3500_v11 = vadd.f32 %v9843_v51, %v9801_v26  ;;  %v11231_v56 = vld [vmem:[#allocation254_spill] sm:$0xff]  ;;  %v11232_v7 = vld [vmem:[#allocation255_spill] sm:$0xff] }
0x163e   : > { %v7358_v34 = vpack.c.bf16 %v11232_v7, %v11231_v56  ;;  %v3415_v26 = vadd.f32 %v9833_v2, %v9871_v31  ;;  %v3498_v51 = vadd.f32 %v9835_v19, %v9874_v33  ;;  %v3654_v19 = vadd.f32 %v9864_v1, %v9900_v13  ;;  %v11239_v7 = vld [vmem:[#allocation256_spill] sm:$0xff] }
0x163f   : > { %v3734_v57 = vpop.f32.mrb[18].mxu0  ;;  %v3817_v60 = vpop.f32.mrb[18].mxu1  ;;  %4113 = vmatmul.mubr.f32.vlgmr.msra.gmra.mrb[30].mxu0 %v3838_v41  ;;  %4193 = vmatmul.mubr.f32.vlgmr.msra.gmra.mrb[30].mxu1 %v3840_v18  ;;  %v7330_v56 = vpack.c.bf16 %v11238_v37, %v11237_v61  ;;  %v11253_v61 = vld [vmem:[#allocation228_spill] sm:$0xff]  ;;  %v11254_v37 = vld [vmem:[#allocation229_spill] sm:$0xff] }
0x1640   : > { %v9959_v40 = vadd.f32 %v3734_v57, %v9907_v52  ;;  %v9962_v43 = vadd.f32 %v3817_v60, %v9910_v28  ;;  %v3736_v8 = vpop.f32.mrb[19].mxu0  ;;  %v3819_v10 = vpop.f32.mrb[19].mxu1  ;;  %v3854_v57 = vmax.f32 %v3409_v0, 0.0  ;;  %v3856_v60 = vmax.f32 %v3492_v45, 0.0  ;;  %4117 = vmatprep.mubr.f32.mxu0 %v3855_v58  ;;  %4197 = vmatprep.mubr.f32.mxu1 %v3857_v3 }
0x1641   : > { %v9967_v63 = vadd.f32 %v3736_v8, %v9935_v4  ;;  %v9970_v49 = vadd.f32 %v3819_v10, %v9940_v48  ;;  %v3871_v8 = vmax.f32 %v3417_v46, 0.0  ;;  %v3571_v10 = vadd.f32 %v9862_v12, %v9895_v35  ;;  %7321 = vmatpush3.bf16.msra.mxu0 %v7320_v27  ;;  %7353 = vmatpush3.bf16.msra.mxu1 %v7352_v42  ;;  %v11233_v42 = vld [vmem:[#allocation206_spill] sm:$0xff]  ;;  %v11234_v12 = vld [vmem:[#allocation207_spill] sm:$0xff] }
0x1642   : > { %v3873_v45 = vmax.f32 %v3500_v11, 0.0  ;;  %7323 = vmatprep.subr.bf16.mxu0 %v7322_v24  ;;  %7355 = vmatprep.subr.bf16.mxu1 %v7354_v22  ;;  %v7328_v27 = vpack.c.bf16 %v11234_v12, %v11233_v42  ;;  %v11235_v11 = vld [vmem:[#allocation238_spill] sm:$0xff]  ;;  %v3870_v24 = vmax.f32 %v3415_v26, 0.0  ;;  %v3872_v22 = vmax.f32 %v3498_v51, 0.0  ;;  %v11244_v26 = vld [vmem:[#allocation241_spill] sm:$0xff] }
0x1643   : > { %v3740_v41 = vpop.f32.mrb[20].mxu0  ;;  %v3823_v18 = vpop.f32.mrb[20].mxu1  ;;  %4118 = vmatmul.mubr.f32.gmra.mrb[32].mxu0 %v3854_v57  ;;  %4198 = vmatmul.mubr.f32.gmra.mrb[32].mxu1 %v3856_v60  ;;  %v7360_v1 = vpack.c.bf16 %v11236_v16, %v11235_v11  ;;  %v11251_v11 = vld [vmem:[#allocation242_spill] sm:$0xff]  ;;  %v11252_v16 = vld [vmem:[#allocation243_spill] sm:$0xff] }
0x1644   : > { %v9985_v15 = vadd.f32 %v3740_v41, %v9907_v52  ;;  %v9988_v0 = vadd.f32 %v3823_v18, %v9910_v28  ;;  %v3742_v31 = vpop.f32.mrb[21].mxu0  ;;  %v3825_v2 = vpop.f32.mrb[21].mxu1  ;;  %4122 = vmatprep.mubr.f32.mxu0 %v3871_v8  ;;  %4202 = vmatprep.mubr.f32.mxu1 %v3873_v45  ;;  %v11240_v41 = vld [vmem:[#allocation257_spill] sm:$0xff]  ;;  %v3845_v45 = vmax.f32 %v3654_v19, 0.0  ;;  %v11247_v19 = vld [vmem:[#allocation258_spill] sm:$0xff] }
0x1645   : > { %v9993_v33 = vadd.f32 %v3742_v31, %v9935_v4  ;;  %v9996_v58 = vadd.f32 %v3825_v2, %v9940_v48  ;;  %v7362_v18 = vpack.c.bf16 %v11240_v41, %v11239_v7  ;;  %7325 = vmatpush3.bf16.msra.mxu0 %v7324_v25  ;;  %7357 = vmatpush3.bf16.msra.mxu1 %v7356_v55  ;;  %v3843_v2 = vmax.f32 %v3571_v10, 0.0  ;;  %v11241_v25 = vld [vmem:[#allocation208_spill] sm:$0xff]  ;;  %v11246_v10 = vld [vmem:[#allocation227_spill] sm:$0xff]  ;;  %v11256_v41 = vld [vmem:[#allocation261_spill] sm:$0xff] }
0x1646   : > { %7327 = vmatprep.subr.bf16.mxu0 %v7326_v9  ;;  %7359 = vmatprep.subr.bf16.mxu1 %v7358_v34  ;;  %v11243_v55 = vld [vmem:[#allocation240_spill] sm:$0xff]  ;;  %v11248_v9 = vld [vmem:[#allocation259_spill] sm:$0xff] }
0x1647   : > { %v3746_v46 = vpop.f32.mrb[22].mxu0  ;;  %v3829_v3 = vpop.f32.mrb[22].mxu1  ;;  %4123 = vmatmul.mubr.f32.gmra.mrb[34].mxu0 %v3870_v24  ;;  %4203 = vmatmul.mubr.f32.gmra.mrb[34].mxu1 %v3872_v22  ;;  %v7364_v51 = vpack.c.bf16 %v11244_v26, %v11243_v55  ;;  %v7366_v34 = vpack.c.bf16 %v11248_v9, %v11247_v19  ;;  %v11255_v7 = vld [vmem:[#allocation260_spill] sm:$0xff]  ;;  %v11258_v22 = vld [vmem:[#allocation213_spill] sm:$0xff]  ;;  %v11263_v55 = vld [vmem:[#allocation262_spill] sm:$0xff] }
0x1648   : > { %v10007_v57 = vadd.f32 %v3746_v46, %v9907_v52  ;;  %v10010_v60 = vadd.f32 %v3829_v3, %v9910_v28  ;;  %v3748_v8 = vpop.f32.mrb[23].mxu0  ;;  %v3831_v31 = vpop.f32.mrb[23].mxu1  ;;  %4272 = vmatprep.mubr.f32.mxu0 %v3843_v2  ;;  %4352 = vmatprep.mubr.f32.mxu1 %v3845_v45  ;;  %v11242_v52 = vld [vmem:[#allocation209_spill] sm:$0xff]  ;;  %v11249_v46 = vld [vmem:[#allocation210_spill] sm:$0xff]  ;;  %v11250_v3 = vld [vmem:[#allocation211_spill] sm:$0xff] }
0x1649   : > { %v10013_v42 = vadd.f32 %v3748_v8, %v9935_v4  ;;  %v10016_v12 = vadd.f32 %v3831_v31, %v9940_v48  ;;  %7329 = vmatpush3.bf16.msra.mxu0 %v7328_v27  ;;  %7361 = vmatpush3.bf16.msra.mxu1 %v7360_v1  ;;  %v7332_v28 = vpack.c.bf16 %v11242_v52, %v11241_v25  ;;  %v11245_v4 = vld [vmem:[#allocation226_spill] sm:$0xff]  ;;  %v11257_v24 = vld [vmem:[#allocation212_spill] sm:$0xff]  ;;  %v11260_v2 = vld [vmem:[#allocation245_spill] sm:$0xff] }
0x164a   : > { %7331 = vmatprep.subr.bf16.mxu0 %v7330_v56  ;;  %7363 = vmatprep.subr.bf16.mxu1 %v7362_v18  ;;  %v7334_v48 = vpack.c.bf16 %v11246_v10, %v11245_v4  ;;  %v7336_v27 = vpack.c.bf16 %v11250_v3, %v11249_v46  ;;  %v7368_v1 = vpack.c.bf16 %v11252_v16, %v11251_v11  ;;  %v11259_v31 = vld [vmem:[#allocation244_spill] sm:$0xff]  ;;  %v11261_v25 = vld [vmem:[#allocation230_spill] sm:$0xff]  ;;  %v11262_v52 = vld [vmem:[#allocation231_spill] sm:$0xff] }
0x164b   : > { %v7338_v56 = vpack.c.bf16 %v11254_v37, %v11253_v61  ;;  %v7370_v18 = vpack.c.bf16 %v11256_v41, %v11255_v7  ;;  %v7340_v8 = vpack.c.bf16 %v11258_v22, %v11257_v24  ;;  %v7372_v45 = vpack.c.bf16 %v11260_v2, %v11259_v31  ;;  %v11264_v26 = vld [vmem:[#allocation263_spill] sm:$0xff]  ;;  %v11265_v4 = vld [vmem:[#allocation214_spill] sm:$0xff]  ;;  %v11269_v3 = vld [vmem:[#allocation232_spill] sm:$0xff] }
0x164c   : > { %v11266_v10 = vld [vmem:[#allocation215_spill] sm:$0xff]  ;;  %v11267_v19 = vld [vmem:[#allocation246_spill] sm:$0xff]  ;;  %v3116_v46 = vrot.slane %v11184_v38, %v9567_v50  ;;  %v11271_v16 = vld [vmem:[#allocation264_spill] sm:$0xff] }
0x164d   : > { %7333 = vmatpush3.bf16.msra.mxu0 %v7332_v28  ;;  %7365 = vmatpush3.bf16.msra.mxu1 %v7364_v51  ;;  %v7342_v28 = vpack.c.bf16 %v11262_v52, %v11261_v25  ;;  %v7374_v51 = vpack.c.bf16 %v11264_v26, %v11263_v55  ;;  %v11268_v9 = vld [vmem:[#allocation247_spill] sm:$0xff]  ;;  %v11273_v37 = vld [vmem:[#allocation216_spill] sm:$0xff]  ;;  %v11277_v38 = vld [vmem:[#allocation282_spill] sm:$0xff]  ;;  %v3577_v52 = vadd.f32 %v9884_v20, %v9895_v35 }
0x164e   : > { %7335 = vmatprep.subr.bf16.mxu0 %v7334_v48  ;;  %7367 = vmatprep.subr.bf16.mxu1 %v7366_v34  ;;  %v7344_v48 = vpack.c.bf16 %v11266_v10, %v11265_v4  ;;  %v7376_v34 = vpack.c.bf16 %v11268_v9, %v11267_v19  ;;  %v11275_v41 = vld [vmem:[#allocation248_spill] sm:$0xff]  ;;  %v3569_v22 = vadd.f32 %v9854_v44, %v3116_v46  ;;  %v11279_v2 = vld [vmem:[#allocation314_spill] sm:$0xff]  ;;  %v11282_v26 = vld [vmem:[#allocation267_spill] sm:$0xff] }
0x164f   : > { %v11281_v55 = vld [vmem:[#allocation266_spill] sm:$0xff]  ;;  %v11284_v4 = vld [vmem:[#allocation299_spill] sm:$0xff]  ;;  %v11286_v19 = vld [vmem:[#allocation285_spill] sm:$0xff] }
0x1650   : > { %v11283_v44 = vld [vmem:[#allocation298_spill] sm:$0xff]  ;;  %v11287_v20 = vld [vmem:[#allocation316_spill] sm:$0xff] }
0x1651   : > { %7337 = vmatpush3.bf16.msra.mxu0 %v7336_v27  ;;  %7369 = vmatpush3.bf16.msra.mxu1 %v7368_v1  ;;  %v11270_v27 = vld [vmem:[#allocation233_spill] sm:$0xff]  ;;  %v7416_v10 = vpack.c.bf16 %v11284_v4, %v11283_v44  ;;  %v3849_v44 = vmax.f32 %v9970_v49, 0.0  ;;  %v11301_v4 = vld [vmem:[#allocation288_spill] sm:$0xff] }
0x1652   : > { %7339 = vmatprep.subr.bf16.mxu0 %v7338_v56  ;;  %7371 = vmatprep.subr.bf16.mxu1 %v7370_v18  ;;  %v7346_v11 = vpack.c.bf16 %v11270_v27, %v11269_v3  ;;  %v11272_v1 = vld [vmem:[#allocation265_spill] sm:$0xff]  ;;  %v3844_v3 = vmax.f32 %v9860_v21, 0.0  ;;  %v3575_v27 = vadd.f32 %v9876_v29, %v3116_v46  ;;  %v11289_v21 = vld [vmem:[#allocation268_spill] sm:$0xff] }
0x1653   : > { %v7378_v61 = vpack.c.bf16 %v11272_v1, %v11271_v16  ;;  %v11274_v56 = vld [vmem:[#allocation217_spill] sm:$0xff]  ;;  %v3859_v16 = vmax.f32 %v3577_v52, 0.0 }
0x1654   : > { %v7348_v7 = vpack.c.bf16 %v11274_v56, %v11273_v37  ;;  %v11276_v18 = vld [vmem:[#allocation249_spill] sm:$0xff]  ;;  %v3666_v37 = vadd.f32 %v9926_v59, %v9900_v13  ;;  %v11293_v59 = vld [vmem:[#allocation286_spill] sm:$0xff] }
0x1655   : > { %7341 = vmatpush3.bf16.msra.mxu0 %v7340_v8  ;;  %7373 = vmatpush3.bf16.msra.mxu1 %v7372_v45  ;;  %v7380_v24 = vpack.c.bf16 %v11276_v18, %v11275_v41  ;;  %v11278_v8 = vld [vmem:[#allocation283_spill] sm:$0xff]  ;;  %v11290_v56 = vld [vmem:[#allocation269_spill] sm:$0xff]  ;;  %v3860_v41 = vmax.f32 %v9882_v17, 0.0  ;;  %v3581_v18 = vadd.f32 %v9916_v36, %v3116_v46  ;;  %v3876_v36 = vmax.f32 %v9922_v47, 0.0  ;;  %v11297_v46 = vld [vmem:[#allocation270_spill] sm:$0xff] }
0x1656   : > { %7343 = vmatprep.subr.bf16.mxu0 %v7342_v28  ;;  %7375 = vmatprep.subr.bf16.mxu1 %v7374_v51  ;;  %v7382_v31 = vpack.c.bf16 %v11278_v8, %v11277_v38  ;;  %v11280_v45 = vld [vmem:[#allocation315_spill] sm:$0xff]  ;;  %v3660_v28 = vadd.f32 %v9886_v62, %v9900_v13  ;;  %v7384_v51 = vpack.c.bf16 %v11282_v26, %v11281_v55  ;;  %v11288_v62 = vld [vmem:[#allocation317_spill] sm:$0xff]  ;;  %v3877_v38 = vmax.f32 %v3666_v37, 0.0 }
0x1657   : > { %v7414_v25 = vpack.c.bf16 %v11280_v45, %v11279_v2  ;;  %v7388_v29 = vpack.c.bf16 %v11290_v56, %v11289_v21  ;;  %v11294_v13 = vld [vmem:[#allocation287_spill] sm:$0xff]  ;;  %v3874_v17 = vmax.f32 %v3581_v18, 0.0  ;;  %v11313_v21 = vld [vmem:[#allocation274_spill] sm:$0xff] }
0x1658   : > { %v3861_v1 = vmax.f32 %v3660_v28, 0.0  ;;  %v7390_v8 = vpack.c.bf16 %v11294_v13, %v11293_v59  ;;  %v11296_v2 = vld [vmem:[#allocation319_spill] sm:$0xff]  ;;  %v11299_v28 = vld [vmem:[#allocation302_spill] sm:$0xff]  ;;  %v11321_v13 = vld [vmem:[#allocation276_spill] sm:$0xff] }
0x1659   : > { %7345 = vmatpush3.bf16.msra.mxu0 %v7344_v48  ;;  %7377 = vmatpush3.bf16.msra.mxu1 %v7376_v34  ;;  %v11285_v48 = vld [vmem:[#allocation284_spill] sm:$0xff]  ;;  %v3842_v34 = vmax.f32 %v3569_v22, 0.0  ;;  %v11292_v22 = vld [vmem:[#allocation301_spill] sm:$0xff]  ;;  %v11300_v55 = vld [vmem:[#allocation303_spill] sm:$0xff] }
0x165a   : > { %7347 = vmatprep.subr.bf16.mxu0 %v7346_v11  ;;  %7379 = vmatprep.subr.bf16.mxu1 %v7378_v61  ;;  %v7386_v9 = vpack.c.bf16 %v11286_v19, %v11285_v48  ;;  %v7418_v11 = vpack.c.bf16 %v11288_v62, %v11287_v20  ;;  %v3583_v61 = vadd.f32 %v9924_v39, %v9895_v35  ;;  %v11303_v19 = vld [vmem:[#allocation320_spill] sm:$0xff]  ;;  %v11308_v20 = vld [vmem:[#allocation305_spill] sm:$0xff]  ;;  %v11309_v62 = vld [vmem:[#allocation290_spill] sm:$0xff] }
0x165b   : > { %v7424_v26 = vpack.c.bf16 %v11300_v55, %v11299_v28  ;;  %v11314_v56 = vld [vmem:[#allocation275_spill] sm:$0xff] }
0x165c   : > { %v3875_v39 = vmax.f32 %v3583_v61, 0.0  ;;  %v11312_v61 = vld [vmem:[#allocation323_spill] sm:$0xff] }
0x165d   : > { %7349 = vmatpush3.bf16.msra.mxu0 %v7348_v7  ;;  %7381 = vmatpush3.bf16.msra.mxu1 %v7380_v24  ;;  %v3858_v7 = vmax.f32 %v3575_v27, 0.0  ;;  %v11291_v24 = vld [vmem:[#allocation300_spill] sm:$0xff]  ;;  %v11328_v28 = vld [vmem:[#allocation327_spill] sm:$0xff] }
0x165e   : > { %7383 = vmatprep.subr.bf16.mxu0 %v7382_v31  ;;  %7415 = vmatprep.subr.bf16.mxu1 %v7414_v25  ;;  %v7420_v35 = vpack.c.bf16 %v11292_v22, %v11291_v24  ;;  %v11295_v31 = vld [vmem:[#allocation318_spill] sm:$0xff]  ;;  %v11298_v25 = vld [vmem:[#allocation271_spill] sm:$0xff]  ;;  %v11317_v24 = vld [vmem:[#allocation292_spill] sm:$0xff] }
0x165f   : > { %v7422_v45 = vpack.c.bf16 %v11296_v2, %v11295_v31  ;;  %v7392_v52 = vpack.c.bf16 %v11298_v25, %v11297_v46  ;;  %v11318_v22 = vld [vmem:[#allocation293_spill] sm:$0xff]  ;;  %v11323_v2 = vld [vmem:[#allocation308_spill] sm:$0xff]  ;;  %v11326_v46 = vld [vmem:[#allocation295_spill] sm:$0xff] }
0x1660   : > { %4273 = vmatmul.mubr.f32.vlgmr.msra.gmra.mrb[36].mxu0 %v3842_v34  ;;  %4353 = vmatmul.mubr.f32.vlgmr.msra.gmra.mrb[36].mxu1 %v3844_v3  ;;  %v11305_v34 = vld [vmem:[#allocation272_spill] sm:$0xff]  ;;  %v11306_v3 = vld [vmem:[#allocation273_spill] sm:$0xff] }
0x1661   : > { %4277 = vmatprep.mubr.f32.mxu0 %v3859_v16  ;;  %4357 = vmatprep.mubr.f32.mxu1 %v3861_v1  ;;  %v7396_v27 = vpack.c.bf16 %v11306_v3, %v11305_v34  ;;  %v11311_v1 = vld [vmem:[#allocation322_spill] sm:$0xff]  ;;  %v11335_v34 = vld [vmem:[#allocation328_spill] sm:$0xff]  ;;  %v11336_v3 = vld [vmem:[#allocation329_spill] sm:$0xff] }
0x1662   : > { %7385 = vmatpush3.bf16.msra.mxu0 %v7384_v51  ;;  %7417 = vmatpush3.bf16.msra.mxu1 %v7416_v10  ;;  %v3847_v51 = vmax.f32 %v9967_v63, 0.0  ;;  %v11302_v10 = vld [vmem:[#allocation289_spill] sm:$0xff]  ;;  %v11307_v63 = vld [vmem:[#allocation304_spill] sm:$0xff]  ;;  %v7430_v37 = vpack.c.bf16 %v11312_v61, %v11311_v1  ;;  %v3846_v1 = vmax.f32 %v9959_v40, 0.0  ;;  %v3848_v61 = vmax.f32 %v9962_v43, 0.0 }
0x1663   : > { %7387 = vmatprep.subr.bf16.mxu0 %v7386_v9  ;;  %7419 = vmatprep.subr.bf16.mxu1 %v7418_v11  ;;  %v7394_v48 = vpack.c.bf16 %v11302_v10, %v11301_v4  ;;  %v11304_v9 = vld [vmem:[#allocation321_spill] sm:$0xff]  ;;  %v7428_v49 = vpack.c.bf16 %v11308_v20, %v11307_v63  ;;  %v11310_v11 = vld [vmem:[#allocation291_spill] sm:$0xff]  ;;  %v11331_v4 = vld [vmem:[#allocation310_spill] sm:$0xff]  ;;  %v3878_v40 = vmax.f32 %v10007_v57, 0.0  ;;  %v3880_v43 = vmax.f32 %v10010_v60, 0.0 }
0x1664   : > { %4278 = vmatmul.mubr.f32.gmra.mrb[38].mxu0 %v3858_v7  ;;  %4358 = vmatmul.mubr.f32.gmra.mrb[38].mxu1 %v3860_v41  ;;  %v7426_v47 = vpack.c.bf16 %v11304_v9, %v11303_v19  ;;  %v7398_v16 = vpack.c.bf16 %v11310_v11, %v11309_v62  ;;  %v11315_v7 = vld [vmem:[#allocation306_spill] sm:$0xff]  ;;  %v11316_v41 = vld [vmem:[#allocation307_spill] sm:$0xff]  ;;  %v11333_v19 = vld [vmem:[#allocation296_spill] sm:$0xff] }
0x1665   : > { %4282 = vmatprep.mubr.f32.mxu0 %v3875_v39  ;;  %4362 = vmatprep.mubr.f32.mxu1 %v3877_v38  ;;  %v7432_v18 = vpack.c.bf16 %v11316_v41, %v11315_v7  ;;  %v11319_v39 = vld [vmem:[#allocation324_spill] sm:$0xff]  ;;  %v11320_v38 = vld [vmem:[#allocation325_spill] sm:$0xff]  ;;  %v11332_v10 = vld [vmem:[#allocation311_spill] sm:$0xff]  ;;  %v3879_v7 = vmax.f32 %v10013_v42, 0.0  ;;  %v3881_v41 = vmax.f32 %v10016_v12, 0.0 }
0x1666   : > { %7389 = vmatpush3.bf16.msra.mxu0 %v7388_v29  ;;  %7421 = vmatpush3.bf16.msra.mxu1 %v7420_v35  ;;  %v7400_v29 = vpack.c.bf16 %v11314_v56, %v11313_v21  ;;  %v7402_v35 = vpack.c.bf16 %v11318_v22, %v11317_v24  ;;  %v7434_v59 = vpack.c.bf16 %v11320_v38, %v11319_v39  ;;  %v11334_v9 = vld [vmem:[#allocation297_spill] sm:$0xff]  ;;  %v11337_v63 = vld [vmem:[#allocation280_spill] sm:$0xff]  ;;  %v3865_v21 = vmax.f32 %v9996_v58, 0.0 }
0x1667   : > { %7391 = vmatprep.subr.bf16.mxu0 %v7390_v8  ;;  %7423 = vmatprep.subr.bf16.mxu1 %v7422_v45  ;;  %v11322_v8 = vld [vmem:[#allocation277_spill] sm:$0xff]  ;;  %v11339_v62 = vld [vmem:[#allocation312_spill] sm:$0xff]  ;;  %v3862_v56 = vmax.f32 %v9985_v15, 0.0  ;;  %v6326_v58 = vpop.f32.mrb[24].mxu1  ;;  %v11341_v15 = vld [vmem:[#allocation330_spill] sm:$0xff] }
0x1668   : > { %4283 = vmatmul.mubr.f32.gmra.mrb[40].mxu0 %v3874_v17  ;;  %4363 = vmatmul.mubr.f32.gmra.mrb[40].mxu1 %v3876_v36  ;;  %v7404_v31 = vpack.c.bf16 %v11322_v8, %v11321_v13  ;;  %v11324_v45 = vld [vmem:[#allocation309_spill] sm:$0xff]  ;;  %v11325_v36 = vld [vmem:[#allocation294_spill] sm:$0xff]  ;;  %v6327_v24 = vpop.f32.mrb[25].mxu1 }
0x1669   : > { %4432 = vmatprep.mubr.f32.mxu0 %v3847_v51  ;;  %4512 = vmatprep.mubr.f32.mxu1 %v3849_v44  ;;  %v7436_v17 = vpack.c.bf16 %v11324_v45, %v11323_v2  ;;  %v7406_v25 = vpack.c.bf16 %v11326_v46, %v11325_v36  ;;  %v11330_v51 = vld [vmem:[#allocation279_spill] sm:$0xff]  ;;  %v11338_v20 = vld [vmem:[#allocation281_spill] sm:$0xff]  ;;  %v6328_v22 = vadd.f32 %v6327_v24, %v6326_v58 }
0x166a   : > { %7393 = vmatpush3.bf16.msra.mxu0 %v7392_v52  ;;  %7425 = vmatpush3.bf16.msra.mxu1 %v7424_v26  ;;  %v11327_v52 = vld [vmem:[#allocation326_spill] sm:$0xff]  ;;  %v11340_v11 = vld [vmem:[#allocation313_spill] sm:$0xff] }
0x166b   : > { %7395 = vmatprep.subr.bf16.mxu0 %v7394_v48  ;;  %7427 = vmatprep.subr.bf16.mxu1 %v7426_v47  ;;  %v7438_v55 = vpack.c.bf16 %v11328_v28, %v11327_v52  ;;  %v11329_v26 = vld [vmem:[#allocation278_spill] sm:$0xff]  ;;  %v7440_v48 = vpack.c.bf16 %v11332_v10, %v11331_v4  ;;  %v7410_v47 = vpack.c.bf16 %v11334_v9, %v11333_v19 }
0x166c   : > { %v7408_v44 = vpack.c.bf16 %v11330_v51, %v11329_v26 }
0x166e   : > { %7397 = vmatpush3.bf16.msra.mxu0 %v7396_v27  ;;  %7429 = vmatpush3.bf16.msra.mxu1 %v7428_v49  ;;  %v7442_v27 = vpack.c.bf16 %v11336_v3, %v11335_v34  ;;  %v7412_v49 = vpack.c.bf16 %v11338_v20, %v11337_v63 }
0x166f   : > { %7399 = vmatprep.subr.bf16.mxu0 %v7398_v16  ;;  %7431 = vmatprep.subr.bf16.mxu1 %v7430_v37  ;;  %v7444_v16 = vpack.c.bf16 %v11340_v11, %v11339_v62  ;;  %v3863_v37 = vmax.f32 %v9993_v33, 0.0  ;;  %v6285_v33 = vpop.f32.mrb[24].mxu0 }
0x1672   : > { %7401 = vmatpush3.bf16.msra.mxu0 %v7400_v29  ;;  %7433 = vmatpush3.bf16.msra.mxu1 %v7432_v18  ;;  %v3864_v29 = vmax.f32 %v9988_v0, 0.0  ;;  %v3886_v18 = vrot.slane %v11341_v15, %v9567_v50  ;;  %v6286_v0 = vpop.f32.mrb[25].mxu0 }
0x1673   : > { %7403 = vmatprep.subr.bf16.mxu0 %v7402_v35  ;;  %7435 = vmatprep.subr.bf16.mxu1 %v7434_v59  ;;  %v6287_v42 = vadd.f32 %v6286_v0, %v6285_v33 }
0x1675   : > { %v3955_v12 = vadd.f32 %v6287_v42, %v3886_v18 }
0x1676   : > { %7405 = vmatpush3.bf16.msra.mxu0 %v7404_v31  ;;  %7437 = vmatpush3.bf16.msra.mxu1 %v7436_v17 }
0x1677   : > { %7407 = vmatprep.subr.bf16.mxu0 %v7406_v25  ;;  %7439 = vmatprep.subr.bf16.mxu1 %v7438_v55  ;;  %v4035_v38 = vadd.f32 %v6328_v22, %v3955_v12 }
0x167a   : > { %7409 = vmatpush3.bf16.msra.mxu0 %v7408_v44  ;;  %7441 = vmatpush3.bf16.msra.mxu1 %v7440_v48 }
0x167b   : > { %7411 = vmatprep.subr.bf16.mxu0 %v7410_v47  ;;  %7443 = vmatprep.subr.bf16.mxu1 %v7442_v27 }
0x167e   : > { %7413 = vmatpush3.bf16.msra.mxu0 %v7412_v49  ;;  %7445 = vmatpush3.bf16.msra.mxu1 %v7444_v16 }
0x1681   : > { %4433 = vmatmul.mubr.f32.vlgmr.msra.gmra.mrb[42].mxu0 %v3846_v1  ;;  %4513 = vmatmul.mubr.f32.vlgmr.msra.gmra.mrb[42].mxu1 %v3848_v61 }
0x1682   : > { %4437 = vmatprep.mubr.f32.mxu0 %v3863_v37  ;;  %4517 = vmatprep.mubr.f32.mxu1 %v3865_v21 }
0x1685   : > { %4438 = vmatmul.mubr.f32.gmra.mrb[44].mxu0 %v3862_v56  ;;  %4518 = vmatmul.mubr.f32.gmra.mrb[44].mxu1 %v3864_v29 }
0x1686   : > { %4442 = vmatprep.mubr.f32.mxu0 %v3879_v7  ;;  %4522 = vmatprep.mubr.f32.mxu1 %v3881_v41 }
0x1689   : > { %4443 = vmatmul.mubr.f32.gmra.mrb[46].mxu0 %v3878_v40  ;;  %4523 = vmatmul.mubr.f32.gmra.mrb[46].mxu1 %v3880_v43 }
0x16f9   : > { %v6288_v35 = vpop.f32.mrb[26].mxu0  ;;  %v6329_v39 = vpop.f32.mrb[26].mxu1 }
0x16fa   : > { %v6289_v59 = vpop.f32.mrb[27].mxu0  ;;  %v6330_v13 = vpop.f32.mrb[27].mxu1 }
0x16fb   : > { %v6290_v57 = vadd.f32 %v6289_v59, %v6288_v35  ;;  %v6331_v8 = vadd.f32 %v6330_v13, %v6329_v39 }
0x16fd   : > { %v3960_v60 = vadd.f32 %v6290_v57, %v3886_v18  ;;  %v6291_v31 = vpop.f32.mrb[28].mxu0  ;;  %v6332_v2 = vpop.f32.mrb[28].mxu1 }
0x16fe   : > { %v6292_v45 = vpop.f32.mrb[29].mxu0  ;;  %v6333_v17 = vpop.f32.mrb[29].mxu1 }
0x16ff   : > { %v4040_v36 = vadd.f32 %v6331_v8, %v3960_v60  ;;  %v6293_v46 = vadd.f32 %v6292_v45, %v6291_v31  ;;  %v6334_v25 = vadd.f32 %v6333_v17, %v6332_v2 }
0x1701   : > { %v3965_v52 = vadd.f32 %v6293_v46, %v3886_v18 }
0x1703   : > { %v4045_v28 = vadd.f32 %v6334_v25, %v3965_v52 }
0x1712   : > { %v6367_v55 = vpop.f32.mrb[30].mxu0  ;;  %v6408_v26 = vpop.f32.mrb[30].mxu1 }
0x1713   : > { %v6368_v51 = vpop.f32.mrb[31].mxu0  ;;  %v6409_v44 = vpop.f32.mrb[31].mxu1 }
0x1714   : > { %v6369_v4 = vadd.f32 %v6368_v51, %v6367_v55  ;;  %v6410_v10 = vadd.f32 %v6409_v44, %v6408_v26 }
0x1716   : > { %v4115_v48 = vadd.f32 %v6369_v4, %v4035_v38  ;;  %v6370_v19 = vpop.f32.mrb[32].mxu0  ;;  %v6411_v9 = vpop.f32.mrb[32].mxu1 }
0x1717   : > { %v6371_v47 = vpop.f32.mrb[33].mxu0  ;;  %v6412_v34 = vpop.f32.mrb[33].mxu1 }
0x1718   : > { %v4195_v3 = vadd.f32 %v6410_v10, %v4115_v48  ;;  %v6372_v27 = vadd.f32 %v6371_v47, %v6370_v19  ;;  %v6413_v63 = vadd.f32 %v6412_v34, %v6411_v9 }
0x171a   : > { %v4120_v20 = vadd.f32 %v6372_v27, %v4040_v36  ;;  %v6373_v49 = vpop.f32.mrb[34].mxu0  ;;  %v6414_v62 = vpop.f32.mrb[34].mxu1 }
0x171b   : > { %v6374_v11 = vpop.f32.mrb[35].mxu0  ;;  %v6415_v16 = vpop.f32.mrb[35].mxu1 }
0x171c   : > { %v4200_v1 = vadd.f32 %v6413_v63, %v4120_v20  ;;  %v6375_v61 = vadd.f32 %v6374_v11, %v6373_v49  ;;  %v6416_v37 = vadd.f32 %v6415_v16, %v6414_v62 }
0x171e   : > { %v4125_v21 = vadd.f32 %v6375_v61, %v4045_v28 }
0x1720   : > { %v4205_v56 = vadd.f32 %v6416_v37, %v4125_v21 }
0x1733   : > { %v6449_v29 = vpop.f32.mrb[36].mxu0  ;;  %v6490_v7 = vpop.f32.mrb[36].mxu1 }
0x1734   : > { %v6450_v41 = vpop.f32.mrb[37].mxu0  ;;  %v6491_v40 = vpop.f32.mrb[37].mxu1 }
0x1735   : > { %v6451_v43 = vadd.f32 %v6450_v41, %v6449_v29  ;;  %v6492_v33 = vadd.f32 %v6491_v40, %v6490_v7 }
0x1737   : > { %v4275_v58 = vadd.f32 %v6451_v43, %v4195_v3  ;;  %v6452_v15 = vpop.f32.mrb[38].mxu0  ;;  %v6493_v18 = vpop.f32.mrb[38].mxu1 }
0x1738   : > { %v6453_v0 = vpop.f32.mrb[39].mxu0  ;;  %v6494_v24 = vpop.f32.mrb[39].mxu1 }
0x1739   : > { %v4355_v42 = vadd.f32 %v6492_v33, %v4275_v58  ;;  %v6454_v22 = vadd.f32 %v6453_v0, %v6452_v15  ;;  %v6495_v12 = vadd.f32 %v6494_v24, %v6493_v18 }
0x173b   : > { %v4280_v35 = vadd.f32 %v6454_v22, %v4200_v1  ;;  %v6455_v39 = vpop.f32.mrb[40].mxu0  ;;  %v6496_v38 = vpop.f32.mrb[40].mxu1 }
0x173c   : > { %v6456_v59 = vpop.f32.mrb[41].mxu0  ;;  %v6497_v13 = vpop.f32.mrb[41].mxu1 }
0x173d   : > { %v4360_v57 = vadd.f32 %v6495_v12, %v4280_v35  ;;  %v6457_v8 = vadd.f32 %v6456_v59, %v6455_v39  ;;  %v6498_v60 = vadd.f32 %v6497_v13, %v6496_v38 }
0x173f   : > { %v4285_v31 = vadd.f32 %v6457_v8, %v4205_v56  ;;  %v11342_v8 = vld [vmem:[#allocation331_spill] sm:$0xff] }
0x1741   : > { %v4365_v2 = vadd.f32 %v6498_v60, %v4285_v31  ;;  %v4574_v60 = vrot.slane %v11342_v8, %v9567_v50 }
0x1754   : > { %v6531_v45 = vpop.f32.mrb[42].mxu0  ;;  %v6572_v17 = vpop.f32.mrb[42].mxu1 }
0x1755   : > { %v6532_v36 = vpop.f32.mrb[43].mxu0  ;;  %v6573_v46 = vpop.f32.mrb[43].mxu1 }
0x1756   : > { %v6533_v25 = vadd.f32 %v6532_v36, %v6531_v45  ;;  %v6574_v52 = vadd.f32 %v6573_v46, %v6572_v17 }
0x1758   : > { %v4435_v28 = vadd.f32 %v6533_v25, %v4355_v42  ;;  %v6534_v55 = vpop.f32.mrb[44].mxu0  ;;  %v6575_v26 = vpop.f32.mrb[44].mxu1 }
0x1759   : > { %v6535_v51 = vpop.f32.mrb[45].mxu0  ;;  %v6576_v44 = vpop.f32.mrb[45].mxu1 }
0x175a   : > { %v4515_v4 = vadd.f32 %v6574_v52, %v4435_v28  ;;  %v6536_v10 = vadd.f32 %v6535_v51, %v6534_v55  ;;  %v6577_v48 = vadd.f32 %v6576_v44, %v6575_v26 }
0x175c   : > { %v4440_v19 = vadd.f32 %v6536_v10, %v4360_v57  ;;  %v6537_v9 = vpop.f32.mrb[46].mxu0  ;;  %v6578_v47 = vpop.f32.mrb[46].mxu1  ;;  %v4528_v34 = vadd.f32 %v4515_v4, %v9573_v53 }
0x175d   : > { %v6538_v3 = vpop.f32.mrb[47].mxu0  ;;  %v6579_v27 = vpop.f32.mrb[47].mxu1 }
0x175e   : > { %v4520_v63 = vadd.f32 %v6577_v48, %v4440_v19  ;;  %v6539_v20 = vadd.f32 %v6538_v3, %v6537_v9  ;;  %v6580_v49 = vadd.f32 %v6579_v27, %v6578_v47  ;;  %v4531_v62 = vsel %vm1149_vm6, %v4528_v34, 0.0 }
0x175f   : > { %4532 = vadd.xlane.f32.xlu0 %v4531_v62 }
0x1760   : > { %v4445_v11 = vadd.f32 %v6539_v20, %v4365_v2  ;;  %v4529_v16 = vadd.f32 %v4520_v63, %v9591_v32  ;;  %v11343_v2 = vld [vmem:[#allocation332_spill] sm:$0xff] }
0x1761   : > { %v4583_v45 = vrot.slane %v11343_v2, %v9567_v50 }
0x1762   : > { %v4525_v1 = vadd.f32 %v6580_v49, %v4445_v11  ;;  %v4534_v61 = vsel %vm1149_vm6, %v4529_v16, 0.0 }
0x1763   : > { %4535 = vadd.xlane.f32.xlu1 %v4534_v61 }
0x1764   : > { %v4530_v37 = vadd.f32 %v4525_v1, %v9605_v14 }
0x1766   : > { %v4537_v21 = vsel %vm3026_vm1, %v4530_v37, 0.0 }
0x1767   : > { %4538 = vadd.xlane.f32.xlu0 %v4537_v21 }
0x17ec   : > { %v4533_v53 = vpop.xlane.xlu0 %4532 }
0x17ed   : > { %v4540_v56 = vmul.f32 0.03125, %v4533_v53 }
0x17ef   : > { %v4543_v29 = vsub.f32 %v4528_v34, %v4540_v56 }
0x17f0   : > { %v4536_v7 = vpop.xlane.xlu1 %4535 }
0x17f1   : > { %v4541_v41 = vmul.f32 0.03125, %v4536_v7  ;;  %v4546_v40 = vmul.f32 %v4543_v29, %v4543_v29 }
0x17f3   : > { %v4544_v43 = vsub.f32 %v4529_v16, %v4541_v41  ;;  %v4549_v33 = vsel %vm1149_vm6, %v4546_v40, 0.0 }
0x17f4   : > { %v4539_v58 = vpop.xlane.xlu0 %4538  ;;  %4550 = vadd.xlane.f32.xlu1 %v4549_v33 }
0x17f5   : > { %v4542_v32 = vmul.f32 0.03125, %v4539_v58  ;;  %v4547_v15 = vmul.f32 %v4544_v43, %v4544_v43 }
0x17f7   : > { %v4545_v18 = vsub.f32 %v4530_v37, %v4542_v32  ;;  %v4552_v0 = vsel %vm1149_vm6, %v4547_v15, 0.0 }
0x17f8   : > { %4553 = vadd.xlane.f32.xlu0 %v4552_v0 }
0x17f9   : > { %v4548_v14 = vmul.f32 %v4545_v18, %v4545_v18 }
0x17fb   : > { %v4555_v24 = vsel %vm3026_vm1, %v4548_v14, 0.0 }
0x17fc   : > { %4556 = vadd.xlane.f32.xlu1 %v4555_v24 }
0x1881   : > { %v4551_v42 = vpop.xlane.xlu1 %4550 }
0x1882   : > { %v4558_v22 = vmul.f32 0.03125, %v4551_v42 }
0x1884   : > { %v4561_v12 = vadd.f32 1e-05, %v4558_v22 }
0x1885   : > { %v4554_v35 = vpop.xlane.xlu0 %4553 }
0x1886   : > { %7951 = vrsqrt.f32 %v4561_v12  ;;  %v4559_v39 = vmul.f32 0.03125, %v4554_v35 }
0x1888   : > { %v4562_v38 = vadd.f32 1e-05, %v4559_v39 }
0x1889   : > { %v4557_v59 = vpop.xlane.xlu1 %4556 }
0x188a   : > { %7953 = vrsqrt.f32 %v4562_v38  ;;  %v4560_v13 = vmul.f32 0.03125, %v4557_v59 }
0x188c   : > { %v4563_v57 = vadd.f32 1e-05, %v4560_v13 }
0x188e   : > { %7955 = vrsqrt.f32 %v4563_v57 }
0x1890   : > { %v7952_v31 = vpop.eup %7951 }
0x1891   : > { %v4567_v17 = vmul.f32 %v7952_v31, %v4543_v29 }
0x1893   : > { %v4576_v36 = vmul.f32 %v4574_v60, %v4567_v17 }
0x1894   : > { %v7954_v46 = vpop.eup %7953 }
0x1895   : > { %v4585_v25 = vadd.f32 %v4583_v45, %v4576_v36  ;;  %v4568_v52 = vmul.f32 %v7954_v46, %v4544_v43 }
0x1897   : > { %4588 = vst.msk [vmem:[#allocation2] sm:$0xff] %vm1149_vm6, %v4585_v25  ;;  %v4577_v28 = vmul.f32 %v4574_v60, %v4568_v52 }
0x1898   : > { %v7956_v55 = vpop.eup %7955 }
0x1899   : > { %v4586_v26 = vadd.f32 %v4583_v45, %v4577_v28  ;;  %v4569_v51 = vmul.f32 %v7956_v55, %v4545_v18 }
0x189b   : > { %4589 = vst.msk [vmem:[#allocation2 + $0x8] sm:$0xff] %vm1149_vm6, %v4586_v26  ;;  %v4578_v44 = vmul.f32 %v4574_v60, %v4569_v51 }
0x189d   : > { %v4587_v4 = vadd.f32 %v4583_v45, %v4578_v44 }
0x189f   : > { %4590 = vst.msk [vmem:[#allocation2 + $0x10] sm:$0x3] %vm3026_vm1, %v4587_v4 }
0x18a0 PF: > { %p6154_p6 = scmp.ne.s32.totalorder %s8111_s22, 1 }
0x18a1   : > { %v4595_v50 = vsel (!%p6154_p6), %vm1364_vm11, %v9204_v30, %v9210_v5  ;;  %v4596_v10 = vsel (!%p6154_p6), %vm1364_vm11, %v9508_v6, %v9528_v54  ;;  %vm4598_vm2 = vcmask (!%p6154_p6), 254976   ;;  %v11344_v63 = vld [vmem:[#allocation25_spill] sm:$0xff] (!%p6154_p6)  ;;  %v11345_v30 = vld [vmem:[#allocation11_spill] sm:$0xff] (!%p6154_p6)  ;;  %v11348_v6 = vld [vmem:[#allocation24_spill] sm:$0xff] (!%p6154_p6)  ;;  %v8018_v24 = vmov (!%p6154_p6), 0.0  }
0x18a2   : > { %4594 = sbr.rel (%p6154_p6) target bundleno = 7470 (0x1d2e), region = 96  ;;  %v4597_v48 = vadd.f32 (!%p6154_p6), %v4596_v10, %v4595_v50  ;;  %v7446_v20 = vpack.c.bf16 (!%p6154_p6), %v11344_v63, %v8213_v23  ;;  %v11346_v5 = vld [vmem:[#allocation27_spill] sm:$0xff] (!%p6154_p6)  ;;  %v11347_v62 = vld [vmem:[#allocation9_spill] sm:$0xff] (!%p6154_p6)  ;;  %v11349_v11 = vld [vmem:[#allocation10_spill] sm:$0xff] (!%p6154_p6)  ;;  %4776 = vmatprep.mubr.f32.mxu0 (!%p6154_p6), %v8018_v24  ;;  %4847 = vmatprep.mubr.f32.mxu1 (!%p6154_p6), %v8018_v24  ;;  %v4614_v12 = vlaneseq (!%p6154_p6) }
0x18a3   : > { %v7454_v49 = vpack.c.bf16 (!%p6154_p6), %v11346_v5, %v11345_v30  ;;  %v7448_v54 = vpack.c.bf16 (!%p6154_p6), %v11348_v6, %v11347_v62  ;;  %v11350_v16 = vld [vmem:[#allocation26_spill] sm:$0xff] (!%p6154_p6)  ;;  %v11351_v61 = vld [vmem:[#allocation41_spill] sm:$0xff] (!%p6154_p6)  ;;  %v11353_v53 = vld [vmem:[#allocation43_spill] sm:$0xff] (!%p6154_p6) }
0x18a4   : > { %v4599_v19 = vsel (!%p6154_p6), %vm4598_vm2, %v4597_v48, 0.0  ;;  %v7456_v1 = vpack.c.bf16 (!%p6154_p6), %v11350_v16, %v11349_v11  ;;  %7447 = vmatprep.subr.bf16.mxu0 (!%p6154_p6), %v7446_v20  ;;  %v11352_v37 = vld [vmem:[#allocation57_spill] sm:$0xff] (!%p6154_p6)  ;;  %v11354_v56 = vld [vmem:[#allocation59_spill] sm:$0xff] (!%p6154_p6)  ;;  %v11355_v23 = vld [vmem:[#allocation40_spill] sm:$0xff] (!%p6154_p6)  ;;  %v10195_v39 = vshrl.u32 (!%p6154_p6), %v4614_v12, 7 }
0x18a5   : > { %4600 = vadd.xlane.f32.xlu0 (!%p6154_p6), %v4599_v19  ;;  %7455 = vmatprep.subr.bf16.mxu1 (!%p6154_p6), %v7454_v49  ;;  %v7450_v21 = vpack.c.bf16 (!%p6154_p6), %v11352_v37, %v11351_v61  ;;  %v7458_v29 = vpack.c.bf16 (!%p6154_p6), %v11354_v56, %v11353_v53  ;;  %v11356_v7 = vld [vmem:[#allocation56_spill] sm:$0xff] (!%p6154_p6)  ;;  %v11357_v40 = vld [vmem:[#allocation42_spill] sm:$0xff] (!%p6154_p6)  ;;  %v11359_v58 = vld [vmem:[#allocation13_spill] sm:$0xff] (!%p6154_p6) }
0x18a6   : > { %7449 = vmatpush1.bf16.msra.mxu0 (!%p6154_p6), %v7448_v54  ;;  %7457 = vmatpush1.bf16.msra.mxu1 (!%p6154_p6), %v7456_v1  ;;  %v7452_v41 = vpack.c.bf16 (!%p6154_p6), %v11356_v7, %v11355_v23  ;;  %v11358_v43 = vld [vmem:[#allocation58_spill] sm:$0xff] (!%p6154_p6)  ;;  %v11360_v32 = vld [vmem:[#allocation29_spill] sm:$0xff] (!%p6154_p6)  ;;  %v11361_v18 = vld [vmem:[#allocation15_spill] sm:$0xff] (!%p6154_p6)  ;;  %v10198_v38 = vsub.s32 (!%p6154_p6), 0, %v10195_v39 }
0x18a7   : > { %v7460_v33 = vpack.c.bf16 (!%p6154_p6), %v11358_v43, %v11357_v40  ;;  %7451 = vmatprep.subr.bf16.mxu0 (!%p6154_p6), %v7450_v21  ;;  %7459 = vmatprep.subr.bf16.mxu1 (!%p6154_p6), %v7458_v29  ;;  %v7462_v15 = vpack.c.bf16 (!%p6154_p6), %v11360_v32, %v11359_v58  ;;  %v11362_v0 = vld [vmem:[#allocation31_spill] sm:$0xff] (!%p6154_p6)  ;;  %v11364_v8 = vld [vmem:[#allocation8_spill] sm:$0xff] (!%p6154_p6)  ;;  %v11367_v46 = vld [vmem:[#allocation14_spill] sm:$0xff] (!%p6154_p6) }
0x18a8   : > { %v7470_v14 = vpack.c.bf16 (!%p6154_p6), %v11362_v0, %v11361_v18  ;;  %v11363_v59 = vld [vmem:[#allocation7_spill] sm:$0xff] (!%p6154_p6)  ;;  %v4624_v60 = vrot.slane (!%p6154_p6), %v11364_v8, %v10198_v38  ;;  %v11365_v45 = vld [vmem:[#allocation12_spill] sm:$0xff] (!%p6154_p6)  ;;  %v11368_v25 = vld [vmem:[#allocation30_spill] sm:$0xff] (!%p6154_p6) }
0x18a9   : > { %v4617_v13 = vrot.slane %v11363_v59, %v10198_v38  ;;  %v11366_v17 = vld [vmem:[#allocation28_spill] sm:$0xff]  ;;  %v7472_v52 = vpack.c.bf16 %v11368_v25, %v11367_v46  ;;  %v11369_v55 = vld [vmem:[#allocation45_spill] sm:$0xff]  ;;  %v11371_v44 = vld [vmem:[#allocation47_spill] sm:$0xff] }
0x18aa   : > { %7453 = vmatpush1.bf16.msra.mxu0 %v7452_v41  ;;  %7461 = vmatpush1.bf16.msra.mxu1 %v7460_v33  ;;  %v7464_v36 = vpack.c.bf16 %v11366_v17, %v11365_v45  ;;  %v11370_v26 = vld [vmem:[#allocation61_spill] sm:$0xff]  ;;  %v11372_v4 = vld [vmem:[#allocation63_spill] sm:$0xff]  ;;  %v11373_v10 = vld [vmem:[#allocation44_spill] sm:$0xff] }
0x18ab   : > { %7463 = vmatprep.subr.bf16.mxu0 %v7462_v15  ;;  %7471 = vmatprep.subr.bf16.mxu1 %v7470_v14  ;;  %v7466_v51 = vpack.c.bf16 %v11370_v26, %v11369_v55  ;;  %v7474_v50 = vpack.c.bf16 %v11372_v4, %v11371_v44  ;;  %v11379_v20 = vld [vmem:[#allocation19_spill] sm:$0xff]  ;;  %v11381_v49 = vld [vmem:[#allocation16_spill] sm:$0xff]  ;;  %v11383_v54 = vld [vmem:[#allocation18_spill] sm:$0xff] }
0x18ac   : > { %v11380_v30 = vld [vmem:[#allocation35_spill] sm:$0xff]  ;;  %v11382_v62 = vld [vmem:[#allocation32_spill] sm:$0xff]  ;;  %v11384_v11 = vld [vmem:[#allocation34_spill] sm:$0xff] }
0x18ad   : > { %v7486_v5 = vpack.c.bf16 %v11380_v30, %v11379_v20  ;;  %v7480_v6 = vpack.c.bf16 %v11382_v62, %v11381_v49  ;;  %v7488_v16 = vpack.c.bf16 %v11384_v11, %v11383_v54  ;;  %v11385_v1 = vld [vmem:[#allocation49_spill] sm:$0xff]  ;;  %v11387_v21 = vld [vmem:[#allocation51_spill] sm:$0xff]  ;;  %v11389_v29 = vld [vmem:[#allocation48_spill] sm:$0xff] }
0x18ae   : > { %v11386_v61 = vld [vmem:[#allocation65_spill] sm:$0xff]  ;;  %v11388_v53 = vld [vmem:[#allocation67_spill] sm:$0xff]  ;;  %v11390_v23 = vld [vmem:[#allocation64_spill] sm:$0xff] }
0x18af   : > { %v7482_v37 = vpack.c.bf16 %v11386_v61, %v11385_v1  ;;  %v7490_v56 = vpack.c.bf16 %v11388_v53, %v11387_v21  ;;  %v7484_v7 = vpack.c.bf16 %v11390_v23, %v11389_v29  ;;  %v11391_v41 = vld [vmem:[#allocation50_spill] sm:$0xff]  ;;  %v11393_v33 = vld [vmem:[#allocation21_spill] sm:$0xff]  ;;  %v11395_v15 = vld [vmem:[#allocation23_spill] sm:$0xff] }
0x18b0   : > { %v11392_v40 = vld [vmem:[#allocation66_spill] sm:$0xff]  ;;  %v11394_v58 = vld [vmem:[#allocation37_spill] sm:$0xff]  ;;  %v11396_v18 = vld [vmem:[#allocation39_spill] sm:$0xff] }
0x18b1   : > { %v7492_v43 = vpack.c.bf16 %v11392_v40, %v11391_v41  ;;  %v7494_v32 = vpack.c.bf16 %v11394_v58, %v11393_v33  ;;  %v7502_v0 = vpack.c.bf16 %v11396_v18, %v11395_v15  ;;  %v11397_v14 = vld [vmem:[#allocation20_spill] sm:$0xff]  ;;  %v11399_v12 = vld [vmem:[#allocation22_spill] sm:$0xff]  ;;  %v11410_v26 = vld [vmem:[#allocation91_spill] sm:$0xff] }
0x18b2   : > { %v11405_v45 = vld [vmem:[#allocation52_spill] sm:$0xff]  ;;  %v11407_v46 = vld [vmem:[#allocation54_spill] sm:$0xff]  ;;  %v11412_v4 = vld [vmem:[#allocation123_spill] sm:$0xff] }
0x18b3   : > { %v11406_v17 = vld [vmem:[#allocation68_spill] sm:$0xff]  ;;  %v11408_v25 = vld [vmem:[#allocation70_spill] sm:$0xff]  ;;  %v11420_v30 = vld [vmem:[#allocation125_spill] sm:$0xff] }
0x18b4   : > { %v11409_v55 = vld [vmem:[#allocation90_spill] sm:$0xff]  ;;  %v11419_v20 = vld [vmem:[#allocation124_spill] sm:$0xff]  ;;  %v11422_v49 = vld [vmem:[#allocation77_spill] sm:$0xff] }
0x18b5   : > { %v11411_v44 = vld [vmem:[#allocation122_spill] sm:$0xff]  ;;  %v11424_v54 = vld [vmem:[#allocation109_spill] sm:$0xff]  ;;  %v11426_v1 = vld [vmem:[#allocation95_spill] sm:$0xff] }
0x18b6   : > { %v11428_v21 = vld [vmem:[#allocation127_spill] sm:$0xff]  ;;  %v11434_v33 = vld [vmem:[#allocation97_spill] sm:$0xff] }
0x18b7   : > { %v11430_v29 = vld [vmem:[#allocation79_spill] sm:$0xff]  ;;  %v11436_v15 = vld [vmem:[#allocation129_spill] sm:$0xff] }
0x18b8   : > { %v11432_v41 = vld [vmem:[#allocation111_spill] sm:$0xff] }
0x1932   : > { %v4601_v9 = vpop.xlane.xlu0 %4600 }
0x1933   : > { %v4603_v47 = vmul.f32 0.03125, %v4601_v9  ;;  %v11375_v9 = vld [vmem:[#allocation46_spill] sm:$0xff] }
0x1935   : > { %v4604_v34 = vsub.f32 %v4597_v48, %v4603_v47  ;;  %v11374_v48 = vld [vmem:[#allocation60_spill] sm:$0xff]  ;;  %v11376_v47 = vld [vmem:[#allocation62_spill] sm:$0xff] }
0x1936   : > { %v7468_v19 = vpack.c.bf16 %v11374_v48, %v11373_v10  ;;  %v11413_v10 = vld [vmem:[#allocation74_spill] sm:$0xff]  ;;  %v11414_v48 = vld [vmem:[#allocation75_spill] sm:$0xff] }
0x1937   : > { %v4605_v3 = vmul.f32 %v4604_v34, %v4604_v34 }
0x1939   : > { %v4606_v27 = vsel %vm4598_vm2, %v4605_v3, 0.0  ;;  %v11377_v3 = vld [vmem:[#allocation17_spill] sm:$0xff] }
0x193a   : > { %4607 = vadd.xlane.f32.xlu0 %v4606_v27  ;;  %v11378_v27 = vld [vmem:[#allocation33_spill] sm:$0xff] }
0x193b   : > { %v7478_v63 = vpack.c.bf16 %v11378_v27, %v11377_v3  ;;  %v11417_v3 = vld [vmem:[#allocation92_spill] sm:$0xff]  ;;  %v11418_v27 = vld [vmem:[#allocation93_spill] sm:$0xff] }
0x19c7   : > { %v4608_v42 = vpop.xlane.xlu0 %4607 }
0x19c8   : > { %v4609_v22 = vmul.f32 0.03125, %v4608_v42  ;;  %v11398_v42 = vld [vmem:[#allocation36_spill] sm:$0xff] }
0x19ca   : > { %v4610_v35 = vadd.f32 1e-05, %v4609_v22  ;;  %v7496_v22 = vpack.c.bf16 %v11398_v42, %v11397_v14  ;;  %v11438_v14 = vld [vmem:[#allocation81_spill] sm:$0xff] }
0x19cc   : > { %7957 = vrsqrt.f32 %v4610_v35  ;;  %v11400_v35 = vld [vmem:[#allocation38_spill] sm:$0xff] }
0x19cd   : > { %v7504_v59 = vpack.c.bf16 %v11400_v35, %v11399_v12  ;;  %v11440_v12 = vld [vmem:[#allocation113_spill] sm:$0xff] }
0x19d6   : > { %v7958_v57 = vpop.eup %7957 }
0x19d7   : > { %v4612_v31 = vmul.f32 %v7958_v57, %v4604_v34  ;;  %v7476_v34 = vpack.c.bf16 %v11376_v47, %v11375_v9  ;;  %v11402_v57 = vld [vmem:[#allocation69_spill] sm:$0xff]  ;;  %v11415_v9 = vld [vmem:[#allocation106_spill] sm:$0xff]  ;;  %v11416_v47 = vld [vmem:[#allocation107_spill] sm:$0xff] }
0x19d9   : > { %v4619_v2 = vmul.f32 %v4617_v13, %v4612_v31  ;;  %v11401_v13 = vld [vmem:[#allocation53_spill] sm:$0xff]  ;;  %v11404_v31 = vld [vmem:[#allocation71_spill] sm:$0xff] }
0x19da   : > { %v7498_v8 = vpack.c.bf16 %v11402_v57, %v11401_v13  ;;  %v11442_v13 = vld [vmem:[#allocation99_spill] sm:$0xff] }
0x19db   : > { %v10208_v28 = vadd.f32 %v4624_v60, %v4619_v2  ;;  %v11403_v60 = vld [vmem:[#allocation55_spill] sm:$0xff] }
0x19dc   : > { %v7506_v2 = vpack.c.bf16 %v11404_v31, %v11403_v60  ;;  %v11444_v60 = vld [vmem:[#allocation131_spill] sm:$0xff] }
0x19dd   : > { %6155 = vmatmul.mubr.msk.f32.vlgmr.msra.gmra.mrb[0].mxu0 %vm1149_vm6, %v10208_v28  ;;  %6156 = vmatmul.mubr.msk.f32.vlgmr.msra.gmra.mrb[0].mxu1 %vm1149_vm6, %v10208_v28 }
0x19de   : > { %7465 = vmatpush1.bf16.msra.mxu0 %v7464_v36  ;;  %7473 = vmatpush1.bf16.msra.mxu1 %v7472_v52  ;;  %v7500_v36 = vpack.c.bf16 %v11406_v17, %v11405_v45  ;;  %v7508_v52 = vpack.c.bf16 %v11408_v25, %v11407_v46  ;;  %v11446_v45 = vld [vmem:[#allocation83_spill] sm:$0xff] }
0x19df   : > { %7467 = vmatprep.subr.bf16.mxu0 %v7466_v51  ;;  %7475 = vmatprep.subr.bf16.mxu1 %v7474_v50  ;;  %v7510_v51 = vpack.c.bf16 %v11410_v26, %v11409_v55  ;;  %v7542_v50 = vpack.c.bf16 %v11412_v4, %v11411_v44  ;;  %v11448_v46 = vld [vmem:[#allocation115_spill] sm:$0xff]  ;;  %v11450_v55 = vld [vmem:[#allocation101_spill] sm:$0xff] }
0x19e0   : > { %4918 = vmatprep.mubr.f32.mxu0 %v8018_v24  ;;  %4989 = vmatprep.mubr.f32.mxu1 %v8018_v24  ;;  %v11452_v44 = vld [vmem:[#allocation133_spill] sm:$0xff] }
0x19e2   : > { %7469 = vmatpush1.bf16.msra.mxu0 %v7468_v19  ;;  %7477 = vmatpush1.bf16.msra.mxu1 %v7476_v34  ;;  %v7512_v19 = vpack.c.bf16 %v11414_v48, %v11413_v10  ;;  %v7544_v34 = vpack.c.bf16 %v11416_v47, %v11415_v9  ;;  %v11454_v10 = vld [vmem:[#allocation85_spill] sm:$0xff] }
0x19e3   : > { %7479 = vmatprep.subr.bf16.mxu0 %v7478_v63  ;;  %7487 = vmatprep.subr.bf16.mxu1 %v7486_v5  ;;  %v7514_v63 = vpack.c.bf16 %v11418_v27, %v11417_v3  ;;  %v7546_v5 = vpack.c.bf16 %v11420_v30, %v11419_v20  ;;  %v11456_v9 = vld [vmem:[#allocation117_spill] sm:$0xff]  ;;  %v11458_v3 = vld [vmem:[#allocation103_spill] sm:$0xff] }
0x19e4   : > { %v11460_v20 = vld [vmem:[#allocation135_spill] sm:$0xff] }
0x19e5   : > { %6157 = vmatmul.mubr.msk.f32.vlgmr.msra.gmra.mrb[2].mxu0 %vm1149_vm6, %v10208_v28  ;;  %6158 = vmatmul.mubr.msk.f32.vlgmr.msra.gmra.mrb[2].mxu1 %vm1149_vm6, %v10208_v28 }
0x19e6   : > { %7481 = vmatpush1.bf16.msra.mxu0 %v7480_v6  ;;  %7489 = vmatpush1.bf16.msra.mxu1 %v7488_v16  ;;  %v11423_v6 = vld [vmem:[#allocation108_spill] sm:$0xff]  ;;  %v11425_v16 = vld [vmem:[#allocation94_spill] sm:$0xff] }
0x19e7   : > { %7483 = vmatprep.subr.bf16.mxu0 %v7482_v37  ;;  %7491 = vmatprep.subr.bf16.mxu1 %v7490_v56  ;;  %v7548_v11 = vpack.c.bf16 %v11424_v54, %v11423_v6  ;;  %v7518_v61 = vpack.c.bf16 %v11426_v1, %v11425_v16  ;;  %v11427_v37 = vld [vmem:[#allocation126_spill] sm:$0xff]  ;;  %v11464_v6 = vld [vmem:[#allocation119_spill] sm:$0xff]  ;;  %v11466_v16 = vld [vmem:[#allocation105_spill] sm:$0xff] }
0x19e8   : > { %5060 = vmatprep.mubr.f32.mxu0 %v8018_v24  ;;  %5131 = vmatprep.mubr.f32.mxu1 %v8018_v24  ;;  %v7550_v53 = vpack.c.bf16 %v11428_v21, %v11427_v37  ;;  %v11429_v56 = vld [vmem:[#allocation78_spill] sm:$0xff]  ;;  %v11468_v37 = vld [vmem:[#allocation137_spill] sm:$0xff] }
0x19e9   : > { %v7520_v23 = vpack.c.bf16 %v11430_v29, %v11429_v56  ;;  %v11470_v56 = vld [vmem:[#allocation89_spill] sm:$0xff] }
0x19ea   : > { %7485 = vmatpush1.bf16.msra.mxu0 %v7484_v7  ;;  %7493 = vmatpush1.bf16.msra.mxu1 %v7492_v43  ;;  %v11431_v7 = vld [vmem:[#allocation110_spill] sm:$0xff]  ;;  %v11433_v43 = vld [vmem:[#allocation96_spill] sm:$0xff] }
0x19eb   : > { %7495 = vmatprep.subr.bf16.mxu0 %v7494_v32  ;;  %7503 = vmatprep.subr.bf16.mxu1 %v7502_v0  ;;  %v7552_v40 = vpack.c.bf16 %v11432_v41, %v11431_v7  ;;  %v7522_v58 = vpack.c.bf16 %v11434_v33, %v11433_v43  ;;  %v11435_v32 = vld [vmem:[#allocation128_spill] sm:$0xff]  ;;  %v11472_v7 = vld [vmem:[#allocation121_spill] sm:$0xff]  ;;  %v11474_v43 = vld [vmem:[#allocation155_spill] sm:$0xff] }
0x19ec   : > { %v7554_v18 = vpack.c.bf16 %v11436_v15, %v11435_v32  ;;  %v11437_v0 = vld [vmem:[#allocation80_spill] sm:$0xff]  ;;  %v11476_v32 = vld [vmem:[#allocation187_spill] sm:$0xff] }
0x19ed   : > { %6159 = vmatmul.mubr.msk.f32.vlgmr.msra.gmra.mrb[4].mxu0 %vm1149_vm6, %v10208_v28  ;;  %6160 = vmatmul.mubr.msk.f32.vlgmr.msra.gmra.mrb[4].mxu1 %vm1149_vm6, %v10208_v28  ;;  %v7524_v42 = vpack.c.bf16 %v11438_v14, %v11437_v0  ;;  %v4635_v0 = vsub.s32 1, %v10195_v39  ;;  %v4643_v14 = vsub.s32 3, %v10195_v39 }
0x19ee   : > { %7497 = vmatpush1.bf16.msra.mxu0 %v7496_v22  ;;  %7505 = vmatpush1.bf16.msra.mxu1 %v7504_v59  ;;  %v11439_v22 = vld [vmem:[#allocation112_spill] sm:$0xff]  ;;  %v11441_v59 = vld [vmem:[#allocation98_spill] sm:$0xff] }
0x19ef   : > { %7499 = vmatprep.subr.bf16.mxu0 %v7498_v8  ;;  %7507 = vmatprep.subr.bf16.mxu1 %v7506_v2  ;;  %v7556_v35 = vpack.c.bf16 %v11440_v12, %v11439_v22  ;;  %v7526_v57 = vpack.c.bf16 %v11442_v13, %v11441_v59  ;;  %v11443_v8 = vld [vmem:[#allocation130_spill] sm:$0xff] }
0x19f0   : > { %5202 = vmatprep.mubr.f32.mxu0 %v8018_v24  ;;  %5273 = vmatprep.mubr.f32.mxu1 %v8018_v24  ;;  %v11421_v24 = vld [vmem:[#allocation76_spill] sm:$0xff]  ;;  %v7558_v31 = vpack.c.bf16 %v11444_v60, %v11443_v8  ;;  %v11445_v2 = vld [vmem:[#allocation82_spill] sm:$0xff] }
0x19f1   : > { %v7516_v62 = vpack.c.bf16 %v11422_v49, %v11421_v24  ;;  %v7528_v17 = vpack.c.bf16 %v11446_v45, %v11445_v2  ;;  %v11462_v24 = vld [vmem:[#allocation87_spill] sm:$0xff] }
0x19f2   : > { %7501 = vmatpush1.bf16.msra.mxu0 %v7500_v36  ;;  %7509 = vmatpush1.bf16.msra.mxu1 %v7508_v52  ;;  %v11447_v36 = vld [vmem:[#allocation114_spill] sm:$0xff]  ;;  %v11449_v52 = vld [vmem:[#allocation100_spill] sm:$0xff] }
0x19f3   : > { %7511 = vmatprep.subr.bf16.mxu0 %v7510_v51  ;;  %7543 = vmatprep.subr.bf16.mxu1 %v7542_v50  ;;  %v7560_v25 = vpack.c.bf16 %v11448_v46, %v11447_v36  ;;  %v7530_v26 = vpack.c.bf16 %v11450_v55, %v11449_v52  ;;  %v11451_v51 = vld [vmem:[#allocation132_spill] sm:$0xff]  ;;  %v4651_v36 = vsub.s32 5, %v10195_v39  ;;  %v4659_v46 = vsub.s32 7, %v10195_v39  ;;  %v11478_v55 = vld [vmem:[#allocation138_spill] sm:$0xff] }
0x19f4   : > { %v7562_v4 = vpack.c.bf16 %v11452_v44, %v11451_v51  ;;  %v11453_v50 = vld [vmem:[#allocation84_spill] sm:$0xff]  ;;  %v11480_v44 = vld [vmem:[#allocation170_spill] sm:$0xff] }
0x19f5   : > { %6161 = vmatmul.mubr.msk.f32.vlgmr.msra.gmra.mrb[6].mxu0 %vm1149_vm6, %v10208_v28  ;;  %6162 = vmatmul.mubr.msk.f32.vlgmr.msra.gmra.mrb[6].mxu1 %vm1149_vm6, %v10208_v28  ;;  %v7532_v48 = vpack.c.bf16 %v11454_v10, %v11453_v50 }
0x19f6   : > { %7513 = vmatpush3.bf16.msra.mxu0 %v7512_v19  ;;  %7545 = vmatpush3.bf16.msra.mxu1 %v7544_v34  ;;  %v11455_v19 = vld [vmem:[#allocation116_spill] sm:$0xff]  ;;  %v11457_v34 = vld [vmem:[#allocation102_spill] sm:$0xff] }
0x19f7   : > { %7515 = vmatprep.subr.bf16.mxu0 %v7514_v63  ;;  %7547 = vmatprep.subr.bf16.mxu1 %v7546_v5  ;;  %v7564_v47 = vpack.c.bf16 %v11456_v9, %v11455_v19  ;;  %v7534_v27 = vpack.c.bf16 %v11458_v3, %v11457_v34  ;;  %v11459_v63 = vld [vmem:[#allocation134_spill] sm:$0xff]  ;;  %v11482_v19 = vld [vmem:[#allocation156_spill] sm:$0xff]  ;;  %v11483_v9 = vld [vmem:[#allocation157_spill] sm:$0xff] }
0x19f8   : > { %v7566_v30 = vpack.c.bf16 %v11460_v20, %v11459_v63  ;;  %v11461_v5 = vld [vmem:[#allocation86_spill] sm:$0xff]  ;;  %v11484_v34 = vld [vmem:[#allocation188_spill] sm:$0xff]  ;;  %v11485_v3 = vld [vmem:[#allocation189_spill] sm:$0xff] }
0x19f9   : > { %v7536_v49 = vpack.c.bf16 %v11462_v24, %v11461_v5  ;;  %v11486_v24 = vld [vmem:[#allocation140_spill] sm:$0xff] }
0x19fa   : > { %7517 = vmatpush3.bf16.msra.mxu0 %v7516_v62  ;;  %7549 = vmatpush3.bf16.msra.mxu1 %v7548_v11  ;;  %v11463_v62 = vld [vmem:[#allocation118_spill] sm:$0xff]  ;;  %v11465_v11 = vld [vmem:[#allocation104_spill] sm:$0xff] }
0x19fb   : > { %7519 = vmatprep.subr.bf16.mxu0 %v7518_v61  ;;  %7551 = vmatprep.subr.bf16.mxu1 %v7550_v53  ;;  %v7568_v54 = vpack.c.bf16 %v11464_v6, %v11463_v62  ;;  %v7538_v1 = vpack.c.bf16 %v11466_v16, %v11465_v11  ;;  %v11467_v61 = vld [vmem:[#allocation136_spill] sm:$0xff] }
0x19fc   : > { %v7570_v21 = vpack.c.bf16 %v11468_v37, %v11467_v61  ;;  %v11469_v53 = vld [vmem:[#allocation88_spill] sm:$0xff]  ;;  %v11490_v61 = vld [vmem:[#allocation158_spill] sm:$0xff]  ;;  %v11491_v37 = vld [vmem:[#allocation159_spill] sm:$0xff] }
0x19fd   : > { %v7540_v29 = vpack.c.bf16 %v11470_v56, %v11469_v53  ;;  %v11488_v6 = vld [vmem:[#allocation172_spill] sm:$0xff]  ;;  %v11492_v53 = vld [vmem:[#allocation190_spill] sm:$0xff]  ;;  %v11493_v56 = vld [vmem:[#allocation191_spill] sm:$0xff] }
0x19fe   : > { %7521 = vmatpush3.bf16.msra.mxu0 %v7520_v23  ;;  %7553 = vmatpush3.bf16.msra.mxu1 %v7552_v40  ;;  %v11471_v23 = vld [vmem:[#allocation120_spill] sm:$0xff]  ;;  %v11473_v40 = vld [vmem:[#allocation154_spill] sm:$0xff] }
0x19ff   : > { %7523 = vmatprep.subr.bf16.mxu0 %v7522_v58  ;;  %7555 = vmatprep.subr.bf16.mxu1 %v7554_v18  ;;  %v7572_v41 = vpack.c.bf16 %v11472_v7, %v11471_v23  ;;  %v7574_v33 = vpack.c.bf16 %v11474_v43, %v11473_v40  ;;  %v11475_v58 = vld [vmem:[#allocation186_spill] sm:$0xff]  ;;  %v4639_v18 = vsub.s32 2, %v10195_v39 }
0x1a00   : > { %v7606_v15 = vpack.c.bf16 %v11476_v32, %v11475_v58  ;;  %v11494_v43 = vld [vmem:[#allocation142_spill] sm:$0xff] }
0x1a01   : > { %v11496_v32 = vld [vmem:[#allocation174_spill] sm:$0xff] }
0x1a02   : > { %7525 = vmatpush3.bf16.msra.mxu0 %v7524_v42  ;;  %7557 = vmatpush3.bf16.msra.mxu1 %v7556_v35  ;;  %v11477_v42 = vld [vmem:[#allocation72_spill] sm:$0xff] }
0x1a03   : > { %7527 = vmatprep.subr.bf16.mxu0 %v7526_v57  ;;  %7559 = vmatprep.subr.bf16.mxu1 %v7558_v31  ;;  %v4632_v22 = vrot.slane %v11477_v42, %v10198_v38  ;;  %v4640_v12 = vrot.slane %v11477_v42, %v4639_v18  ;;  %v4636_v35 = vrot.slane %v11477_v42, %v4635_v0 }
0x1a04   : > { %v4644_v59 = vrot.slane %v11477_v42, %v4643_v14  ;;  %v4652_v63 = vrot.slane %v11477_v42, %v4651_v36  ;;  %v4660_v20 = vrot.slane %v11477_v42, %v4659_v46 }
0x1a06   : > { %7529 = vmatpush3.bf16.msra.mxu0 %v7528_v17  ;;  %7561 = vmatpush3.bf16.msra.mxu1 %v7560_v25 }
0x1a07   : > { %7531 = vmatprep.subr.bf16.mxu0 %v7530_v26  ;;  %7563 = vmatprep.subr.bf16.mxu1 %v7562_v4  ;;  %v11479_v26 = vld [vmem:[#allocation139_spill] sm:$0xff] }
0x1a08   : > { %v7576_v51 = vpack.c.bf16 %v11479_v26, %v11478_v55  ;;  %v11481_v4 = vld [vmem:[#allocation171_spill] sm:$0xff]  ;;  %v11505_v55 = vld [vmem:[#allocation176_spill] sm:$0xff]  ;;  %v11506_v26 = vld [vmem:[#allocation177_spill] sm:$0xff] }
0x1a09   : > { %v7608_v50 = vpack.c.bf16 %v11481_v4, %v11480_v44 }
0x1a0a   : > { %7533 = vmatpush3.bf16.msra.mxu0 %v7532_v48  ;;  %7565 = vmatpush3.bf16.msra.mxu1 %v7564_v47  ;;  %v7578_v47 = vpack.c.bf16 %v11483_v9, %v11482_v19  ;;  %v11509_v19 = vld [vmem:[#allocation194_spill] sm:$0xff]  ;;  %v11510_v9 = vld [vmem:[#allocation195_spill] sm:$0xff] }
0x1a0b   : > { %7535 = vmatprep.subr.bf16.mxu0 %v7534_v27  ;;  %7567 = vmatprep.subr.bf16.mxu1 %v7566_v30  ;;  %v7610_v27 = vpack.c.bf16 %v11485_v3, %v11484_v34  ;;  %v4647_v34 = vsub.s32 4, %v10195_v39  ;;  %v4655_v3 = vsub.s32 6, %v10195_v39 }
0x1a0e   : > { %7537 = vmatpush3.bf16.msra.mxu0 %v7536_v49  ;;  %7569 = vmatpush3.bf16.msra.mxu1 %v7568_v54  ;;  %v11487_v49 = vld [vmem:[#allocation141_spill] sm:$0xff] }
0x1a0f   : > { %7539 = vmatprep.subr.bf16.mxu0 %v7538_v1  ;;  %7571 = vmatprep.subr.bf16.mxu1 %v7570_v21  ;;  %v7580_v62 = vpack.c.bf16 %v11487_v49, %v11486_v24  ;;  %v11489_v54 = vld [vmem:[#allocation173_spill] sm:$0xff]  ;;  %v7582_v21 = vpack.c.bf16 %v11491_v37, %v11490_v61  ;;  %v11513_v49 = vld [vmem:[#allocation178_spill] sm:$0xff]  ;;  %v11517_v61 = vld [vmem:[#allocation196_spill] sm:$0xff] }
0x1a10   : > { %v7612_v11 = vpack.c.bf16 %v11489_v54, %v11488_v6  ;;  %v11518_v37 = vld [vmem:[#allocation197_spill] sm:$0xff] }
0x1a12   : > { %7541 = vmatpush3.bf16.msra.mxu0 %v7540_v29  ;;  %7573 = vmatpush3.bf16.msra.mxu1 %v7572_v41  ;;  %v7614_v29 = vpack.c.bf16 %v11493_v56, %v11492_v53 }
0x1a13   : > { %7575 = vmatprep.subr.bf16.mxu0 %v7574_v33  ;;  %7607 = vmatprep.subr.bf16.mxu1 %v7606_v15  ;;  %v11495_v33 = vld [vmem:[#allocation143_spill] sm:$0xff] }
0x1a14   : > { %v7584_v58 = vpack.c.bf16 %v11495_v33, %v11494_v43  ;;  %v11497_v15 = vld [vmem:[#allocation175_spill] sm:$0xff]  ;;  %v11523_v33 = vld [vmem:[#allocation166_spill] sm:$0xff] }
0x1ab0   : > { %v4778_v13 = vpop.f32.mrb[0].mxu0  ;;  %v4849_v57 = vpop.f32.mrb[0].mxu1 }
0x1ab1   : > { %v4779_v8 = vadd.f32 %v4778_v13, %v4632_v22  ;;  %v4850_v60 = vadd.f32 %v4849_v57, %v4640_v12  ;;  %v4780_v31 = vpop.f32.mrb[1].mxu0  ;;  %v4851_v2 = vpop.f32.mrb[1].mxu1  ;;  %v7616_v22 = vpack.c.bf16 %v11497_v15, %v11496_v32  ;;  %v11498_v12 = vld [vmem:[#allocation73_spill] sm:$0xff] }
0x1ab2   : > { %v4781_v45 = vadd.f32 %v4780_v31, %v4636_v35  ;;  %v4852_v17 = vadd.f32 %v4851_v2, %v4644_v59  ;;  %v4672_v35 = vrot.slane %v11498_v12, %v4639_v18  ;;  %v11499_v59 = vld [vmem:[#allocation160_spill] sm:$0xff]  ;;  %v11500_v13 = vld [vmem:[#allocation161_spill] sm:$0xff]  ;;  %v4688_v54 = vrot.slane %v11498_v12, %v4655_v3 }
0x1ab3   : > { %v5280_v10 = vmax.f32 %v4779_v8, 0.0  ;;  %v5282_v48 = vmax.f32 %v4850_v60, 0.0  ;;  %v7586_v57 = vpack.c.bf16 %v11500_v13, %v11499_v59  ;;  %v11501_v8 = vld [vmem:[#allocation192_spill] sm:$0xff]  ;;  %v11502_v60 = vld [vmem:[#allocation193_spill] sm:$0xff]  ;;  %v11525_v13 = vld [vmem:[#allocation198_spill] sm:$0xff] }
0x1ab4   : > { %v5281_v25 = vmax.f32 %v4781_v45, 0.0  ;;  %v5283_v52 = vmax.f32 %v4852_v17, 0.0  ;;  %v7618_v31 = vpack.c.bf16 %v11502_v60, %v11501_v8  ;;  %v11503_v17 = vld [vmem:[#allocation144_spill] sm:$0xff]  ;;  %v4648_v60 = vrot.slane %v11477_v42, %v4647_v34 }
0x1ab6   : > { %5366 = vmatprep.mubr.f32.mxu0 %v5281_v25  ;;  %5436 = vmatprep.mubr.f32.mxu1 %v5283_v52  ;;  %v11504_v25 = vld [vmem:[#allocation145_spill] sm:$0xff] }
0x1ab7   : > { %5367 = vmatmul.mubr.f32.vlgmr.msra.gmra.mrb[8].mxu0 %v5280_v10  ;;  %5437 = vmatmul.mubr.f32.vlgmr.msra.gmra.mrb[8].mxu1 %v5282_v48  ;;  %v7588_v52 = vpack.c.bf16 %v11504_v25, %v11503_v17  ;;  %v11508_v10 = vld [vmem:[#allocation163_spill] sm:$0xff]  ;;  %v11529_v25 = vld [vmem:[#allocation182_spill] sm:$0xff] }
0x1ab8   : > { %v10368_v30 = vpop.f32.mrb[2].mxu0  ;;  %v10370_v5 = vpop.f32.mrb[2].mxu1  ;;  %7577 = vmatpush3.bf16.msra.mxu0 %v7576_v51  ;;  %7609 = vmatpush3.bf16.msra.mxu1 %v7608_v50  ;;  %v7620_v51 = vpack.c.bf16 %v11506_v26, %v11505_v55  ;;  %v11507_v50 = vld [vmem:[#allocation162_spill] sm:$0xff]  ;;  %v4656_v26 = vrot.slane %v11477_v42, %v4655_v3  ;;  %v11536_v42 = vld [vmem:[#allocation153_spill] sm:$0xff] }
0x1ab9   : > { %v4922_v16 = vpop.f32.mrb[3].mxu0  ;;  %v4993_v1 = vpop.f32.mrb[3].mxu1  ;;  %7579 = vmatprep.subr.bf16.mxu0 %v7578_v47  ;;  %7611 = vmatprep.subr.bf16.mxu1 %v7610_v27  ;;  %v7590_v48 = vpack.c.bf16 %v11508_v10, %v11507_v50  ;;  %v7622_v47 = vpack.c.bf16 %v11510_v9, %v11509_v19  ;;  %v4680_v27 = vrot.slane %v11498_v12, %v4647_v34  ;;  %v11532_v50 = vld [vmem:[#allocation169_spill] sm:$0xff] }
0x1aba   : > { %v4923_v23 = vadd.f32 %v4922_v16, %v4652_v63  ;;  %v4994_v7 = vadd.f32 %v4993_v1, %v4660_v20  ;;  %v11511_v63 = vld [vmem:[#allocation146_spill] sm:$0xff]  ;;  %v11512_v20 = vld [vmem:[#allocation147_spill] sm:$0xff]  ;;  %v11516_v16 = vld [vmem:[#allocation165_spill] sm:$0xff]  ;;  %v4676_v34 = vrot.slane %v11498_v12, %v4643_v14 }
0x1abb   : > { %v7592_v24 = vpack.c.bf16 %v11512_v20, %v11511_v63  ;;  %v11534_v19 = vld [vmem:[#allocation201_spill] sm:$0xff]  ;;  %v11537_v63 = vld [vmem:[#allocation184_spill] sm:$0xff] }
0x1abc   : > { %v5285_v41 = vmax.f32 %v4923_v23, 0.0  ;;  %v5287_v40 = vmax.f32 %v4994_v7, 0.0  ;;  %7581 = vmatpush3.bf16.msra.mxu0 %v7580_v62  ;;  %7613 = vmatpush3.bf16.msra.mxu1 %v7612_v11  ;;  %v11514_v62 = vld [vmem:[#allocation179_spill] sm:$0xff]  ;;  %v11515_v11 = vld [vmem:[#allocation164_spill] sm:$0xff]  ;;  %v11520_v23 = vld [vmem:[#allocation149_spill] sm:$0xff] }
0x1abd   : > { %7583 = vmatprep.subr.bf16.mxu0 %v7582_v21  ;;  %7615 = vmatprep.subr.bf16.mxu1 %v7614_v29  ;;  %v7624_v6 = vpack.c.bf16 %v11514_v62, %v11513_v49  ;;  %v7594_v1 = vpack.c.bf16 %v11516_v16, %v11515_v11  ;;  %v7626_v21 = vpack.c.bf16 %v11518_v37, %v11517_v61  ;;  %v11519_v29 = vld [vmem:[#allocation148_spill] sm:$0xff]  ;;  %v11538_v20 = vld [vmem:[#allocation185_spill] sm:$0xff]  ;;  %v11539_v49 = vld [vmem:[#allocation218_spill] sm:$0xff] }
0x1abe   : > { %5506 = vmatprep.mubr.f32.mxu0 %v5285_v41  ;;  %5576 = vmatprep.mubr.f32.mxu1 %v5287_v40  ;;  %v7596_v7 = vpack.c.bf16 %v11520_v23, %v11519_v29  ;;  %v11521_v41 = vld [vmem:[#allocation180_spill] sm:$0xff]  ;;  %v11522_v40 = vld [vmem:[#allocation181_spill] sm:$0xff]  ;;  %v11540_v62 = vld [vmem:[#allocation219_spill] sm:$0xff]  ;;  %v4992_v11 = vadd.f32 %v10370_v5, %v4656_v26 }
0x1abf   : > { %v7628_v43 = vpack.c.bf16 %v11522_v40, %v11521_v41  ;;  %v11542_v16 = vld [vmem:[#allocation251_spill] sm:$0xff]  ;;  %v11543_v37 = vld [vmem:[#allocation202_spill] sm:$0xff]  ;;  %v11547_v41 = vld [vmem:[#allocation220_spill] sm:$0xff] }
0x1ac0   : > { %v10389_v2 = vpop.f32.mrb[4].mxu0  ;;  %v5133_v45 = vpop.f32.mrb[4].mxu1  ;;  %7585 = vmatpush3.bf16.msra.mxu0 %v7584_v58  ;;  %7617 = vmatpush3.bf16.msra.mxu1 %v7616_v22  ;;  %v11524_v58 = vld [vmem:[#allocation167_spill] sm:$0xff]  ;;  %v5286_v29 = vmax.f32 %v4992_v11, 0.0  ;;  %v11545_v23 = vld [vmem:[#allocation234_spill] sm:$0xff]  ;;  %v11548_v40 = vld [vmem:[#allocation221_spill] sm:$0xff] }
0x1ac1   : > { %v10395_v18 = vadd.f32 %v5133_v45, %v4672_v35  ;;  %v5064_v44 = vpop.f32.mrb[5].mxu0  ;;  %v5135_v4 = vpop.f32.mrb[5].mxu1  ;;  %7587 = vmatprep.subr.bf16.mxu0 %v7586_v57  ;;  %7619 = vmatprep.subr.bf16.mxu1 %v7618_v31  ;;  %v7598_v32 = vpack.c.bf16 %v11524_v58, %v11523_v33  ;;  %v11526_v57 = vld [vmem:[#allocation199_spill] sm:$0xff]  ;;  %v11527_v31 = vld [vmem:[#allocation150_spill] sm:$0xff]  ;;  %v11549_v33 = vld [vmem:[#allocation252_spill] sm:$0xff] }
0x1ac2   : > { %v7630_v8 = vpack.c.bf16 %v11526_v57, %v11525_v13  ;;  %v11528_v45 = vld [vmem:[#allocation151_spill] sm:$0xff]  ;;  %v5136_v61 = vadd.f32 %v5135_v4, %v4676_v34  ;;  %v11550_v58 = vld [vmem:[#allocation253_spill] sm:$0xff]  ;;  %v11571_v11 = vld [vmem:[#allocation226_spill] sm:$0xff] }
0x1ac3   : > { %v7600_v17 = vpack.c.bf16 %v11528_v45, %v11527_v31  ;;  %v11552_v13 = vld [vmem:[#allocation205_spill] sm:$0xff]  ;;  %v11555_v45 = vld [vmem:[#allocation222_spill] sm:$0xff] }
0x1ac4   : > { %7589 = vmatpush3.bf16.msra.mxu0 %v7588_v52  ;;  %7621 = vmatpush3.bf16.msra.mxu1 %v7620_v51  ;;  %v11530_v52 = vld [vmem:[#allocation183_spill] sm:$0xff]  ;;  %v11531_v51 = vld [vmem:[#allocation168_spill] sm:$0xff]  ;;  %v5291_v4 = vmax.f32 %v5136_v61, 0.0  ;;  %v11564_v34 = vld [vmem:[#allocation225_spill] sm:$0xff] }
0x1ac5   : > { %7591 = vmatprep.subr.bf16.mxu0 %v7590_v48  ;;  %7623 = vmatprep.subr.bf16.mxu1 %v7622_v47  ;;  %v7632_v55 = vpack.c.bf16 %v11530_v52, %v11529_v25  ;;  %v7602_v10 = vpack.c.bf16 %v11532_v50, %v11531_v51  ;;  %v11533_v48 = vld [vmem:[#allocation200_spill] sm:$0xff]  ;;  %v4668_v47 = vrot.slane %v11498_v12, %v4635_v0  ;;  %v11541_v0 = vld [vmem:[#allocation250_spill] sm:$0xff]  ;;  %v11560_v50 = vld [vmem:[#allocation207_spill] sm:$0xff] }
0x1ac6   : > { %v7634_v9 = vpack.c.bf16 %v11534_v19, %v11533_v48  ;;  %v7670_v14 = vpack.c.bf16 %v11542_v16, %v11541_v0  ;;  %v11557_v52 = vld [vmem:[#allocation254_spill] sm:$0xff]  ;;  %v11562_v19 = vld [vmem:[#allocation239_spill] sm:$0xff] }
0x1ac7   : > { %v11559_v51 = vld [vmem:[#allocation206_spill] sm:$0xff]  ;;  %v11572_v0 = vld [vmem:[#allocation227_spill] sm:$0xff] }
0x1ac8   : > { %v5204_v53 = vpop.f32.mrb[6].mxu0  ;;  %v5275_v56 = vpop.f32.mrb[6].mxu1  ;;  %7593 = vmatpush3.bf16.msra.mxu0 %v7592_v24  ;;  %7625 = vmatpush3.bf16.msra.mxu1 %v7624_v6  ;;  %v7636_v24 = vpack.c.bf16 %v11538_v20, %v11537_v63  ;;  %v7638_v6 = vpack.c.bf16 %v11540_v62, %v11539_v49  ;;  %v11561_v48 = vld [vmem:[#allocation238_spill] sm:$0xff]  ;;  %v11567_v20 = vld [vmem:[#allocation208_spill] sm:$0xff]  ;;  %v7654_v16 = vpack.c.bf16 %v11572_v0, %v11571_v11  ;;  %v11604_v0 = vld [vmem:[#allocation283_spill] sm:$0xff] }
0x1ac9   : > { %v10419_v15 = vadd.f32 %v5204_v53, %v4680_v27  ;;  %v10421_v22 = vadd.f32 %v5275_v56, %v4688_v54  ;;  %v10423_v35 = vpop.f32.mrb[7].mxu0  ;;  %v10425_v59 = vpop.f32.mrb[7].mxu1  ;;  %7595 = vmatprep.subr.bf16.mxu0 %v7594_v1  ;;  %7627 = vmatprep.subr.bf16.mxu1 %v7626_v21  ;;  %v11535_v27 = vld [vmem:[#allocation152_spill] sm:$0xff]  ;;  %v4921_v54 = vadd.f32 %v10368_v30, %v4648_v60  ;;  %v11544_v21 = vld [vmem:[#allocation203_spill] sm:$0xff]  ;;  %v11554_v60 = vld [vmem:[#allocation237_spill] sm:$0xff] }
0x1aca   : > { %v7604_v3 = vpack.c.bf16 %v11536_v42, %v11535_v27  ;;  %v5065_v1 = vadd.f32 %v5064_v44, %v4668_v47  ;;  %v7640_v53 = vpack.c.bf16 %v11544_v21, %v11543_v37  ;;  %v11546_v30 = vld [vmem:[#allocation235_spill] sm:$0xff]  ;;  %v7674_v44 = vpack.c.bf16 %v11550_v58, %v11549_v33  ;;  %v11563_v47 = vld [vmem:[#allocation224_spill] sm:$0xff]  ;;  %v11575_v37 = vld [vmem:[#allocation210_spill] sm:$0xff] }
0x1acb   : > { %v5284_v56 = vmax.f32 %v4921_v54, 0.0  ;;  %v7650_v27 = vpack.c.bf16 %v11564_v34, %v11563_v47  ;;  %v11565_v42 = vld [vmem:[#allocation256_spill] sm:$0xff]  ;;  %v11576_v21 = vld [vmem:[#allocation211_spill] sm:$0xff]  ;;  %v11584_v58 = vld [vmem:[#allocation213_spill] sm:$0xff] }
0x1acc   : > { %7597 = vmatpush3.bf16.msra.mxu0 %v7596_v7  ;;  %7629 = vmatpush3.bf16.msra.mxu1 %v7628_v43  ;;  %v7672_v7 = vpack.c.bf16 %v11546_v30, %v11545_v23  ;;  %v5289_v5 = vmax.f32 %v5065_v1, 0.0  ;;  %v7642_v43 = vpack.c.bf16 %v11548_v40, %v11547_v41  ;;  %v11569_v62 = vld [vmem:[#allocation240_spill] sm:$0xff]  ;;  %v11574_v1 = vld [vmem:[#allocation259_spill] sm:$0xff]  ;;  %v11582_v40 = vld [vmem:[#allocation261_spill] sm:$0xff] }
0x1acd   : > { %7599 = vmatprep.subr.bf16.mxu0 %v7598_v32  ;;  %7631 = vmatprep.subr.bf16.mxu1 %v7630_v8  ;;  %v11551_v32 = vld [vmem:[#allocation204_spill] sm:$0xff]  ;;  %v11598_v34 = vld [vmem:[#allocation265_spill] sm:$0xff]  ;;  %v11603_v11 = vld [vmem:[#allocation282_spill] sm:$0xff] }
0x1ace   : > { %v7644_v57 = vpack.c.bf16 %v11552_v13, %v11551_v32  ;;  %v11553_v8 = vld [vmem:[#allocation236_spill] sm:$0xff]  ;;  %v11586_v32 = vld [vmem:[#allocation245_spill] sm:$0xff] }
0x1acf   : > { %v7676_v31 = vpack.c.bf16 %v11554_v60, %v11553_v8  ;;  %v11579_v30 = vld [vmem:[#allocation228_spill] sm:$0xff]  ;;  %v11588_v8 = vld [vmem:[#allocation231_spill] sm:$0xff] }
0x1ad0   : > { %7601 = vmatpush3.bf16.msra.mxu0 %v7600_v17  ;;  %7633 = vmatpush3.bf16.msra.mxu1 %v7632_v55  ;;  %v11556_v17 = vld [vmem:[#allocation223_spill] sm:$0xff]  ;;  %v11581_v41 = vld [vmem:[#allocation260_spill] sm:$0xff] }
0x1ad1   : > { %7603 = vmatprep.subr.bf16.mxu0 %v7602_v10  ;;  %7635 = vmatprep.subr.bf16.mxu1 %v7634_v9  ;;  %v7646_v25 = vpack.c.bf16 %v11556_v17, %v11555_v45  ;;  %v11558_v55 = vld [vmem:[#allocation255_spill] sm:$0xff]  ;;  %v7648_v10 = vpack.c.bf16 %v11560_v50, %v11559_v51  ;;  %v7680_v9 = vpack.c.bf16 %v11562_v19, %v11561_v48  ;;  %v11583_v33 = vld [vmem:[#allocation212_spill] sm:$0xff]  ;;  %v11593_v51 = vld [vmem:[#allocation246_spill] sm:$0xff] }
0x1ad2   : > { %v7678_v26 = vpack.c.bf16 %v11558_v55, %v11557_v52  ;;  %v11590_v45 = vld [vmem:[#allocation263_spill] sm:$0xff]  ;;  %v11595_v48 = vld [vmem:[#allocation232_spill] sm:$0xff]  ;;  %v11596_v19 = vld [vmem:[#allocation233_spill] sm:$0xff] }
0x1ad3   : > { %v11592_v52 = vld [vmem:[#allocation215_spill] sm:$0xff]  ;;  %v11597_v47 = vld [vmem:[#allocation264_spill] sm:$0xff] }
0x1ad4   : > { %7605 = vmatpush3.bf16.msra.mxu0 %v7604_v3  ;;  %7637 = vmatpush3.bf16.msra.mxu1 %v7636_v24  ;;  %v11566_v3 = vld [vmem:[#allocation257_spill] sm:$0xff]  ;;  %v11594_v50 = vld [vmem:[#allocation247_spill] sm:$0xff] }
0x1ad5   : > { %7639 = vmatprep.subr.bf16.mxu0 %v7638_v6  ;;  %7671 = vmatprep.subr.bf16.mxu1 %v7670_v14  ;;  %v7682_v63 = vpack.c.bf16 %v11566_v3, %v11565_v42  ;;  %v11568_v24 = vld [vmem:[#allocation209_spill] sm:$0xff]  ;;  %v11573_v14 = vld [vmem:[#allocation258_spill] sm:$0xff]  ;;  %v4684_v42 = vrot.slane %v11498_v12, %v4651_v36  ;;  %v4692_v3 = vrot.slane %v11498_v12, %v4659_v46 }
0x1ad6   : > { %v7652_v49 = vpack.c.bf16 %v11568_v24, %v11567_v20  ;;  %v11570_v6 = vld [vmem:[#allocation241_spill] sm:$0xff]  ;;  %v7686_v61 = vpack.c.bf16 %v11574_v1, %v11573_v14  ;;  %v11605_v36 = vld [vmem:[#allocation314_spill] sm:$0xff]  ;;  %v11606_v14 = vld [vmem:[#allocation315_spill] sm:$0xff] }
0x1ad7   : > { %5507 = vmatmul.mubr.f32.vlgmr.msra.gmra.mrb[10].mxu0 %v5284_v56  ;;  %5577 = vmatmul.mubr.f32.vlgmr.msra.gmra.mrb[10].mxu1 %v5286_v29  ;;  %v7684_v54 = vpack.c.bf16 %v11570_v6, %v11569_v62  ;;  %v11577_v56 = vld [vmem:[#allocation242_spill] sm:$0xff]  ;;  %v11578_v29 = vld [vmem:[#allocation243_spill] sm:$0xff]  ;;  %v11600_v20 = vld [vmem:[#allocation217_spill] sm:$0xff]  ;;  %v7734_v39 = vpack.c.bf16 %v11606_v14, %v11605_v36  ;;  %v5207_v46 = vadd.f32 %v10423_v35, %v4684_v42 }
0x1ad8   : > { %7641 = vmatpush3.bf16.msra.mxu0 %v7640_v53  ;;  %5646 = vmatprep.mubr.f32.mxu0 %v5289_v5  ;;  %v7656_v53 = vpack.c.bf16 %v11576_v21, %v11575_v37  ;;  %v7688_v23 = vpack.c.bf16 %v11578_v29, %v11577_v56  ;;  %v11601_v62 = vld [vmem:[#allocation248_spill] sm:$0xff]  ;;  %v11602_v6 = vld [vmem:[#allocation249_spill] sm:$0xff]  ;;  %v11607_v1 = vld [vmem:[#allocation266_spill] sm:$0xff]  ;;  %v5290_v29 = vmax.f32 %v10395_v18, 0.0 }
0x1ad9   : > { %7673 = vmatpush3.bf16.msra.mxu1 %v7672_v7  ;;  %5716 = vmatprep.mubr.f32.mxu1 %v5291_v4  ;;  %v11580_v7 = vld [vmem:[#allocation229_spill] sm:$0xff]  ;;  %v11585_v4 = vld [vmem:[#allocation244_spill] sm:$0xff]  ;;  %v11609_v21 = vld [vmem:[#allocation298_spill] sm:$0xff] }
0x1ada   : > { %7643 = vmatprep.subr.bf16.mxu0 %v7642_v43  ;;  %7675 = vmatprep.subr.bf16.mxu1 %v7674_v44  ;;  %v7658_v5 = vpack.c.bf16 %v11580_v7, %v11579_v30  ;;  %v7690_v43 = vpack.c.bf16 %v11582_v40, %v11581_v41  ;;  %v7660_v44 = vpack.c.bf16 %v11584_v58, %v11583_v33  ;;  %v11612_v30 = vld [vmem:[#allocation285_spill] sm:$0xff]  ;;  %v11613_v35 = vld [vmem:[#allocation316_spill] sm:$0xff]  ;;  %v11641_v36 = vld [vmem:[#allocation306_spill] sm:$0xff] }
0x1adb   : > { %v7692_v13 = vpack.c.bf16 %v11586_v32, %v11585_v4  ;;  %v11616_v33 = vld [vmem:[#allocation269_spill] sm:$0xff]  ;;  %v11619_v32 = vld [vmem:[#allocation286_spill] sm:$0xff]  ;;  %v11633_v42 = vld [vmem:[#allocation304_spill] sm:$0xff] }
0x1adc   : > { %7645 = vmatpush3.bf16.msra.mxu0 %v7644_v57  ;;  %v11587_v57 = vld [vmem:[#allocation230_spill] sm:$0xff]  ;;  %v11618_v4 = vld [vmem:[#allocation301_spill] sm:$0xff]  ;;  %v11642_v14 = vld [vmem:[#allocation307_spill] sm:$0xff] }
0x1add   : > { %7677 = vmatpush3.bf16.msra.mxu1 %v7676_v31  ;;  %7647 = vmatprep.subr.bf16.mxu0 %v7646_v25  ;;  %v7662_v60 = vpack.c.bf16 %v11588_v8, %v11587_v57  ;;  %v11589_v31 = vld [vmem:[#allocation262_spill] sm:$0xff] }
0x1ade   : > { %7679 = vmatprep.subr.bf16.mxu1 %v7678_v26  ;;  %v7694_v17 = vpack.c.bf16 %v11590_v45, %v11589_v31  ;;  %v11591_v25 = vld [vmem:[#allocation214_spill] sm:$0xff]  ;;  %v4664_v26 = vrot.slane %v11498_v12, %v10198_v38  ;;  %v5278_v12 = vadd.f32 %v10425_v59, %v4692_v3  ;;  %v11614_v59 = vld [vmem:[#allocation317_spill] sm:$0xff] }
0x1adf   : > { %v7664_v55 = vpack.c.bf16 %v11592_v52, %v11591_v25  ;;  %v7738_v41 = vpack.c.bf16 %v11614_v59, %v11613_v35  ;;  %v11621_v8 = vld [vmem:[#allocation318_spill] sm:$0xff]  ;;  %v11634_v3 = vld [vmem:[#allocation305_spill] sm:$0xff] }
0x1ae0   : > { %7649 = vmatpush3.bf16.msra.mxu0 %v7648_v10  ;;  %v7696_v10 = vpack.c.bf16 %v11594_v50, %v11593_v51  ;;  %v5295_v40 = vmax.f32 %v5278_v12, 0.0  ;;  %v11623_v45 = vld [vmem:[#allocation270_spill] sm:$0xff]  ;;  %v11627_v51 = vld [vmem:[#allocation288_spill] sm:$0xff]  ;;  %v11628_v50 = vld [vmem:[#allocation289_spill] sm:$0xff] }
0x1ae1   : > { %7681 = vmatpush3.bf16.msra.mxu1 %v7680_v9  ;;  %7651 = vmatprep.subr.bf16.mxu0 %v7650_v27  ;;  %v7666_v9 = vpack.c.bf16 %v11596_v19, %v11595_v48  ;;  %v7698_v27 = vpack.c.bf16 %v11598_v34, %v11597_v47  ;;  %v11625_v52 = vld [vmem:[#allocation302_spill] sm:$0xff]  ;;  %v11629_v48 = vld [vmem:[#allocation320_spill] sm:$0xff]  ;;  %v11630_v19 = vld [vmem:[#allocation321_spill] sm:$0xff] }
0x1ae2   : > { %7683 = vmatprep.subr.bf16.mxu1 %v7682_v63  ;;  %v11599_v63 = vld [vmem:[#allocation216_spill] sm:$0xff]  ;;  %v11632_v34 = vld [vmem:[#allocation273_spill] sm:$0xff]  ;;  %v11653_v59 = vld [vmem:[#allocation326_spill] sm:$0xff] }
0x1ae3   : > { %v7668_v24 = vpack.c.bf16 %v11600_v20, %v11599_v63  ;;  %v11631_v47 = vld [vmem:[#allocation272_spill] sm:$0xff]  ;;  %v7748_v63 = vpack.c.bf16 %v11634_v3, %v11633_v42  ;;  %v11635_v20 = vld [vmem:[#allocation290_spill] sm:$0xff]  ;;  %v11644_v12 = vld [vmem:[#allocation293_spill] sm:$0xff] }
0x1ae4   : > { %7653 = vmatpush3.bf16.msra.mxu0 %v7652_v49  ;;  %v5063_v49 = vadd.f32 %v10389_v2, %v4664_v26 }
0x1ae5   : > { %7685 = vmatpush3.bf16.msra.mxu1 %v7684_v54  ;;  %7655 = vmatprep.subr.bf16.mxu0 %v7654_v16  ;;  %v7700_v54 = vpack.c.bf16 %v11602_v6, %v11601_v62  ;;  %v7702_v16 = vpack.c.bf16 %v11604_v0, %v11603_v11  ;;  %v11637_v62 = vld [vmem:[#allocation322_spill] sm:$0xff]  ;;  %v11638_v6 = vld [vmem:[#allocation323_spill] sm:$0xff] }
0x1ae6   : > { %7687 = vmatprep.subr.bf16.mxu1 %v7686_v61  ;;  %v11608_v61 = vld [vmem:[#allocation267_spill] sm:$0xff]  ;;  %v5288_v37 = vmax.f32 %v5063_v49, 0.0  ;;  %v11639_v11 = vld [vmem:[#allocation274_spill] sm:$0xff] }
0x1ae7   : > { %v7704_v2 = vpack.c.bf16 %v11608_v61, %v11607_v1  ;;  %v11640_v0 = vld [vmem:[#allocation275_spill] sm:$0xff]  ;;  %v11645_v61 = vld [vmem:[#allocation324_spill] sm:$0xff] }
0x1ae8   : > { %7657 = vmatpush3.bf16.msra.mxu0 %v7656_v53  ;;  %v11610_v53 = vld [vmem:[#allocation299_spill] sm:$0xff] }
0x1ae9   : > { %7689 = vmatpush3.bf16.msra.mxu1 %v7688_v23  ;;  %7659 = vmatprep.subr.bf16.mxu0 %v7658_v5  ;;  %v7736_v56 = vpack.c.bf16 %v11610_v53, %v11609_v21  ;;  %v11611_v23 = vld [vmem:[#allocation284_spill] sm:$0xff]  ;;  %v5293_v5 = vmax.f32 %v5207_v46, 0.0  ;;  %v11648_v53 = vld [vmem:[#allocation277_spill] sm:$0xff] }
0x1aea   : > { %7691 = vmatprep.subr.bf16.mxu1 %v7690_v43  ;;  %v7706_v7 = vpack.c.bf16 %v11612_v30, %v11611_v23  ;;  %v11615_v43 = vld [vmem:[#allocation268_spill] sm:$0xff]  ;;  %v11650_v23 = vld [vmem:[#allocation309_spill] sm:$0xff] }
0x1aeb   : > { %v7708_v58 = vpack.c.bf16 %v11616_v33, %v11615_v43  ;;  %v11643_v46 = vld [vmem:[#allocation292_spill] sm:$0xff]  ;;  %v11655_v43 = vld [vmem:[#allocation278_spill] sm:$0xff]  ;;  %v11656_v33 = vld [vmem:[#allocation279_spill] sm:$0xff] }
0x1aec   : > { %7661 = vmatpush3.bf16.msra.mxu0 %v7660_v44  ;;  %v11617_v44 = vld [vmem:[#allocation300_spill] sm:$0xff]  ;;  %v7722_v1 = vpack.c.bf16 %v11644_v12, %v11643_v46 }
0x1aed   : > { %7693 = vmatpush3.bf16.msra.mxu1 %v7692_v13  ;;  %7663 = vmatprep.subr.bf16.mxu0 %v7662_v60  ;;  %v7740_v18 = vpack.c.bf16 %v11618_v4, %v11617_v44  ;;  %v11620_v13 = vld [vmem:[#allocation287_spill] sm:$0xff]  ;;  %v11647_v21 = vld [vmem:[#allocation276_spill] sm:$0xff]  ;;  %v11657_v44 = vld [vmem:[#allocation310_spill] sm:$0xff] }
0x1aee   : > { %7695 = vmatprep.subr.bf16.mxu1 %v7694_v17  ;;  %v7710_v57 = vpack.c.bf16 %v11620_v13, %v11619_v32  ;;  %v11622_v60 = vld [vmem:[#allocation319_spill] sm:$0xff]  ;;  %v11659_v32 = vld [vmem:[#allocation296_spill] sm:$0xff]  ;;  %v11660_v13 = vld [vmem:[#allocation297_spill] sm:$0xff] }
0x1aef   : > { %v7742_v31 = vpack.c.bf16 %v11622_v60, %v11621_v8  ;;  %v11624_v17 = vld [vmem:[#allocation271_spill] sm:$0xff]  ;;  %v11661_v8 = vld [vmem:[#allocation328_spill] sm:$0xff]  ;;  %v11662_v60 = vld [vmem:[#allocation329_spill] sm:$0xff] }
0x1af0   : > { %7665 = vmatpush3.bf16.msra.mxu0 %v7664_v55  ;;  %v7712_v25 = vpack.c.bf16 %v11624_v17, %v11623_v45  ;;  %v11626_v55 = vld [vmem:[#allocation303_spill] sm:$0xff]  ;;  %v11663_v45 = vld [vmem:[#allocation280_spill] sm:$0xff]  ;;  %v11664_v17 = vld [vmem:[#allocation281_spill] sm:$0xff] }
0x1af1   : > { %7697 = vmatpush3.bf16.msra.mxu1 %v7696_v10  ;;  %7667 = vmatprep.subr.bf16.mxu0 %v7666_v9  ;;  %v7744_v26 = vpack.c.bf16 %v11626_v55, %v11625_v52  ;;  %v7714_v10 = vpack.c.bf16 %v11628_v50, %v11627_v51  ;;  %v7746_v9 = vpack.c.bf16 %v11630_v19, %v11629_v48  ;;  %v11658_v4 = vld [vmem:[#allocation311_spill] sm:$0xff]  ;;  %v11665_v52 = vld [vmem:[#allocation312_spill] sm:$0xff]  ;;  %v11666_v55 = vld [vmem:[#allocation313_spill] sm:$0xff]  ;;  %v5292_v51 = vmax.f32 %v10419_v15, 0.0 }
0x1af2   : > { %7699 = vmatprep.subr.bf16.mxu1 %v7698_v27  ;;  %v7716_v27 = vpack.c.bf16 %v11632_v34, %v11631_v47  ;;  %v5294_v50 = vmax.f32 %v10421_v22, 0.0  ;;  %v11667_v19 = vld [vmem:[#allocation330_spill] sm:$0xff] }
0x1af4   : > { %7669 = vmatpush3.bf16.msra.mxu0 %v7668_v24  ;;  %v11636_v24 = vld [vmem:[#allocation291_spill] sm:$0xff] }
0x1af5   : > { %7701 = vmatpush3.bf16.msra.mxu1 %v7700_v54  ;;  %7703 = vmatprep.subr.bf16.mxu0 %v7702_v16  ;;  %v7718_v49 = vpack.c.bf16 %v11636_v24, %v11635_v20  ;;  %v7750_v54 = vpack.c.bf16 %v11638_v6, %v11637_v62  ;;  %v7720_v16 = vpack.c.bf16 %v11640_v0, %v11639_v11 }
0x1af6   : > { %7735 = vmatprep.subr.bf16.mxu1 %v7734_v39  ;;  %v7752_v39 = vpack.c.bf16 %v11642_v14, %v11641_v36 }
0x1af7   : > { %5647 = vmatmul.mubr.f32.vlgmr.msra.gmra.mrb[12].mxu0 %v5288_v37 }
0x1af8   : > { %5717 = vmatmul.mubr.f32.vlgmr.msra.gmra.mrb[12].mxu1 %v5290_v29  ;;  %7705 = vmatpush3.bf16.msra.mxu0 %v7704_v2  ;;  %v11646_v2 = vld [vmem:[#allocation325_spill] sm:$0xff]  ;;  %v11649_v29 = vld [vmem:[#allocation308_spill] sm:$0xff] }
0x1af9   : > { %5786 = vmatprep.mubr.f32.mxu0 %v5293_v5  ;;  %7737 = vmatpush3.bf16.msra.mxu1 %v7736_v56  ;;  %v7754_v37 = vpack.c.bf16 %v11646_v2, %v11645_v61  ;;  %v7724_v56 = vpack.c.bf16 %v11648_v53, %v11647_v21  ;;  %v7756_v30 = vpack.c.bf16 %v11650_v23, %v11649_v29  ;;  %v11652_v5 = vld [vmem:[#allocation295_spill] sm:$0xff] }
0x1afa   : > { %5856 = vmatprep.mubr.f32.mxu1 %v5295_v40  ;;  %7707 = vmatprep.subr.bf16.mxu0 %v7706_v7  ;;  %v11651_v7 = vld [vmem:[#allocation294_spill] sm:$0xff] }
0x1afb   : > { %7739 = vmatprep.subr.bf16.mxu1 %v7738_v41  ;;  %v7726_v35 = vpack.c.bf16 %v11652_v5, %v11651_v7  ;;  %v11654_v41 = vld [vmem:[#allocation327_spill] sm:$0xff] }
0x1afc   : > { %7709 = vmatpush3.bf16.msra.mxu0 %v7708_v58  ;;  %v7758_v40 = vpack.c.bf16 %v11654_v41, %v11653_v59  ;;  %v7728_v58 = vpack.c.bf16 %v11656_v33, %v11655_v43 }
0x1afd   : > { %7741 = vmatpush3.bf16.msra.mxu1 %v7740_v18  ;;  %7711 = vmatprep.subr.bf16.mxu0 %v7710_v57  ;;  %v7760_v18 = vpack.c.bf16 %v11658_v4, %v11657_v44  ;;  %v7730_v57 = vpack.c.bf16 %v11660_v13, %v11659_v32 }
0x1afe   : > { %7743 = vmatprep.subr.bf16.mxu1 %v7742_v31  ;;  %v7762_v31 = vpack.c.bf16 %v11662_v60, %v11661_v8 }
0x1b00   : > { %7713 = vmatpush3.bf16.msra.mxu0 %v7712_v25  ;;  %v7732_v25 = vpack.c.bf16 %v11664_v17, %v11663_v45 }
0x1b01   : > { %7745 = vmatpush3.bf16.msra.mxu1 %v7744_v26  ;;  %7715 = vmatprep.subr.bf16.mxu0 %v7714_v10  ;;  %v7764_v26 = vpack.c.bf16 %v11666_v55, %v11665_v52 }
0x1b02   : > { %7747 = vmatprep.subr.bf16.mxu1 %v7746_v9  ;;  %v5300_v9 = vrot.slane %v11667_v19, %v10198_v38 }
0x1b04   : > { %7717 = vmatpush3.bf16.msra.mxu0 %v7716_v27 }
0x1b05   : > { %7749 = vmatpush3.bf16.msra.mxu1 %v7748_v63  ;;  %7719 = vmatprep.subr.bf16.mxu0 %v7718_v49 }
0x1b06   : > { %7751 = vmatprep.subr.bf16.mxu1 %v7750_v54 }
0x1b08   : > { %7721 = vmatpush3.bf16.msra.mxu0 %v7720_v16 }
0x1b09   : > { %7753 = vmatpush3.bf16.msra.mxu1 %v7752_v39  ;;  %7723 = vmatprep.subr.bf16.mxu0 %v7722_v1 }
0x1b0a   : > { %7755 = vmatprep.subr.bf16.mxu1 %v7754_v37 }
0x1b0c   : > { %7725 = vmatpush3.bf16.msra.mxu0 %v7724_v56 }
0x1b0d   : > { %7757 = vmatpush3.bf16.msra.mxu1 %v7756_v30  ;;  %7727 = vmatprep.subr.bf16.mxu0 %v7726_v35 }
0x1b0e   : > { %7759 = vmatprep.subr.bf16.mxu1 %v7758_v40 }
0x1b10   : > { %7729 = vmatpush3.bf16.msra.mxu0 %v7728_v58  ;;  %v11668_v58 = vld [vmem:[#allocation331_spill] sm:$0xff] }
0x1b11   : > { %7761 = vmatpush3.bf16.msra.mxu1 %v7760_v18  ;;  %7731 = vmatprep.subr.bf16.mxu0 %v7730_v57  ;;  %v5880_v44 = vrot.slane %v11668_v58, %v10198_v38 }
0x1b12   : > { %7763 = vmatprep.subr.bf16.mxu1 %v7762_v31 }
0x1b14   : > { %7733 = vmatpush3.bf16.msra.mxu0 %v7732_v25 }
0x1b15   : > { %7765 = vmatpush3.bf16.msra.mxu1 %v7764_v26 }
0x1b17   : > { %5787 = vmatmul.mubr.f32.vlgmr.msra.gmra.mrb[14].mxu0 %v5292_v51 }
0x1b18   : > { %5857 = vmatmul.mubr.f32.vlgmr.msra.gmra.mrb[14].mxu1 %v5294_v50 }
0x1b8a   : > { %v6613_v10 = vpop.f32.mrb[8].mxu0  ;;  %v6648_v48 = vpop.f32.mrb[8].mxu1 }
0x1b8b   : > { %v6614_v47 = vpop.f32.mrb[9].mxu0  ;;  %v6649_v34 = vpop.f32.mrb[9].mxu1 }
0x1b8c   : > { %v6615_v27 = vadd.f32 %v6614_v47, %v6613_v10  ;;  %v6650_v42 = vadd.f32 %v6649_v34, %v6648_v48 }
0x1b8e   : > { %v5369_v3 = vadd.f32 %v6615_v27, %v5300_v9 }
0x1b90   : > { %v5439_v63 = vadd.f32 %v6650_v42, %v5369_v3 }
0x1baa   : > { %v6683_v20 = vpop.f32.mrb[10].mxu0  ;;  %v6718_v24 = vpop.f32.mrb[10].mxu1 }
0x1bab   : > { %v6684_v49 = vpop.f32.mrb[11].mxu0  ;;  %v6719_v15 = vpop.f32.mrb[11].mxu1 }
0x1bac   : > { %v6685_v62 = vadd.f32 %v6684_v49, %v6683_v20  ;;  %v6720_v6 = vadd.f32 %v6719_v15, %v6718_v24 }
0x1bae   : > { %v5509_v22 = vadd.f32 %v6685_v62, %v5439_v63 }
0x1bb0   : > { %v5579_v54 = vadd.f32 %v6720_v6, %v5509_v22 }
0x1bca   : > { %v6753_v11 = vpop.f32.mrb[12].mxu0 }
0x1bcb   : > { %v6788_v0 = vpop.f32.mrb[12].mxu1  ;;  %v6754_v16 = vpop.f32.mrb[13].mxu0 }
0x1bcc   : > { %v6755_v36 = vadd.f32 %v6754_v16, %v6753_v11  ;;  %v6789_v14 = vpop.f32.mrb[13].mxu1 }
0x1bcd   : > { %v6790_v39 = vadd.f32 %v6789_v14, %v6788_v0 }
0x1bce   : > { %v5649_v46 = vadd.f32 %v6755_v36, %v5579_v54 }
0x1bd0   : > { %v5719_v12 = vadd.f32 %v6790_v39, %v5649_v46 }
0x1bea   : > { %v6823_v1 = vpop.f32.mrb[14].mxu0 }
0x1beb   : > { %v6858_v61 = vpop.f32.mrb[14].mxu1  ;;  %v6824_v2 = vpop.f32.mrb[15].mxu0 }
0x1bec   : > { %v6825_v37 = vadd.f32 %v6824_v2, %v6823_v1  ;;  %v6859_v21 = vpop.f32.mrb[15].mxu1 }
0x1bed   : > { %v6860_v53 = vadd.f32 %v6859_v21, %v6858_v61 }
0x1bee   : > { %v5789_v56 = vadd.f32 %v6825_v37, %v5719_v12 }
0x1bf0   : > { %v5859_v29 = vadd.f32 %v6860_v53, %v5789_v56 }
0x1bf2   : > { %v5862_v23 = vadd.f32 %v5859_v29, %v10208_v28  ;;  %v11669_v28 = vld [vmem:[#allocation332_spill] sm:$0xff] }
0x1bf3   : > { %v5887_v18 = vrot.slane %v11669_v28, %v10198_v38 }
0x1bf4   : > { %v5863_v30 = vsel %vm4598_vm2, %v5862_v23, 0.0 }
0x1bf5   : > { %5864 = vadd.xlane.f32.xlu1 %v5863_v30 }
0x1c82   : > { %v5865_v7 = vpop.xlane.xlu1 %5864 }
0x1c83   : > { %v5866_v5 = vmul.f32 0.03125, %v5865_v7 }
0x1c85   : > { %v5867_v35 = vsub.f32 %v5862_v23, %v5866_v5 }
0x1c87   : > { %v5868_v59 = vmul.f32 %v5867_v35, %v5867_v35 }
0x1c89   : > { %v5869_v41 = vsel %vm4598_vm2, %v5868_v59, 0.0 }
0x1c8a   : > { %5870 = vadd.xlane.f32.xlu1 %v5869_v41 }
0x1d17   : > { %v5871_v40 = vpop.xlane.xlu1 %5870 }
0x1d18   : > { %v5872_v43 = vmul.f32 0.03125, %v5871_v40 }
0x1d1a   : > { %v5873_v33 = vadd.f32 1e-05, %v5872_v43 }
0x1d1c   : > { %7959 = vrsqrt.f32 %v5873_v33 }
0x1d26   : > { %v7960_v4 = vpop.eup %7959 }
0x1d27   : > { %v5875_v32 = vmul.f32 %v7960_v4, %v5867_v35 }
0x1d29   : > { %v5882_v13 = vmul.f32 %v5880_v44, %v5875_v32 }
0x1d2b   : > { %v5889_v57 = vadd.f32 %v5887_v18, %v5882_v13 }
0x1d2d   : > { %5890 = vst.msk [vmem:[#allocation3] sm:$0x3] %vm4598_vm2, %v5889_v57 }
0x1d2e PF: > { %p7770_p7 = scmp.eq.s32.totalorder %s8111_s22, 1  ;;  %s8019_s23 = smov [#allocation3]  }
0x1d2f   : > { %s5898_s28 = sshll.u32 %s8019_s23, 4  ;;  %s5899_s28 = int_to_ptr.vmem [resolvable:$true] %s5898_s28 }
0x1d30   : > { %s7961_s0 = scalar_lea.vmem %s5899_s28, 32  ;;  %p7968_p11 = scmp.lt.s32.totalorder %s5899_s28, %s5899_s28 }
0x1d31   : > { %p7962_p8 = scmp.ne.s32.totalorder %s5899_s28, %s7961_s0  ;;  %p7969_p12 = scmp.lt.s32.totalorder %s7961_s0, %s7961_s0 }
0x1d33   : > { %p7963_p9 = pnand %p7962_p8, %p7770_p7  ;;  %p7970_p13 = por %p7969_p12, %p7968_p11 }
0x1d35   : > { %p7964_p10 = pneg %p7963_p9 }
0x1d37   : > { %p7971_p0 = pnand %p7970_p13, %p7964_p10 }
0x1d39   : > { %7974 = shalt.err (!%p7971_p0)
}
0x1d3a   : > { %s11670_s2 = sld [smem:[#allocation339_spill]] }
0x1d40   : > { %s7975_s6 = scalar_lea.hbm %s11670_s2, 32 }
0x1d41   : > { %p7976_p1 = scmp.ne.s32.totalorder %s11670_s2, %s7975_s6  ;;  %p7981_p4 = scmp.lt.u32.totalorder %s7975_s6, %s11670_s2 }
0x1d43   : > { %p7977_p2 = pnand %p7976_p1, %p7770_p7 }
0x1d45   : > { %p7978_p3 = pneg %p7977_p2 }
0x1d47   : > { %p7983_p5 = pnand %p7981_p4, %p7978_p3 }
0x1d49   : > { %7986 = shalt.err (!%p7983_p5)
}
0x1d4a   : > { %7767 = dma.vmem_to_hbm [thread:$0]  (%p7770_p7), %s5899_s28, 32, %s11670_s2, [#allocation4]  }
0x1d4b   : > { %7992 = dma.done.wait (%p7770_p7), [#allocation4], 32  }
0x1d4c   : > { %7994 = vsyncadd (%p7770_p7), [#allocation4], 4294967264 }
0x1d4d PF: > { %s11671_s21 = sld [smem:[#allocation6_spill]] }
0x1d53   : > { %s27_s21 = sadd.s32 1, %s11671_s21  }
0x1d54   : > { %p24_p6 = scmp.ge.s32.totalorder %s27_s21, 4  }
0x1d56   :  { %26 = sbr.rel (!%p24_p6) target bundleno = 9 (0x9), region = 156 }
0x1d5d   :  { %5911 = vsyncpa [#allocation4], 1 }
0x1d5e   :  { %5913 = vsyncpa [#allocation4 + $0x1], 1 }

</bundles_post_ra>
